<compile_context>
chip_gen: v7x
topology: tpu7x:2x2x1
jax: 0.10.0
libtpu: 0.0.40
codegen_flags: <defaults>
</compile_context>

<pallas_src>
import functools

import jax
import jax.numpy as jnp
from jax.experimental import pallas as pl
from jax.experimental.pallas import tpu as pltpu


WEIGHTS_DTYPE = jnp.bfloat16  # self.dtype in ToWeightsDType (half precision)
_SUBLANE = 16                 # bf16 min sublane tile
_MAX_B_BLOCK = 256            # batch tile when B is large (keeps h_f32 small)


def _to_weights_dtype_kernel(x_ref, w1_ref, b1_ref, w2_ref, b2_ref, o_ref):
    # Linear 1: bf16 x @ bf16 W1 on the MXU's native bf16 path, f32 accumulate.
    # The .astype calls are no-ops when params were prepared as bf16.
    x = x_ref[...].astype(jnp.bfloat16)
    w1 = w1_ref[...].astype(jnp.bfloat16)
    h = jnp.dot(x, w1, preferred_element_type=jnp.float32)
    h = h + b1_ref[...].astype(jnp.float32)   # f32 bias
    h = h * jax.nn.sigmoid(h)                 # SiLU in f32 (sigmoid -> EUP)
    # Linear 2: bf16 activation @ bf16 W2, f32 accumulate.
    w2 = w2_ref[...].astype(jnp.bfloat16)
    y = jnp.dot(h.astype(jnp.bfloat16), w2, preferred_element_type=jnp.float32)
    y = y + b2_ref[...].astype(jnp.float32)
    o_ref[...] = y.astype(o_ref.dtype)        # .to(self.dtype)


def prepare_timestep_embedding_params(w1, b1, w2, b2):
    """One-time (model setup) conversion: bf16 weights/biases, row-vector biases.

    Keep this OUT of the per-step jit so W2 is never round-tripped through an
    XLA convert on every call.
    """
    h_mid = w1.shape[1]
    h_out = w2.shape[1]
    return (w1.astype(jnp.bfloat16),
            b1.reshape(1, h_mid).astype(jnp.bfloat16),
            w2.astype(jnp.bfloat16),
            b2.reshape(1, h_out).astype(jnp.bfloat16))


@functools.partial(jax.jit, static_argnames=("dtype",))
def to_weights_dtype_forward(x, w1, b1, w2, b2, *, dtype=WEIGHTS_DTYPE):
    """Pallas implementation of ToWeightsDType(TimestepEmbedding(...), dtype)(x)."""
    B, c_in = x.shape
    h_mid = w1.shape[1]
    h_out = w2.shape[1]

    # x is tiny ([B, 16]); casting it per call is negligible and keeps the MXU
    # on its bf16 path.
    x_bf = x.astype(jnp.bfloat16)

    # Batch tiling: pad to a multiple of 16 rows (unmasked bf16 stores); for
    # large B, tile at 256 rows so the f32 intermediate stays small and the
    # "parallel" axis can shard across TensorCores (v7x).
    b16 = max(_SUBLANE, ((B + _SUBLANE - 1) // _SUBLANE) * _SUBLANE)
    block_b = b16 if b16 <= _MAX_B_BLOCK else _MAX_B_BLOCK
    b_pad = ((b16 + block_b - 1) // block_b) * block_b
    if b_pad != B:
        x_bf = jnp.pad(x_bf, ((0, b_pad - B), (0, 0)))
    nb = b_pad // block_b

    itemsize = lambda a: jnp.dtype(a.dtype).itemsize
    cost = pl.CostEstimate(
        flops=2 * b_pad * (c_in * h_mid + h_mid * h_out),
        transcendentals=b_pad * h_mid,  # sigmoid
        bytes_accessed=(x_bf.size * itemsize(x_bf)
                        + w1.size * itemsize(w1) + w2.size * itemsize(w2)
                        + b1.size * itemsize(b1) + b2.size * itemsize(b2)
                        + b_pad * h_out * jnp.dtype(dtype).itemsize),
    )

    grid_spec = pltpu.PrefetchScalarGridSpec(
        num_scalar_prefetch=0,
        grid=(nb,),
        in_specs=[
            pl.BlockSpec((block_b, c_in), lambda i: (i, 0)),   # x: per-block
            pl.BlockSpec((c_in, h_mid), lambda i: (0, 0)),     # W1: resident
            pl.BlockSpec((1, h_mid), lambda i: (0, 0)),        # b1: resident
            pl.BlockSpec((h_mid, h_out), lambda i: (0, 0)),    # W2: resident
            pl.BlockSpec((1, h_out), lambda i: (0, 0)),        # b2: resident
        ],
        out_specs=pl.BlockSpec((block_b, h_out), lambda i: (i, 0)),
    )

    out = pl.pallas_call(
        _to_weights_dtype_kernel,
        out_shape=jax.ShapeDtypeStruct((b_pad, h_out), dtype),
        grid_spec=grid_spec,
        compiler_params=pltpu.CompilerParams(
            dimension_semantics=("parallel",)),
        cost_estimate=cost,
    )(x_bf, w1, b1, w2, b2)

    return out[:B] if b_pad != B else out


def reference_forward(x, w1, b1, w2, b2, *, dtype=WEIGHTS_DTYPE):
    h = x @ w1 + b1
    h = h * jax.nn.sigmoid(h)
    y = h @ w2 + b2
    return y.astype(dtype)


if __name__ == "__main__":
    # Real TimestepEmbedding(in_channels=16, time_embed_dim=1280) dims so the
    # HBM-bound W2 path is exercised; still small (bf16 W2 = 3.3 MB).
    C_IN, H = 16, 1280

    key = jax.random.PRNGKey(0)
    kx, kw1, kb1, kw2, kb2 = jax.random.split(key, 5)

    w1 = jax.random.normal(kw1, (C_IN, H), dtype=jnp.float32) * 0.05
    b1 = jax.random.normal(kb1, (H,), dtype=jnp.float32) * 0.01
    w2 = jax.random.normal(kw2, (H, H), dtype=jnp.float32) * 0.05
    b2 = jax.random.normal(kb2, (H,), dtype=jnp.float32) * 0.01

    # One-time setup-side bf16 conversion (kept OUT of the per-step jit).
    params = jax.block_until_ready(
        prepare_timestep_embedding_params(w1, b1, w2, b2))

    ok = True
    # 16: dense single-block path; 5: row-padding path; 272: multi-block grid.
    for B in (16, 5, 272):
        x = jax.random.normal(jax.random.fold_in(kx, B), (B, C_IN),
                              dtype=jnp.float32)
        out = jax.block_until_ready(to_weights_dtype_forward(x, *params))
        ref = reference_forward(x, w1, b1, w2, b2)
        assert out.shape == (B, H)
        assert out.dtype == WEIGHTS_DTYPE
        ok &= bool(jnp.allclose(out.astype(jnp.float32),
                                ref.astype(jnp.float32),
                                atol=2e-2, rtol=2e-2))

    assert ok
    print("KERNEL_OK")
</pallas_src>

<mosaic_0001>
module attributes {stable_mosaic.version = 11 : i64} {
  func.func @_to_weights_dtype_kernel(%arg0: i32, %arg1: memref<16x16xbf16, #tpu.memory_space<vmem>>, %arg2: memref<16x1280xbf16, #tpu.memory_space<vmem>>, %arg3: memref<1x1280xbf16, #tpu.memory_space<vmem>>, %arg4: memref<1280x1280xbf16, #tpu.memory_space<vmem>>, %arg5: memref<1x1280xbf16, #tpu.memory_space<vmem>>, %arg6: memref<16x1280xbf16, #tpu.memory_space<vmem>>) attributes {dimension_semantics = [#tpu.dimension_semantics<parallel>], iteration_bounds = array<i64: 1>, scalar_prefetch = 0 : i64, scratch_operands = 0 : i64, tpu.core_type = #tpu.core_type<tc>, window_params = [{transform_indices = @transform_0, window_bounds = array<i64: 16, 16>}, {pipeline_mode = #tpu.pipeline_mode<synchronous>, transform_indices = @transform_1, window_bounds = array<i64: 16, 1280>}, {pipeline_mode = #tpu.pipeline_mode<synchronous>, transform_indices = @transform_2, window_bounds = array<i64: 1, 1280>}, {pipeline_mode = #tpu.pipeline_mode<synchronous>, transform_indices = @transform_3, window_bounds = array<i64: 1280, 1280>}, {pipeline_mode = #tpu.pipeline_mode<synchronous>, transform_indices = @transform_4, window_bounds = array<i64: 1, 1280>}, {transform_indices = @transform_5, window_bounds = array<i64: 16, 1280>}]} {
    %c0 = arith.constant 0 : index
    %c0_0 = arith.constant 0 : index
    %0 = vector.load %arg1[%c0, %c0_0] : memref<16x16xbf16, #tpu.memory_space<vmem>>, vector<16x16xbf16>
    %c0_1 = arith.constant 0 : index
    %c0_2 = arith.constant 0 : index
    %1 = vector.load %arg2[%c0_1, %c0_2] : memref<16x1280xbf16, #tpu.memory_space<vmem>>, vector<16x1280xbf16>
    %cst = arith.constant dense<0.000000e+00> : vector<16x1280xf32>
    %2 = tpu.matmul %0, %1, %cst {dimension_numbers = #tpu.dot_dimension_numbers<[1], [0], [0], [1], [0, 0, 1, 1], [], []>} : vector<16x16xbf16>, vector<16x1280xbf16>, vector<16x1280xf32> -> vector<16x1280xf32>
    %c0_3 = arith.constant 0 : index
    %c0_4 = arith.constant 0 : index
    %3 = vector.load %arg3[%c0_3, %c0_4] : memref<1x1280xbf16, #tpu.memory_space<vmem>>, vector<1x1280xbf16>
    %4 = arith.extf %3 : vector<1x1280xbf16> to vector<1x1280xf32>
    %5 = vector.broadcast %4 : vector<1x1280xf32> to vector<16x1280xf32>
    %6 = arith.addf %2, %5 : vector<16x1280xf32>
    %7 = arith.negf %6 : vector<16x1280xf32>
    %8 = math.exp %7 : vector<16x1280xf32>
    %cst_5 = arith.constant 1.000000e+00 : f32
    %9 = vector.broadcast %cst_5 : f32 to vector<16x1280xf32>
    %10 = arith.addf %9, %8 : vector<16x1280xf32>
    %11 = arith.divf %9, %10 : vector<16x1280xf32>
    %12 = arith.mulf %6, %11 : vector<16x1280xf32>
    %c0_6 = arith.constant 0 : index
    %c0_7 = arith.constant 0 : index
    %13 = vector.load %arg4[%c0_6, %c0_7] : memref<1280x1280xbf16, #tpu.memory_space<vmem>>, vector<1280x1280xbf16>
    %14 = arith.truncf %12 : vector<16x1280xf32> to vector<16x1280xbf16>
    %cst_8 = arith.constant dense<0.000000e+00> : vector<16x1280xf32>
    %15 = tpu.matmul %14, %13, %cst_8 {dimension_numbers = #tpu.dot_dimension_numbers<[1], [0], [0], [1], [0, 0, 1, 1], [], []>} : vector<16x1280xbf16>, vector<1280x1280xbf16>, vector<16x1280xf32> -> vector<16x1280xf32>
    %c0_9 = arith.constant 0 : index
    %c0_10 = arith.constant 0 : index
    %16 = vector.load %arg5[%c0_9, %c0_10] : memref<1x1280xbf16, #tpu.memory_space<vmem>>, vector<1x1280xbf16>
    %17 = arith.extf %16 : vector<1x1280xbf16> to vector<1x1280xf32>
    %18 = vector.broadcast %17 : vector<1x1280xf32> to vector<16x1280xf32>
    %19 = arith.addf %15, %18 : vector<16x1280xf32>
    %20 = arith.truncf %19 : vector<16x1280xf32> to vector<16x1280xbf16>
    %c0_11 = arith.constant 0 : index
    %c0_12 = arith.constant 0 : index
    %21 = vector.load %arg6[%c0_11, %c0_12] : memref<16x1280xbf16, #tpu.memory_space<vmem>>, vector<16x1280xbf16>
    tpu.vector_store %arg6[%c0_11, %c0_12], %20 {strides = array<i32>} : memref<16x1280xbf16, #tpu.memory_space<vmem>>, vector<16x1280xbf16>,
    return
  }
  func.func @transform_0(%arg0: i32) -> (i32, i32) {
    %c0_i32 = arith.constant 0 : i32
    %c0_i32_0 = arith.constant 0 : i32
    return %arg0, %c0_i32 : i32, i32
  }
  func.func @transform_1(%arg0: i32) -> (i32, i32) {
    %c0_i32 = arith.constant 0 : i32
    %c0_i32_0 = arith.constant 0 : i32
    %c0_i32_1 = arith.constant 0 : i32
    return %c0_i32, %c0_i32_0 : i32, i32
  }
  func.func @transform_2(%arg0: i32) -> (i32, i32) {
    %c0_i32 = arith.constant 0 : i32
    %c0_i32_0 = arith.constant 0 : i32
    %c0_i32_1 = arith.constant 0 : i32
    return %c0_i32, %c0_i32_0 : i32, i32
  }
  func.func @transform_3(%arg0: i32) -> (i32, i32) {
    %c0_i32 = arith.constant 0 : i32
    %c0_i32_0 = arith.constant 0 : i32
    %c0_i32_1 = arith.constant 0 : i32
    return %c0_i32, %c0_i32_0 : i32, i32
  }
  func.func @transform_4(%arg0: i32) -> (i32, i32) {
    %c0_i32 = arith.constant 0 : i32
    %c0_i32_0 = arith.constant 0 : i32
    %c0_i32_1 = arith.constant 0 : i32
    return %c0_i32, %c0_i32_0 : i32, i32
  }
  func.func @transform_5(%arg0: i32) -> (i32, i32) {
    %c0_i32 = arith.constant 0 : i32
    %c0_i32_0 = arith.constant 0 : i32
    return %arg0, %c0_i32 : i32, i32
  }
}

</mosaic_0001>

<bundles_post_ra>
// kernel: to_weights_dtype_forward.1
= control target key start
LH: loop header
LB: loop body
LE: loop exit
PB: predicated region body
PF: predicated region fallthrough
CT: control target
= control target key end

     0   :  { %10 = vsyncpa [#allocation3], 0  ;;  %s9392_s0 = inlined_call_operand.vmem [shape: bf16[16,16], index: 0, kind: input, shape index: {}]   ;;  %s9393_s1 = inlined_call_operand.hbm [shape: bf16[16,1280], index: 1, kind: input, shape index: {}]   ;;  %s9394_s2 = inlined_call_operand.hbm [shape: bf16[1,1280], index: 2, kind: input, shape index: {}]   ;;  %s9395_s3 = inlined_call_operand.hbm [shape: bf16[1280,1280], index: 3, kind: input, shape index: {}]   ;;  %s9396_s4 = inlined_call_operand.hbm [shape: bf16[1,1280], index: 4, kind: input, shape index: {}]   ;;  %s9397_s5 = inlined_call_operand.hbm [shape: bf16[16,1280], index: 5, kind: output, shape index: {}]  }
   0x1   :  { %11 = vsyncpa [#allocation6], 0 }
   0x2   :  { %12 = vsyncpa [#allocation9], 0 }
   0x3   :  { %13 = vsyncpa [#allocation4], 0  ;;  %s9048_s18 = smov [#allocation5]   ;;  %s9049_s20 = smov [#allocation2]  }
   0x4   :  { %s34_s19 = sshll.u32 %s9048_s18, 4  ;;  %s21_s21 = sshll.u32 %s9049_s20, 4  ;;  %s35_s19 = int_to_ptr.vmem [resolvable:$true] %s34_s19  ;;  %s9086_s21 = int_to_ptr.vmem [resolvable:$true] %s21_s21 }
   0x5   :  { %s8930_s24 = scalar_lea.hbm %s9394_s2, 160 }
   0x6   :  { %p8931_p0 = scmp.ne.s32.totalorder %s9394_s2, %s8930_s24  ;;  %p8934_p1 = scmp.lt.u32.totalorder %s8930_s24, %s9394_s2 }
   0x8   :  { %p8936_p2 = pnand %p8934_p1, %p8931_p0 }
   0xa   :  { %8939 = shalt.err (!%p8936_p2)
}
   0xb   :  { %s8940_s29 = scalar_lea.vmem %s35_s19, 160  ;;  %p8945_p4 = scmp.lt.s32.totalorder %s35_s19, %s35_s19 }
   0xc   :  { %p8941_p3 = scmp.ne.s32.totalorder %s35_s19, %s8940_s29  ;;  %p8946_p5 = scmp.lt.s32.totalorder %s8940_s29, %s8940_s29 }
   0xe   :  { %p8947_p6 = por %p8946_p5, %p8945_p4 }
  0x10   :  { %p8948_p7 = pnand %p8947_p6, %p8941_p3 }
  0x12   :  { %8951 = shalt.err (!%p8948_p7)
}
  0x13   :  { %37 = dma.hbm_to_vmem [thread:$0]  %s9394_s2, 160, %s35_s19, [#allocation6]  }
  0x14   :  { %s8952_s9 = scalar_lea.hbm %s9393_s1, 1280 }
  0x15   :  { %p8953_p8 = scmp.ne.s32.totalorder %s9393_s1, %s8952_s9  ;;  %p8956_p9 = scmp.lt.u32.totalorder %s8952_s9, %s9393_s1 }
  0x17   :  { %p8958_p10 = pnand %p8956_p9, %p8953_p8 }
  0x19   :  { %8961 = shalt.err (!%p8958_p10)
}
  0x1a   :  { %s8962_s14 = scalar_lea.vmem %s9086_s21, 1280  ;;  %p8967_p12 = scmp.lt.s32.totalorder %s9086_s21, %s9086_s21 }
  0x1b   :  { %p8963_p11 = scmp.ne.s32.totalorder %s9086_s21, %s8962_s14  ;;  %p8968_p13 = scmp.lt.s32.totalorder %s8962_s14, %s8962_s14 }
  0x1d   :  { %p8969_p0 = por %p8968_p13, %p8967_p12 }
  0x1f   :  { %p8970_p1 = pnand %p8969_p0, %p8963_p11 }
  0x21   :  { %8973 = shalt.err (!%p8970_p1)
}
  0x22   :  { %s9050_s2 = smov 640   ;;  %s9051_s15 = smov 40  }
  0x23   :  { %27 = dma.hbm_to_vmem [thread:$0]  %s9393_s1, 1280, %s9086_s21, [#allocation3], %s9050_s2, %s9050_s2, %s9051_s15  }
  0x24   :  { %s9052_s18 = smov [#allocation7]   ;;  %s9053_s20 = smov [#allocation8]  }
  0x25   :  { %s43_s19 = sshll.u32 %s9052_s18, 4  ;;  %s56_s22 = sshll.u32 %s9053_s20, 4  ;;  %s44_s19 = int_to_ptr.vmem [resolvable:$true] %s43_s19  ;;  %s57_s22 = int_to_ptr.vmem [resolvable:$true] %s56_s22 }
  0x26   :  { %s8974_s25 = scalar_lea.hbm %s9395_s3, 102400 }
  0x27   :  { %p8975_p2 = scmp.ne.s32.totalorder %s9395_s3, %s8974_s25  ;;  %p8978_p3 = scmp.lt.u32.totalorder %s8974_s25, %s9395_s3 }
  0x29   :  { %p8980_p4 = pnand %p8978_p3, %p8975_p2 }
  0x2b   :  { %8983 = shalt.err (!%p8980_p4)
}
  0x2c   :  { %s8984_s1 = scalar_lea.vmem %s44_s19, 102400  ;;  %p8989_p6 = scmp.lt.s32.totalorder %s44_s19, %s44_s19 }
  0x2d   :  { %p8985_p5 = scmp.ne.s32.totalorder %s44_s19, %s8984_s1  ;;  %p8990_p7 = scmp.lt.s32.totalorder %s8984_s1, %s8984_s1 }
  0x2f   :  { %p8991_p8 = por %p8990_p7, %p8989_p6 }
  0x31   :  { %p8992_p9 = pnand %p8991_p8, %p8985_p5 }
  0x33   :  { %8995 = shalt.err (!%p8992_p9)
}
  0x34   :  { %49 = dma.hbm_to_vmem [thread:$0]  %s9395_s3, 102400, %s44_s19, [#allocation6], %s9050_s2, %s9050_s2, %s9051_s15  }
  0x35   :  { %s8996_s8 = scalar_lea.hbm %s9396_s4, 160 }
  0x36   :  { %p8997_p10 = scmp.ne.s32.totalorder %s9396_s4, %s8996_s8  ;;  %p9000_p11 = scmp.lt.u32.totalorder %s8996_s8, %s9396_s4 }
  0x38   :  { %p9002_p12 = pnand %p9000_p11, %p8997_p10 }
  0x3a   :  { %9005 = shalt.err (!%p9002_p12)
}
  0x3b   :  { %s9006_s13 = scalar_lea.vmem %s57_s22, 160  ;;  %p9011_p0 = scmp.lt.s32.totalorder %s57_s22, %s57_s22 }
  0x3c   :  { %p9007_p13 = scmp.ne.s32.totalorder %s57_s22, %s9006_s13  ;;  %p9012_p1 = scmp.lt.s32.totalorder %s9006_s13, %s9006_s13 }
  0x3e   :  { %p9013_p2 = por %p9012_p1, %p9011_p0 }
  0x40   :  { %p9014_p3 = pnand %p9013_p2, %p9007_p13 }
  0x42   :  { %9017 = shalt.err (!%p9014_p3)
}
  0x43   :  { %59 = dma.hbm_to_vmem [thread:$0]  %s9396_s4, 160, %s57_s22, [#allocation9]  }
  0x44   :  { %9040 = dma.done.wait [#allocation3], 1280  }
  0x45   :  { %9041 = vsyncadd [#allocation3], 4294966016 }
  0x46   :  { %9042 = dma.done.wait [#allocation6], 102560  }
  0x47   :  { %9043 = vsyncadd [#allocation6], 4294864736 }
  0x48   :  { %9044 = dma.done.wait [#allocation9], 160  }
  0x49   :  { %9045 = vsyncadd [#allocation9], 4294967136  ;;  %v9054_v0 = vmov 0   ;;  %v7633_v1 = vld [vmem:[#allocation2 + $0x4] ss:$40 sps:$4 sm:$0xff]   ;;  %vm238_vm0 = vcmask 130048  }
  0x4a   :  { %274 = vmatprep.mubr.bf16.mxu0 %v9054_v0  ;;  %v7635_v2 = vld [vmem:[#allocation2] ss:$40 sps:$4 sm:$0xff]   ;;  %242 = vmatprep.subr.bf16.mxu0 %v7633_v1  ;;  %v7639_v5 = vld [vmem:[#allocation2 + $0xc] ss:$40 sps:$4 sm:$0xff]   ;;  %v7640_v7 = vld [vmem:[#allocation2 + $0x10] ss:$40 sps:$4 sm:$0xff]  }
  0x4b   :  { %v7636_v3 = vld [vmem:[%s9392_s0] sm:$0xff]   ;;  %243 = vmatpush1.bf16.msra.mxu0 %v7635_v2  ;;  %v7637_v4 = vld [vmem:[#allocation2 + $0x8] ss:$40 sps:$4 sm:$0xff]   ;;  %v7642_v6 = vld [vmem:[#allocation2 + $0x14] ss:$40 sps:$4 sm:$0xff]   ;;  %s9055_s0 = smov [#allocation10]  }
  0x4c   :  { %285 = vmatprep.subr.bf16.mxu0 %v7639_v5  ;;  %v7645_v8 = vld [vmem:[#allocation2 + $0x1c] ss:$40 sps:$4 sm:$0xff]   ;;  %v7670_v11 = vld [vmem:[#allocation7 + $0xa54] ss:$40 sps:$4 sm:$0xff]   ;;  %v7672_v12 = vld [vmem:[#allocation7 + $0xa50] ss:$40 sps:$4 sm:$0xff]  }
  0x4d   :  { %v7664_v9 = vld [vmem:[#allocation7 + $0xa04] ss:$40 sps:$4 sm:$0xff]   ;;  %v7666_v10 = vld [vmem:[#allocation7 + $0xa00] ss:$40 sps:$4 sm:$0xff]   ;;  %v7654_v20 = vld [vmem:[#allocation7 + $0x54] ss:$40 sps:$4 sm:$0xff]  }
  0x4e   :  { %6680 = vmatmul.mubr.msk.bf16.vlgmr.msra.gmra.mrb[0].mxu0 %vm238_vm0, %v7636_v3  ;;  %5591 = vmatprep.subr.bf16.mxu1 %v7664_v9  ;;  %v7643_v13 = vld [vmem:[#allocation2 + $0x18] ss:$40 sps:$4 sm:$0xff]   ;;  %v7648_v14 = vld [vmem:[#allocation2 + $0x24] ss:$40 sps:$4 sm:$0xff]   ;;  %s6655_s4 = sshll.u32 %s9055_s0, 4  ;;  %s6656_s4 = int_to_ptr.vmem [resolvable:$true] %s6655_s4 }
  0x4f   :  { %286 = vmatpush1.bf16.msra.mxu0 %v7637_v4  ;;  %317 = vmatprep.mubr.bf16.mxu0 %v9054_v0  ;;  %v7676_v15 = vld [vmem:[#allocation7 + $0xaa4] ss:$40 sps:$4 sm:$0xff]   ;;  %v7678_v16 = vld [vmem:[#allocation7 + $0xaa0] ss:$40 sps:$4 sm:$0xff]   ;;  %v7652_v21 = vld [vmem:[#allocation7 + $0x50] ss:$40 sps:$4 sm:$0xff]   ;;  %p9023_p5 = scmp.lt.s32.totalorder %s6656_s4, %s6656_s4 }
  0x50   :  { %328 = vmatprep.subr.bf16.mxu0 %v7642_v6  ;;  %5592 = vmatpush1.bf16.msra.mxu1 %v7666_v10  ;;  %v7646_v17 = vld [vmem:[#allocation2 + $0x20] ss:$40 sps:$4 sm:$0xff]   ;;  %v7660_v24 = vld [vmem:[#allocation7 + $0xf4] ss:$40 sps:$4 sm:$0xff]   ;;  %s9018_s18 = scalar_lea.vmem %s6656_s4, 1280 }
  0x51   :  { %5593 = vmatprep.subr.bf16.mxu1 %v7670_v11  ;;  %v7651_v18 = vld [vmem:[#allocation7 + $0x4] ss:$40 sps:$4 sm:$0xff]   ;;  %v7649_v19 = vld [vmem:[#allocation7] ss:$40 sps:$4 sm:$0xff]   ;;  %v7658_v25 = vld [vmem:[#allocation7 + $0xf0] ss:$40 sps:$4 sm:$0xff]   ;;  %p9019_p4 = scmp.ne.s32.totalorder %s6656_s4, %s9018_s18  ;;  %p9024_p6 = scmp.lt.s32.totalorder %s9018_s18, %s9018_s18 }
  0x52   :  { %v7657_v22 = vld [vmem:[#allocation7 + $0xa4] ss:$40 sps:$4 sm:$0xff]   ;;  %v7655_v23 = vld [vmem:[#allocation7 + $0xa0] ss:$40 sps:$4 sm:$0xff]   ;;  %v7669_v28 = vld [vmem:[#allocation7 + $0x194] ss:$40 sps:$4 sm:$0xff]  }
  0x53   :  { %v7663_v26 = vld [vmem:[#allocation7 + $0x144] ss:$40 sps:$4 sm:$0xff]   ;;  %v7661_v27 = vld [vmem:[#allocation7 + $0x140] ss:$40 sps:$4 sm:$0xff]   ;;  %v7667_v29 = vld [vmem:[#allocation7 + $0x190] ss:$40 sps:$4 sm:$0xff]   ;;  %p9025_p7 = por %p9024_p6, %p9023_p5 }
  0x54   :  { %5594 = vmatpush1.bf16.msra.mxu1 %v7672_v12  ;;  %v7675_v30 = vld [vmem:[#allocation7 + $0x1e4] ss:$40 sps:$4 sm:$0xff]   ;;  %v7673_v31 = vld [vmem:[#allocation7 + $0x1e0] ss:$40 sps:$4 sm:$0xff]   ;;  %v7681_v32 = vld [vmem:[#allocation7 + $0x234] ss:$40 sps:$4 sm:$0xff]  }
  0x55   :  { %5595 = vmatprep.subr.bf16.mxu1 %v7676_v15  ;;  %v7682_v33 = vld [vmem:[#allocation7 + $0xaf4] ss:$40 sps:$4 sm:$0xff]   ;;  %v7679_v34 = vld [vmem:[#allocation7 + $0x230] ss:$40 sps:$4 sm:$0xff]   ;;  %v7687_v36 = vld [vmem:[#allocation7 + $0x284] ss:$40 sps:$4 sm:$0xff]   ;;  %p9026_p8 = pnand %p9025_p7, %p9019_p4 }
  0x56   :  { %6681 = vmatmul.mubr.msk.bf16.vlgmr.msra.gmra.mrb[4].mxu0 %vm238_vm0, %v7636_v3  ;;  %v7684_v35 = vld [vmem:[#allocation7 + $0xaf0] ss:$40 sps:$4 sm:$0xff]   ;;  %v7688_v37 = vld [vmem:[#allocation7 + $0xb44] ss:$40 sps:$4 sm:$0xff]   ;;  %v7685_v38 = vld [vmem:[#allocation7 + $0x280] ss:$40 sps:$4 sm:$0xff]  }
  0x57   :  { %329 = vmatpush1.bf16.msra.mxu0 %v7640_v7  ;;  %360 = vmatprep.mubr.bf16.mxu0 %v9054_v0  ;;  %v7690_v39 = vld [vmem:[#allocation7 + $0xb40] ss:$40 sps:$4 sm:$0xff]   ;;  %v7693_v40 = vld [vmem:[#allocation7 + $0x2d4] ss:$40 sps:$4 sm:$0xff]   ;;  %v7691_v42 = vld [vmem:[#allocation7 + $0x2d0] ss:$40 sps:$4 sm:$0xff]  }
  0x58   :  { %371 = vmatprep.subr.bf16.mxu0 %v7645_v8  ;;  %5596 = vmatpush1.bf16.msra.mxu1 %v7678_v16  ;;  %v7694_v41 = vld [vmem:[#allocation7 + $0xb94] ss:$40 sps:$4 sm:$0xff]   ;;  %v7696_v43 = vld [vmem:[#allocation7 + $0xb90] ss:$40 sps:$4 sm:$0xff]   ;;  %v7699_v44 = vld [vmem:[#allocation7 + $0x324] ss:$40 sps:$4 sm:$0xff]  }
  0x59   :  { %5597 = vmatprep.subr.bf16.mxu1 %v7682_v33  ;;  %v7700_v45 = vld [vmem:[#allocation7 + $0xbe4] ss:$40 sps:$4 sm:$0xff]   ;;  %v7697_v46 = vld [vmem:[#allocation7 + $0x320] ss:$40 sps:$4 sm:$0xff]   ;;  %v7705_v48 = vld [vmem:[#allocation7 + $0x374] ss:$40 sps:$4 sm:$0xff]  }
  0x5a   :  { %v7702_v47 = vld [vmem:[#allocation7 + $0xbe0] ss:$40 sps:$4 sm:$0xff]   ;;  %v7706_v49 = vld [vmem:[#allocation7 + $0xc34] ss:$40 sps:$4 sm:$0xff]   ;;  %v7703_v50 = vld [vmem:[#allocation7 + $0x370] ss:$40 sps:$4 sm:$0xff]  }
  0x5b   :  { %v7708_v51 = vld [vmem:[#allocation7 + $0xc30] ss:$40 sps:$4 sm:$0xff]   ;;  %v7711_v52 = vld [vmem:[#allocation7 + $0x3c4] ss:$40 sps:$4 sm:$0xff]   ;;  %v7709_v54 = vld [vmem:[#allocation7 + $0x3c0] ss:$40 sps:$4 sm:$0xff]  }
  0x5c   :  { %5598 = vmatpush1.bf16.msra.mxu1 %v7684_v35  ;;  %v7712_v53 = vld [vmem:[#allocation7 + $0xc84] ss:$40 sps:$4 sm:$0xff]   ;;  %v7714_v55 = vld [vmem:[#allocation7 + $0xc80] ss:$40 sps:$4 sm:$0xff]   ;;  %v7717_v56 = vld [vmem:[#allocation7 + $0x414] ss:$40 sps:$4 sm:$0xff]  }
  0x5d   :  { %5599 = vmatprep.subr.bf16.mxu1 %v7688_v37  ;;  %v7718_v57 = vld [vmem:[#allocation7 + $0xcd4] ss:$40 sps:$4 sm:$0xff]   ;;  %v7715_v58 = vld [vmem:[#allocation7 + $0x410] ss:$40 sps:$4 sm:$0xff]   ;;  %v7723_v60 = vld [vmem:[#allocation7 + $0x464] ss:$40 sps:$4 sm:$0xff]  }
  0x5e   :  { %6682 = vmatmul.mubr.msk.bf16.vlgmr.msra.gmra.mrb[8].mxu0 %vm238_vm0, %v7636_v3  ;;  %v7720_v59 = vld [vmem:[#allocation7 + $0xcd0] ss:$40 sps:$4 sm:$0xff]   ;;  %v7724_v61 = vld [vmem:[#allocation7 + $0xd24] ss:$40 sps:$4 sm:$0xff]   ;;  %v7721_v62 = vld [vmem:[#allocation7 + $0x460] ss:$40 sps:$4 sm:$0xff]  }
  0x5f   :  { %372 = vmatpush1.bf16.msra.mxu0 %v7643_v13  ;;  %403 = vmatprep.mubr.bf16.mxu0 %v9054_v0  ;;  %v7726_v63 = vld [vmem:[#allocation7 + $0xd20] ss:$40 sps:$4 sm:$0xff]   ;;  %v7730_v1 = vld [vmem:[#allocation7 + $0xd74] ss:$40 sps:$4 sm:$0xff]   ;;  %v7727_v2 = vld [vmem:[#allocation7 + $0x4b0] ss:$40 sps:$4 sm:$0xff]  }
  0x60   :  { %414 = vmatprep.subr.bf16.mxu0 %v7648_v14  ;;  %5600 = vmatpush1.bf16.msra.mxu1 %v7690_v39  ;;  %v7735_v4 = vld [vmem:[#allocation7 + $0x504] ss:$40 sps:$4 sm:$0xff]   ;;  %v7738_v6 = vld [vmem:[#allocation7 + $0xdc0] ss:$40 sps:$4 sm:$0xff]   ;;  %v7742_v7 = vld [vmem:[#allocation7 + $0xe14] ss:$40 sps:$4 sm:$0xff]   ;;  %v93_v14 = vlaneseq }
  0x61   :  { %5601 = vmatprep.subr.bf16.mxu1 %v7694_v41  ;;  %v7736_v5 = vld [vmem:[#allocation7 + $0xdc4] ss:$40 sps:$4 sm:$0xff]   ;;  %v7744_v8 = vld [vmem:[#allocation7 + $0xe10] ss:$40 sps:$4 sm:$0xff]   ;;  %v7750_v10 = vld [vmem:[#allocation7 + $0xe60] ss:$40 sps:$4 sm:$0xff]  }
  0x62   :  { %v7748_v9 = vld [vmem:[#allocation7 + $0xe64] ss:$40 sps:$4 sm:$0xff]   ;;  %v7754_v11 = vld [vmem:[#allocation7 + $0xeb4] ss:$40 sps:$4 sm:$0xff]   ;;  %v7756_v12 = vld [vmem:[#allocation7 + $0xeb0] ss:$40 sps:$4 sm:$0xff]  }
  0x63   :  { %v7762_v13 = vld [vmem:[#allocation7 + $0xf04] ss:$40 sps:$4 sm:$0xff]   ;;  %v94_v15 = vshrl.u32 %v93_v14, 7  ;;  %v85_v16 = vld [vmem:[#allocation5] sm:$0xff] }
  0x64   :  { %5602 = vmatpush1.bf16.msra.mxu1 %v7696_v43 }
  0x65   :  { %5603 = vmatprep.subr.bf16.mxu1 %v7700_v45 }
  0x66   :  { %6683 = vmatmul.mubr.msk.bf16.vlgmr.msra.gmra.mrb[12].mxu0 %vm238_vm0, %v7636_v3 }
  0x67   :  { %415 = vmatpush1.bf16.msra.mxu0 %v7646_v17  ;;  %446 = vmatprep.mubr.bf16.mxu0 %v9054_v0  ;;  %v7729_v0 = vld [vmem:[#allocation7 + $0x4b4] ss:$40 sps:$4 sm:$0xff]   ;;  %v87_v17 = vunpack.c.l.bf16 %v85_v16 }
  0x68   :  { %5505 = vmatprep.subr.bf16.mxu0 %v7651_v18  ;;  %5604 = vmatpush1.bf16.msra.mxu1 %v7702_v47  ;;  %v9155_v18 = vsub.s32 0, %v94_v15 }
  0x69   :  { %5605 = vmatprep.subr.bf16.mxu1 %v7706_v49 }
  0x6c   :  { %5606 = vmatpush1.bf16.msra.mxu1 %v7708_v51 }
  0x6d   :  { %5607 = vmatprep.subr.bf16.mxu1 %v7712_v53 }
  0x6e   :  { %6684 = vmatmul.mubr.msk.bf16.vlgmr.msra.gmra.mrb[16].mxu0 %vm238_vm0, %v7636_v3  ;;  %v7732_v3 = vld [vmem:[#allocation7 + $0xd70] ss:$40 sps:$4 sm:$0xff]  }
  0x6f   :  { %5506 = vmatpush1.bf16.msra.mxu0 %v7649_v19  ;;  %v9157_v19 = vsub.s32 2, %v94_v15 }
  0x70   :  { %5507 = vmatprep.subr.bf16.mxu0 %v7654_v20  ;;  %5608 = vmatpush1.bf16.msra.mxu1 %v7714_v55  ;;  %v96_v20 = vrot.slane %v87_v17, %v9155_v18 }
  0x71   :  { %5609 = vmatprep.subr.bf16.mxu1 %v7718_v57 }
  0x73   :  { %5508 = vmatpush1.bf16.msra.mxu0 %v7652_v21  ;;  %v100_v21 = vrot.slane %v87_v17, %v9157_v19 }
  0x74   :  { %5509 = vmatprep.subr.bf16.mxu0 %v7657_v22  ;;  %5610 = vmatpush1.bf16.msra.mxu1 %v7720_v59  ;;  %v146_v22 = vrot.slane %v96_v20, %v9155_v18 }
  0x75   :  { %5611 = vmatprep.subr.bf16.mxu1 %v7724_v61 }
  0x77   :  { %5510 = vmatpush1.bf16.msra.mxu0 %v7655_v23  ;;  %v9162_v23 = vsub.s32 4, %v94_v15 }
  0x78   :  { %5511 = vmatprep.subr.bf16.mxu0 %v7660_v24  ;;  %5612 = vmatpush1.bf16.msra.mxu1 %v7726_v63  ;;  %v150_v24 = vrot.slane %v100_v21, %v9155_v18  ;;  %v86_v63 = vld [vmem:[#allocation5 + $0x8] sm:$0x3] }
  0x79   :  { %5613 = vmatprep.subr.bf16.mxu1 %v7730_v1  ;;  %v89_v20 = vunpack.c.l.bf16 %v86_v63 }
  0x7b   :  { %5512 = vmatpush1.bf16.msra.mxu0 %v7658_v25  ;;  %v9165_v25 = vsub.s32 6, %v94_v15 }
  0x7c   :  { %5513 = vmatprep.subr.bf16.mxu0 %v7663_v26  ;;  %5614 = vmatpush1.bf16.msra.mxu1 %v7732_v3 }
  0x7d   :  { %5615 = vmatprep.subr.bf16.mxu1 %v7736_v5 }
  0x7f   :  { %5514 = vmatpush1.bf16.msra.mxu0 %v7661_v27 }
  0x80   :  { %5515 = vmatprep.subr.bf16.mxu0 %v7669_v28  ;;  %5616 = vmatpush1.bf16.msra.mxu1 %v7738_v6 }
  0x81   :  { %5617 = vmatprep.subr.bf16.mxu1 %v7742_v7 }
  0x83   :  { %5516 = vmatpush1.bf16.msra.mxu0 %v7667_v29  ;;  %v104_v29 = vrot.slane %v87_v17, %v9162_v23 }
  0x84   :  { %5517 = vmatprep.subr.bf16.mxu0 %v7675_v30  ;;  %5618 = vmatpush1.bf16.msra.mxu1 %v7744_v8 }
  0x85   :  { %5619 = vmatprep.subr.bf16.mxu1 %v7748_v9  ;;  %v154_v39 = vrot.slane %v104_v29, %v9155_v18 }
  0x87   :  { %5518 = vmatpush1.bf16.msra.mxu0 %v7673_v31 }
  0x88   :  { %5519 = vmatprep.subr.bf16.mxu0 %v7681_v32  ;;  %5620 = vmatpush1.bf16.msra.mxu1 %v7750_v10  ;;  %v108_v32 = vrot.slane %v87_v17, %v9165_v25 }
  0x89   :  { %5621 = vmatprep.subr.bf16.mxu1 %v7754_v11 }
  0x8b   :  { %5520 = vmatpush1.bf16.msra.mxu0 %v7679_v34 }
  0x8c   :  { %5521 = vmatprep.subr.bf16.mxu0 %v7687_v36  ;;  %5622 = vmatpush1.bf16.msra.mxu1 %v7756_v12 }
  0x8d   :  { %5634 = vmatprep.subr.bf16.mxu1 %v7762_v13 }
  0x8f   :  { %5522 = vmatpush1.bf16.msra.mxu0 %v7685_v38 }
  0x90   :  { %5523 = vmatprep.subr.bf16.mxu0 %v7693_v40  ;;  %v88_v40 = vunpack.c.h.bf16 %v85_v16 }
  0x92   :  { %v116_v49 = vrot.slane %v88_v40, %v9157_v19  ;;  %v124_v9 = vrot.slane %v88_v40, %v9165_v25 }
  0x93   :  { %5524 = vmatpush1.bf16.msra.mxu0 %v7691_v42  ;;  %v158_v42 = vrot.slane %v108_v32, %v9155_v18 }
  0x94   :  { %5525 = vmatprep.subr.bf16.mxu0 %v7699_v44 }
  0x97   :  { %5526 = vmatpush1.bf16.msra.mxu0 %v7697_v46  ;;  %v112_v46 = vrot.slane %v88_v40, %v9155_v18 }
  0x98   :  { %5527 = vmatprep.subr.bf16.mxu0 %v7705_v48 }
  0x9b   :  { %5528 = vmatpush1.bf16.msra.mxu0 %v7703_v50 }
  0x9c   :  { %5529 = vmatprep.subr.bf16.mxu0 %v7711_v52 }
  0x9f   :  { %5530 = vmatpush1.bf16.msra.mxu0 %v7709_v54 }
  0xa0   :  { %5531 = vmatprep.subr.bf16.mxu0 %v7717_v56  ;;  %v162_v56 = vrot.slane %v112_v46, %v9155_v18 }
  0xa3   :  { %5532 = vmatpush1.bf16.msra.mxu0 %v7715_v58  ;;  %v166_v58 = vrot.slane %v116_v49, %v9155_v18 }
  0xa4   :  { %5533 = vmatprep.subr.bf16.mxu0 %v7723_v60 }
  0xa7   :  { %5534 = vmatpush1.bf16.msra.mxu0 %v7721_v62 }
  0xa8   :  { %5535 = vmatprep.subr.bf16.mxu0 %v7729_v0 }
  0xab   :  { %5536 = vmatpush1.bf16.msra.mxu0 %v7727_v2 }
  0xac   :  { %5548 = vmatprep.subr.bf16.mxu0 %v7735_v4  ;;  %v120_v4 = vrot.slane %v88_v40, %v9162_v23 }
  0xae   :  { %v170_v17 = vrot.slane %v120_v4, %v9155_v18 }
 0x121   :  { %v276_v26 = vpop.f32.mrb[0].mxu0 }
 0x122   :  { %v9167_v27 = vadd.f32 %v276_v26, %v146_v22  ;;  %v278_v28 = vpop.f32.mrb[1].mxu0 }
 0x123   :  { %v9170_v30 = vadd.f32 %v278_v28, %v150_v24  ;;  %v280_v31 = vpop.f32.mrb[2].mxu0 }
 0x124   :  { %v6685_v33 = vmul.f32 -1.442695, %v9167_v27  ;;  %v9174_v34 = vadd.f32 %v280_v31, %v146_v22  ;;  %v282_v35 = vpop.f32.mrb[3].mxu0  ;;  %v174_v22 = vrot.slane %v124_v9, %v9155_v18 }
 0x125   :  { %v6686_v36 = vmul.f32 -1.442695, %v9170_v30  ;;  %v9177_v37 = vadd.f32 %v282_v35, %v150_v24 }
 0x126   :  { %8849 = vpow2.f32 %v6685_v33  ;;  %v6695_v38 = vmul.f32 -1.442695, %v9174_v34 }
 0x127   :  { %8851 = vpow2.f32 %v6686_v36  ;;  %v6696_v41 = vmul.f32 -1.442695, %v9177_v37  ;;  %v128_v36 = vrot.slane %v89_v20, %v9155_v18 }
 0x128   :  { %8853 = vpow2.f32 %v6695_v38 }
 0x129   :  { %8855 = vpow2.f32 %v6696_v41  ;;  %v319_v43 = vpop.f32.mrb[4].mxu0 }
 0x12a   :  { %v9183_v44 = vadd.f32 %v319_v43, %v154_v39  ;;  %v321_v45 = vpop.f32.mrb[5].mxu0 }
 0x12b   :  { %v9186_v47 = vadd.f32 %v321_v45, %v158_v42  ;;  %v323_v48 = vpop.f32.mrb[6].mxu0 }
 0x12c   :  { %v6687_v50 = vmul.f32 -1.442695, %v9183_v44  ;;  %v9190_v51 = vadd.f32 %v323_v48, %v154_v39  ;;  %v325_v52 = vpop.f32.mrb[7].mxu0 }
 0x12d   :  { %v6688_v53 = vmul.f32 -1.442695, %v9186_v47  ;;  %v9193_v54 = vadd.f32 %v325_v52, %v158_v42  ;;  %v132_v42 = vrot.slane %v89_v20, %v9157_v19 }
 0x12e   :  { %8857 = vpow2.f32 %v6687_v50  ;;  %v6697_v55 = vmul.f32 -1.442695, %v9190_v51 }
 0x12f   :  { %8859 = vpow2.f32 %v6688_v53  ;;  %v6698_v57 = vmul.f32 -1.442695, %v9193_v54 }
 0x130   :  { %v8850_v59 = vpop.eup %8849  ;;  %8861 = vpow2.f32 %v6697_v55 }
 0x131   :  { %v8852_v60 = vpop.eup %8851  ;;  %v517_v61 = vadd.f32 1.0, %v8850_v59  ;;  %8863 = vpow2.f32 %v6698_v57  ;;  %v362_v62 = vpop.f32.mrb[8].mxu0  ;;  %v182_v59 = vrot.slane %v132_v42, %v9155_v18  ;;  %v7747_v42 = vld [vmem:[#allocation7 + $0x5a4] ss:$40 sps:$4 sm:$0xff]  }
 0x132   :  { %v8854_v0 = vpop.eup %8853  ;;  %v518_v1 = vadd.f32 1.0, %v8852_v60  ;;  %v9199_v2 = vadd.f32 %v362_v62, %v162_v56  ;;  %v364_v3 = vpop.f32.mrb[9].mxu0 }
 0x133   :  { %v8856_v5 = vpop.eup %8855  ;;  %8865 = vrcp.f32 %v517_v61  ;;  %v527_v6 = vadd.f32 1.0, %v8854_v0  ;;  %v9202_v7 = vadd.f32 %v364_v3, %v166_v58  ;;  %v366_v8 = vpop.f32.mrb[10].mxu0  ;;  %v7733_v3 = vld [vmem:[#allocation7 + $0x500] ss:$40 sps:$4 sm:$0xff]  }
 0x134   :  { %8867 = vrcp.f32 %v518_v1  ;;  %v528_v10 = vadd.f32 1.0, %v8856_v5  ;;  %v6689_v11 = vmul.f32 -1.442695, %v9199_v2  ;;  %v9206_v12 = vadd.f32 %v366_v8, %v162_v56  ;;  %v368_v13 = vpop.f32.mrb[11].mxu0 }
 0x135   :  { %8869 = vrcp.f32 %v527_v6  ;;  %v6690_v14 = vmul.f32 -1.442695, %v9202_v7  ;;  %v9209_v15 = vadd.f32 %v368_v13, %v166_v58  ;;  %v178_v56 = vrot.slane %v128_v36, %v9155_v18 }
 0x136   :  { %8871 = vrcp.f32 %v528_v10  ;;  %v6699_v16 = vmul.f32 -1.442695, %v9206_v12 }
 0x137   :  { %8873 = vpow2.f32 %v6689_v11  ;;  %v6700_v21 = vmul.f32 -1.442695, %v9209_v15 }
 0x138   :  { %v8858_v24 = vpop.eup %8857  ;;  %8875 = vpow2.f32 %v6690_v14 }
 0x139   :  { %v8860_v26 = vpop.eup %8859  ;;  %v519_v28 = vadd.f32 1.0, %v8858_v24  ;;  %8877 = vpow2.f32 %v6699_v16  ;;  %v405_v29 = vpop.f32.mrb[12].mxu0  ;;  %v7741_v16 = vld [vmem:[#allocation7 + $0x554] ss:$40 sps:$4 sm:$0xff]  }
 0x13a   :  { %v8862_v31 = vpop.eup %8861  ;;  %v520_v32 = vadd.f32 1.0, %v8860_v26  ;;  %8879 = vpow2.f32 %v6700_v21  ;;  %v9215_v33 = vadd.f32 %v405_v29, %v170_v17  ;;  %v407_v35 = vpop.f32.mrb[13].mxu0 }
 0x13b   :  { %v8864_v38 = vpop.eup %8863  ;;  %8881 = vrcp.f32 %v519_v28  ;;  %v529_v39 = vadd.f32 1.0, %v8862_v31  ;;  %v9218_v40 = vadd.f32 %v407_v35, %v174_v22  ;;  %v409_v41 = vpop.f32.mrb[14].mxu0  ;;  %v7739_v31 = vld [vmem:[#allocation7 + $0x550] ss:$40 sps:$4 sm:$0xff]  }
 0x13c   :  { %8883 = vrcp.f32 %v520_v32  ;;  %v530_v43 = vadd.f32 1.0, %v8864_v38  ;;  %v6691_v45 = vmul.f32 -1.442695, %v9215_v33  ;;  %v9222_v46 = vadd.f32 %v409_v41, %v170_v17  ;;  %v411_v48 = vpop.f32.mrb[15].mxu0 }
 0x13d   :  { %v8866_v49 = vpop.eup %8865  ;;  %8885 = vrcp.f32 %v529_v39  ;;  %v6692_v50 = vmul.f32 -1.442695, %v9218_v40  ;;  %v9225_v52 = vadd.f32 %v411_v48, %v174_v22 }
 0x13e   :  { %v8868_v53 = vpop.eup %8867  ;;  %8887 = vrcp.f32 %v530_v43  ;;  %v6701_v55 = vmul.f32 -1.442695, %v9222_v46  ;;  %v577_v61 = vmul.f32 %v8866_v49, %v9167_v27  ;;  %v7745_v49 = vld [vmem:[#allocation7 + $0x5a0] ss:$40 sps:$4 sm:$0xff]  }
 0x13f   :  { %v8870_v57 = vpop.eup %8869  ;;  %8889 = vpow2.f32 %v6691_v45  ;;  %v6702_v58 = vmul.f32 -1.442695, %v9225_v52  ;;  %v578_v0 = vmul.f32 %v8868_v53, %v9170_v30 }
 0x140   :  { %v8872_v60 = vpop.eup %8871  ;;  %v587_v62 = vmul.f32 %v8870_v57, %v9174_v34  ;;  %8891 = vpow2.f32 %v6692_v50 }
 0x141   :  { %v8874_v63 = vpop.eup %8873  ;;  %v588_v1 = vmul.f32 %v8872_v60, %v9177_v37  ;;  %8893 = vpow2.f32 %v6701_v55  ;;  %v448_v4 = vpop.f32.mrb[16].mxu0 }
 0x142   :  { %v8876_v5 = vpop.eup %8875  ;;  %v9235_v6 = vpack.c.bf16 %v587_v62, %v577_v61  ;;  %v521_v8 = vadd.f32 1.0, %v8874_v63  ;;  %8895 = vpow2.f32 %v6702_v58  ;;  %v9237_v9 = vadd.f32 %v448_v4, %v178_v56  ;;  %v450_v10 = vpop.f32.mrb[17].mxu0  ;;  %v7753_v58 = vld [vmem:[#allocation7 + $0x5f4] ss:$40 sps:$4 sm:$0xff]   ;;  %v7759_v63 = vld [vmem:[#allocation7 + $0x644] ss:$40 sps:$4 sm:$0xff]  }
 0x143   :  { %v8878_v27 = vpop.eup %8877  ;;  %v9239_v11 = vpack.c.bf16 %v588_v1, %v578_v0  ;;  %v522_v34 = vadd.f32 1.0, %v8876_v5  ;;  %v9241_v13 = vadd.f32 %v450_v10, %v182_v59  ;;  %v452_v30 = vpop.f32.mrb[18].mxu0  ;;  %v7757_v4 = vld [vmem:[#allocation7 + $0x640] ss:$40 sps:$4 sm:$0xff]  }
 0x144   :  { %v8880_v14 = vpop.eup %8879  ;;  %8897 = vrcp.f32 %v521_v8  ;;  %v531_v37 = vadd.f32 1.0, %v8878_v27  ;;  %v6693_v17 = vmul.f32 -1.442695, %v9237_v9  ;;  %v9244_v20 = vadd.f32 %v452_v30, %v178_v56  ;;  %v454_v21 = vpop.f32.mrb[19].mxu0  ;;  %v7760_v27 = vld [vmem:[#allocation7 + $0xf00] ss:$40 sps:$4 sm:$0xff]  }
 0x145   :  { %v8882_v22 = vpop.eup %8881  ;;  %8899 = vrcp.f32 %v522_v34  ;;  %v532_v24 = vadd.f32 1.0, %v8880_v14  ;;  %5537 = vmatprep.mubr.bf16.mxu0 %v9239_v11  ;;  %v6694_v26 = vmul.f32 -1.442695, %v9241_v13  ;;  %v9248_v28 = vadd.f32 %v454_v21, %v182_v59  ;;  %v7765_v34 = vld [vmem:[#allocation7 + $0x694] ss:$40 sps:$4 sm:$0xff]  }
 0x146   :  { %v8884_v29 = vpop.eup %8883  ;;  %8901 = vrcp.f32 %v531_v37  ;;  %5538 = vmatmul.mubr.bf16.vlgmr.msra.gmra.mrb[20].mxu0 %v9235_v6  ;;  %v6703_v32 = vmul.f32 -1.442695, %v9244_v20  ;;  %v579_v39 = vmul.f32 %v8882_v22, %v9183_v44 }
 0x147   :  { %v8886_v35 = vpop.eup %8885  ;;  %8903 = vrcp.f32 %v532_v24  ;;  %5549 = vmatpush1.bf16.msra.mxu0 %v7733_v3  ;;  %v6704_v36 = vmul.f32 -1.442695, %v9248_v28  ;;  %v580_v45 = vmul.f32 %v8884_v29, %v9186_v47 }
 0x148   :  { %v8888_v38 = vpop.eup %8887  ;;  %v589_v41 = vmul.f32 %v8886_v35, %v9190_v51  ;;  %5550 = vmatprep.subr.bf16.mxu0 %v7741_v16  ;;  %8905 = vpow2.f32 %v6693_v17  ;;  %v7766_v35 = vld [vmem:[#allocation7 + $0xf50] ss:$40 sps:$4 sm:$0xff]  }
 0x149   :  { %v8890_v43 = vpop.eup %8889  ;;  %v590_v48 = vmul.f32 %v8888_v38, %v9193_v54  ;;  %8907 = vpow2.f32 %v6694_v26  ;;  %v7751_v54 = vld [vmem:[#allocation7 + $0x5f0] ss:$40 sps:$4 sm:$0xff]  }
 0x14a   :  { %v8892_v50 = vpop.eup %8891  ;;  %v9257_v53 = vpack.c.bf16 %v589_v41, %v579_v39  ;;  %v523_v55 = vadd.f32 1.0, %v8890_v43  ;;  %8909 = vpow2.f32 %v6703_v32  ;;  %v7769_v41 = vld [vmem:[#allocation7 + $0x6e0] ss:$40 sps:$4 sm:$0xff]  }
 0x14b   :  { %v8894_v56 = vpop.eup %8893  ;;  %v9259_v57 = vpack.c.bf16 %v590_v48, %v580_v45  ;;  %5551 = vmatpush1.bf16.msra.mxu0 %v7739_v31  ;;  %v524_v44 = vadd.f32 1.0, %v8892_v50  ;;  %8911 = vpow2.f32 %v6704_v36  ;;  %v7771_v36 = vld [vmem:[#allocation7 + $0x6e4] ss:$40 sps:$4 sm:$0xff]   ;;  %v7777_v48 = vld [vmem:[#allocation7 + $0x734] ss:$40 sps:$4 sm:$0xff]  }
 0x14c   :  { %v8896_v51 = vpop.eup %8895  ;;  %5552 = vmatprep.subr.bf16.mxu0 %v7747_v42  ;;  %8913 = vrcp.f32 %v523_v55  ;;  %v533_v47 = vadd.f32 1.0, %v8894_v56  ;;  %v7774_v42 = vld [vmem:[#allocation7 + $0xfa4] ss:$40 sps:$4 sm:$0xff]   ;;  %v7780_v50 = vld [vmem:[#allocation7 + $0xff4] ss:$40 sps:$4 sm:$0xff]  }
 0x14d   :  { %5580 = vmatprep.mubr.bf16.mxu0 %v9259_v57  ;;  %8915 = vrcp.f32 %v524_v44  ;;  %v534_v59 = vadd.f32 1.0, %v8896_v51  ;;  %v7783_v56 = vld [vmem:[#allocation7 + $0x784] ss:$40 sps:$4 sm:$0xff]  }
 0x14e   :  { %v8898_v60 = vpop.eup %8897  ;;  %8917 = vrcp.f32 %v533_v47  ;;  %v7786_v47 = vld [vmem:[#allocation7 + $0x1044] ss:$40 sps:$4 sm:$0xff]  }
 0x14f   :  { %v8900_v61 = vpop.eup %8899  ;;  %5553 = vmatpush1.bf16.msra.mxu0 %v7745_v49  ;;  %8919 = vrcp.f32 %v534_v59  ;;  %v581_v1 = vmul.f32 %v8898_v60, %v9199_v2  ;;  %v7775_v49 = vld [vmem:[#allocation7 + $0x730] ss:$40 sps:$4 sm:$0xff]  }
 0x150   :  { %v8902_v62 = vpop.eup %8901  ;;  %5554 = vmatprep.subr.bf16.mxu0 %v7753_v58  ;;  %v582_v8 = vmul.f32 %v8900_v61, %v9202_v7  ;;  %v7763_v7 = vld [vmem:[#allocation7 + $0x690] ss:$40 sps:$4 sm:$0xff]   ;;  %v7781_v58 = vld [vmem:[#allocation7 + $0x780] ss:$40 sps:$4 sm:$0xff]  }
 0x151   :  { %v8904_v0 = vpop.eup %8903  ;;  %v591_v3 = vmul.f32 %v8902_v62, %v9206_v12  ;;  %v7768_v12 = vld [vmem:[#allocation7 + $0xf54] ss:$40 sps:$4 sm:$0xff]   ;;  %v7784_v62 = vld [vmem:[#allocation7 + $0x1040] ss:$40 sps:$4 sm:$0xff]  }
 0x152   :  { %v8906_v5 = vpop.eup %8905  ;;  %v592_v10 = vmul.f32 %v8904_v0, %v9209_v15 }
 0x153   :  { %v8908_v30 = vpop.eup %8907  ;;  %v9266_v14 = vpack.c.bf16 %v591_v3, %v581_v1  ;;  %5555 = vmatpush1.bf16.msra.mxu0 %v7751_v54  ;;  %v525_v37 = vadd.f32 1.0, %v8906_v5  ;;  %v7792_v1 = vld [vmem:[#allocation7 + $0x1094] ss:$40 sps:$4 sm:$0xff]   ;;  %v7798_v5 = vld [vmem:[#allocation7 + $0x10e4] ss:$40 sps:$4 sm:$0xff]  }
 0x154   :  { %v8910_v16 = vpop.eup %8909  ;;  %v9268_v17 = vpack.c.bf16 %v592_v10, %v582_v8  ;;  %5556 = vmatprep.subr.bf16.mxu0 %v7759_v63  ;;  %v526_v2 = vadd.f32 1.0, %v8908_v30  ;;  %v7789_v63 = vld [vmem:[#allocation7 + $0x7d4] ss:$40 sps:$4 sm:$0xff]   ;;  %v7799_v10 = vld [vmem:[#allocation7 + $0x870] ss:$40 sps:$4 sm:$0xff]  }
 0x155   :  { %v8912_v21 = vpop.eup %8911  ;;  %8921 = vrcp.f32 %v525_v37  ;;  %v535_v22 = vadd.f32 1.0, %v8910_v16  ;;  %v7801_v8 = vld [vmem:[#allocation7 + $0x874] ss:$40 sps:$4 sm:$0xff]   ;;  %v7807_v30 = vld [vmem:[#allocation7 + $0x8c4] ss:$40 sps:$4 sm:$0xff]  }
 0x156   :  { %v8914_v24 = vpop.eup %8913  ;;  %5623 = vmatprep.mubr.bf16.mxu1 %v9268_v17  ;;  %8923 = vrcp.f32 %v526_v2  ;;  %v536_v15 = vadd.f32 1.0, %v8912_v21  ;;  %v7805_v37 = vld [vmem:[#allocation7 + $0x8c0] ss:$40 sps:$4 sm:$0xff]   ;;  %v7810_v16 = vld [vmem:[#allocation7 + $0x1184] ss:$40 sps:$4 sm:$0xff]  }
 0x157   :  { %v8916_v26 = vpop.eup %8915  ;;  %v583_v29 = vmul.f32 %v8914_v24, %v9215_v33  ;;  %5557 = vmatpush1.bf16.msra.mxu0 %v7757_v4  ;;  %5624 = vmatmul.mubr.bf16.vlgmr.msra.gmra.mrb[0].mxu1 %v9266_v14  ;;  %8925 = vrcp.f32 %v535_v22  ;;  %v7795_v4 = vld [vmem:[#allocation7 + $0x824] ss:$40 sps:$4 sm:$0xff]   ;;  %v7808_v2 = vld [vmem:[#allocation7 + $0x1180] ss:$40 sps:$4 sm:$0xff]   ;;  %v7813_v21 = vld [vmem:[#allocation7 + $0x914] ss:$40 sps:$4 sm:$0xff]  }
 0x158   :  { %v8918_v31 = vpop.eup %8917  ;;  %v584_v32 = vmul.f32 %v8916_v26, %v9218_v40  ;;  %5635 = vmatpush1.bf16.msra.mxu1 %v7760_v27  ;;  %5558 = vmatprep.subr.bf16.mxu0 %v7765_v34  ;;  %8927 = vrcp.f32 %v536_v15  ;;  %v7772_v40 = vld [vmem:[#allocation7 + $0xfa0] ss:$40 sps:$4 sm:$0xff]   ;;  %v7804_v27 = vld [vmem:[#allocation7 + $0x1134] ss:$40 sps:$4 sm:$0xff]   ;;  %v7802_v34 = vld [vmem:[#allocation7 + $0x1130] ss:$40 sps:$4 sm:$0xff]  }
 0x159   :  { %v8920_v38 = vpop.eup %8919  ;;  %v593_v39 = vmul.f32 %v8918_v31, %v9222_v46  ;;  %5636 = vmatprep.subr.bf16.mxu1 %v7768_v12  ;;  %v7811_v12 = vld [vmem:[#allocation7 + $0x910] ss:$40 sps:$4 sm:$0xff]   ;;  %v7816_v22 = vld [vmem:[#allocation7 + $0x11d4] ss:$40 sps:$4 sm:$0xff]   ;;  %v7817_v15 = vld [vmem:[#allocation7 + $0x960] ss:$40 sps:$4 sm:$0xff]  }
 0x15a   :  { %v594_v33 = vmul.f32 %v8920_v38, %v9225_v52  ;;  %v7778_v52 = vld [vmem:[#allocation7 + $0xff0] ss:$40 sps:$4 sm:$0xff]   ;;  %v7822_v26 = vld [vmem:[#allocation7 + $0x1224] ss:$40 sps:$4 sm:$0xff]   ;;  %v7825_v31 = vld [vmem:[#allocation7 + $0x9b4] ss:$40 sps:$4 sm:$0xff]  }
 0x15b   :  { %v9276_v43 = vpack.c.bf16 %v593_v39, %v583_v29  ;;  %5559 = vmatpush1.bf16.msra.mxu0 %v7763_v7  ;;  %v7814_v24 = vld [vmem:[#allocation7 + $0x11d0] ss:$40 sps:$4 sm:$0xff]   ;;  %v7819_v7 = vld [vmem:[#allocation7 + $0x964] ss:$40 sps:$4 sm:$0xff]   ;;  %v7820_v29 = vld [vmem:[#allocation7 + $0x1220] ss:$40 sps:$4 sm:$0xff]  }
 0x15c   :  { %v9278_v45 = vpack.c.bf16 %v594_v33, %v584_v32  ;;  %5637 = vmatpush1.bf16.msra.mxu1 %v7766_v35  ;;  %5560 = vmatprep.subr.bf16.mxu0 %v7771_v36  ;;  %v7823_v32 = vld [vmem:[#allocation7 + $0x9b0] ss:$40 sps:$4 sm:$0xff]   ;;  %v7828_v35 = vld [vmem:[#allocation7 + $0x1274] ss:$40 sps:$4 sm:$0xff]   ;;  %v7831_v38 = vld [vmem:[#allocation7 + $0x12c4] ss:$40 sps:$4 sm:$0xff]  }
 0x15d   :  { %5638 = vmatprep.subr.bf16.mxu1 %v7774_v42  ;;  %v7826_v36 = vld [vmem:[#allocation7 + $0x1270] ss:$40 sps:$4 sm:$0xff]   ;;  %v7834_v39 = vld [vmem:[#allocation7 + $0xc] ss:$40 sps:$4 sm:$0xff]   ;;  %v7829_v42 = vld [vmem:[#allocation7 + $0x12c0] ss:$40 sps:$4 sm:$0xff]  }
 0x15e   :  { %5666 = vmatprep.mubr.bf16.mxu1 %v9278_v45  ;;  %v7840_v33 = vld [vmem:[#allocation7 + $0x5c] ss:$40 sps:$4 sm:$0xff]  }
 0x15f   :  { %v8922_v46 = vpop.eup %8921  ;;  %5561 = vmatpush1.bf16.msra.mxu0 %v7769_v41  ;;  %v7832_v41 = vld [vmem:[#allocation7 + $0x8] ss:$40 sps:$4 sm:$0xff]  }
 0x160   :  { %v8924_v55 = vpop.eup %8923  ;;  %5639 = vmatpush1.bf16.msra.mxu1 %v7772_v40  ;;  %5562 = vmatprep.subr.bf16.mxu0 %v7777_v48  ;;  %v585_v44 = vmul.f32 %v8922_v46, %v9237_v9  ;;  %v7787_v9 = vld [vmem:[#allocation7 + $0x7d0] ss:$40 sps:$4 sm:$0xff]   ;;  %v7837_v40 = vld [vmem:[#allocation7 + $0x1314] ss:$40 sps:$4 sm:$0xff]  }
 0x161   :  { %v8926_v51 = vpop.eup %8925  ;;  %5640 = vmatprep.subr.bf16.mxu1 %v7780_v50  ;;  %v586_v54 = vmul.f32 %v8924_v55, %v9241_v13  ;;  %v7790_v13 = vld [vmem:[#allocation7 + $0x1090] ss:$40 sps:$4 sm:$0xff]   ;;  %v7843_v50 = vld [vmem:[#allocation7 + $0x1364] ss:$40 sps:$4 sm:$0xff]  }
 0x162   :  { %v8928_v59 = vpop.eup %8927  ;;  %v595_v60 = vmul.f32 %v8926_v51, %v9244_v20  ;;  %v7793_v20 = vld [vmem:[#allocation7 + $0x820] ss:$40 sps:$4 sm:$0xff]   ;;  %v7846_v46 = vld [vmem:[#allocation7 + $0xac] ss:$40 sps:$4 sm:$0xff]  }
 0x163   :  { %5563 = vmatpush1.bf16.msra.mxu0 %v7775_v49  ;;  %v596_v61 = vmul.f32 %v8928_v59, %v9248_v28  ;;  %v7796_v28 = vld [vmem:[#allocation7 + $0x10e0] ss:$40 sps:$4 sm:$0xff]   ;;  %v7835_v49 = vld [vmem:[#allocation7 + $0x1310] ss:$40 sps:$4 sm:$0xff]  }
 0x164   :  { %5641 = vmatpush1.bf16.msra.mxu1 %v7778_v52  ;;  %5564 = vmatprep.subr.bf16.mxu0 %v7783_v56  ;;  %v9285_v0 = vpack.c.bf16 %v595_v60, %v585_v44  ;;  %v7838_v48 = vld [vmem:[#allocation7 + $0x58] ss:$40 sps:$4 sm:$0xff]   ;;  %v7844_v55 = vld [vmem:[#allocation7 + $0xa8] ss:$40 sps:$4 sm:$0xff]   ;;  %v7849_v56 = vld [vmem:[#allocation7 + $0x13b4] ss:$40 sps:$4 sm:$0xff]  }
 0x165   :  { %5642 = vmatprep.subr.bf16.mxu1 %v7786_v47  ;;  %v9287_v3 = vpack.c.bf16 %v596_v61, %v586_v54  ;;  %v7841_v52 = vld [vmem:[#allocation7 + $0x1360] ss:$40 sps:$4 sm:$0xff]   ;;  %v7852_v44 = vld [vmem:[#allocation7 + $0xfc] ss:$40 sps:$4 sm:$0xff]   ;;  %v7858_v54 = vld [vmem:[#allocation7 + $0x14c] ss:$40 sps:$4 sm:$0xff]  }
 0x166   :  { %v7850_v51 = vld [vmem:[#allocation7 + $0xf8] ss:$40 sps:$4 sm:$0xff]   ;;  %v7855_v47 = vld [vmem:[#allocation7 + $0x1404] ss:$40 sps:$4 sm:$0xff]   ;;  %v7856_v59 = vld [vmem:[#allocation7 + $0x148] ss:$40 sps:$4 sm:$0xff]  }
 0x167   :  { %5565 = vmatpush1.bf16.msra.mxu0 %v7781_v58  ;;  %v7847_v58 = vld [vmem:[#allocation7 + $0x13b0] ss:$40 sps:$4 sm:$0xff]   ;;  %v7853_v60 = vld [vmem:[#allocation7 + $0x1400] ss:$40 sps:$4 sm:$0xff]   ;;  %v7864_v61 = vld [vmem:[#allocation7 + $0x19c] ss:$40 sps:$4 sm:$0xff]  }
 0x168   :  { %5643 = vmatpush1.bf16.msra.mxu1 %v7784_v62  ;;  %5566 = vmatprep.subr.bf16.mxu0 %v7789_v63  ;;  %v7861_v62 = vld [vmem:[#allocation7 + $0x1454] ss:$40 sps:$4 sm:$0xff]   ;;  %v7862_v63 = vld [vmem:[#allocation7 + $0x198] ss:$40 sps:$4 sm:$0xff]  }
 0x169   :  { %5644 = vmatprep.subr.bf16.mxu1 %v7792_v1  ;;  %v7870_v1 = vld [vmem:[#allocation7 + $0x1ec] ss:$40 sps:$4 sm:$0xff]  }
 0x16b   :  { %5567 = vmatpush1.bf16.msra.mxu0 %v7787_v9  ;;  %v7859_v9 = vld [vmem:[#allocation7 + $0x1450] ss:$40 sps:$4 sm:$0xff]  }
 0x16c   :  { %5645 = vmatpush1.bf16.msra.mxu1 %v7790_v13  ;;  %5568 = vmatprep.subr.bf16.mxu0 %v7795_v4  ;;  %v7867_v13 = vld [vmem:[#allocation7 + $0x14a4] ss:$40 sps:$4 sm:$0xff]   ;;  %v7868_v4 = vld [vmem:[#allocation7 + $0x1e8] ss:$40 sps:$4 sm:$0xff]  }
 0x16d   :  { %5646 = vmatprep.subr.bf16.mxu1 %v7798_v5  ;;  %v7873_v5 = vld [vmem:[#allocation7 + $0x14f4] ss:$40 sps:$4 sm:$0xff]  }
 0x16f   :  { %5569 = vmatpush1.bf16.msra.mxu0 %v7793_v20  ;;  %v7865_v20 = vld [vmem:[#allocation7 + $0x14a0] ss:$40 sps:$4 sm:$0xff]  }
 0x170   :  { %5647 = vmatpush1.bf16.msra.mxu1 %v7796_v28  ;;  %5570 = vmatprep.subr.bf16.mxu0 %v7801_v8  ;;  %v7876_v28 = vld [vmem:[#allocation7 + $0x23c] ss:$40 sps:$4 sm:$0xff]   ;;  %v7874_v8 = vld [vmem:[#allocation7 + $0x238] ss:$40 sps:$4 sm:$0xff]  }
 0x171   :  { %5648 = vmatprep.subr.bf16.mxu1 %v7804_v27  ;;  %v7879_v27 = vld [vmem:[#allocation7 + $0x1544] ss:$40 sps:$4 sm:$0xff]  }
 0x173   :  { %5571 = vmatpush1.bf16.msra.mxu0 %v7799_v10  ;;  %v7871_v10 = vld [vmem:[#allocation7 + $0x14f0] ss:$40 sps:$4 sm:$0xff]  }
 0x174   :  { %5649 = vmatpush1.bf16.msra.mxu1 %v7802_v34  ;;  %5572 = vmatprep.subr.bf16.mxu0 %v7807_v30  ;;  %v7882_v34 = vld [vmem:[#allocation7 + $0x28c] ss:$40 sps:$4 sm:$0xff]   ;;  %v7880_v30 = vld [vmem:[#allocation7 + $0x288] ss:$40 sps:$4 sm:$0xff]  }
 0x175   :  { %5650 = vmatprep.subr.bf16.mxu1 %v7810_v16  ;;  %v7885_v16 = vld [vmem:[#allocation7 + $0x1594] ss:$40 sps:$4 sm:$0xff]  }
 0x177   :  { %5573 = vmatpush1.bf16.msra.mxu0 %v7805_v37  ;;  %v7877_v37 = vld [vmem:[#allocation7 + $0x1540] ss:$40 sps:$4 sm:$0xff]  }
 0x178   :  { %5651 = vmatpush1.bf16.msra.mxu1 %v7808_v2  ;;  %5574 = vmatprep.subr.bf16.mxu0 %v7813_v21  ;;  %v7888_v2 = vld [vmem:[#allocation7 + $0x2dc] ss:$40 sps:$4 sm:$0xff]   ;;  %v7886_v21 = vld [vmem:[#allocation7 + $0x2d8] ss:$40 sps:$4 sm:$0xff]  }
 0x179   :  { %5652 = vmatprep.subr.bf16.mxu1 %v7816_v22  ;;  %v7891_v22 = vld [vmem:[#allocation7 + $0x15e4] ss:$40 sps:$4 sm:$0xff]  }
 0x17b   :  { %5575 = vmatpush1.bf16.msra.mxu0 %v7811_v12  ;;  %v7883_v12 = vld [vmem:[#allocation7 + $0x1590] ss:$40 sps:$4 sm:$0xff]  }
 0x17c   :  { %5653 = vmatpush1.bf16.msra.mxu1 %v7814_v24  ;;  %5576 = vmatprep.subr.bf16.mxu0 %v7819_v7  ;;  %v7894_v24 = vld [vmem:[#allocation7 + $0x32c] ss:$40 sps:$4 sm:$0xff]   ;;  %v7892_v7 = vld [vmem:[#allocation7 + $0x328] ss:$40 sps:$4 sm:$0xff]  }
 0x17d   :  { %5654 = vmatprep.subr.bf16.mxu1 %v7822_v26  ;;  %v7897_v26 = vld [vmem:[#allocation7 + $0x1634] ss:$40 sps:$4 sm:$0xff]  }
 0x17f   :  { %5577 = vmatpush1.bf16.msra.mxu0 %v7817_v15  ;;  %v7889_v15 = vld [vmem:[#allocation7 + $0x15e0] ss:$40 sps:$4 sm:$0xff]  }
 0x180   :  { %5655 = vmatpush1.bf16.msra.mxu1 %v7820_v29  ;;  %5578 = vmatprep.subr.bf16.mxu0 %v7825_v31  ;;  %v7900_v29 = vld [vmem:[#allocation7 + $0x37c] ss:$40 sps:$4 sm:$0xff]   ;;  %v7898_v31 = vld [vmem:[#allocation7 + $0x378] ss:$40 sps:$4 sm:$0xff]  }
 0x181   :  { %5656 = vmatprep.subr.bf16.mxu1 %v7828_v35  ;;  %v7903_v35 = vld [vmem:[#allocation7 + $0x1684] ss:$40 sps:$4 sm:$0xff]  }
 0x183   :  { %5579 = vmatpush1.bf16.msra.mxu0 %v7823_v32  ;;  %v7895_v32 = vld [vmem:[#allocation7 + $0x1630] ss:$40 sps:$4 sm:$0xff]  }
 0x184   :  { %5657 = vmatpush1.bf16.msra.mxu1 %v7826_v36  ;;  %5720 = vmatprep.subr.bf16.mxu0 %v7834_v39  ;;  %v7906_v36 = vld [vmem:[#allocation7 + $0x3cc] ss:$40 sps:$4 sm:$0xff]   ;;  %v7901_v39 = vld [vmem:[#allocation7 + $0x1680] ss:$40 sps:$4 sm:$0xff]  }
 0x185   :  { %5658 = vmatprep.subr.bf16.mxu1 %v7831_v38  ;;  %v7904_v38 = vld [vmem:[#allocation7 + $0x3c8] ss:$40 sps:$4 sm:$0xff]  }
 0x186   :  { %5581 = vmatmul.mubr.bf16.vlgmr.msra.gmra.mrb[20].mxu0 %v9257_v53 }
 0x187   :  { %5721 = vmatpush1.bf16.msra.mxu0 %v7832_v41  ;;  %5752 = vmatprep.mubr.bf16.mxu0 %v9239_v11  ;;  %v7909_v41 = vld [vmem:[#allocation7 + $0x16d4] ss:$40 sps:$4 sm:$0xff]  }
 0x188   :  { %5659 = vmatpush1.bf16.msra.mxu1 %v7829_v42  ;;  %5722 = vmatprep.subr.bf16.mxu0 %v7840_v33  ;;  %v7912_v42 = vld [vmem:[#allocation7 + $0x41c] ss:$40 sps:$4 sm:$0xff]   ;;  %v7910_v33 = vld [vmem:[#allocation7 + $0x418] ss:$40 sps:$4 sm:$0xff]  }
 0x189   :  { %5660 = vmatprep.subr.bf16.mxu1 %v7837_v40  ;;  %v7907_v40 = vld [vmem:[#allocation7 + $0x16d0] ss:$40 sps:$4 sm:$0xff]  }
 0x18b   :  { %5723 = vmatpush1.bf16.msra.mxu0 %v7838_v48  ;;  %v7915_v48 = vld [vmem:[#allocation7 + $0x1724] ss:$40 sps:$4 sm:$0xff]  }
 0x18c   :  { %5661 = vmatpush1.bf16.msra.mxu1 %v7835_v49  ;;  %5724 = vmatprep.subr.bf16.mxu0 %v7846_v46  ;;  %v7918_v49 = vld [vmem:[#allocation7 + $0x46c] ss:$40 sps:$4 sm:$0xff]   ;;  %v7913_v46 = vld [vmem:[#allocation7 + $0x1720] ss:$40 sps:$4 sm:$0xff]  }
 0x18d   :  { %5662 = vmatprep.subr.bf16.mxu1 %v7843_v50  ;;  %v7916_v50 = vld [vmem:[#allocation7 + $0x468] ss:$40 sps:$4 sm:$0xff]  }
 0x18f   :  { %5725 = vmatpush1.bf16.msra.mxu0 %v7844_v55  ;;  %v7921_v55 = vld [vmem:[#allocation7 + $0x1774] ss:$40 sps:$4 sm:$0xff]  }
 0x190   :  { %5663 = vmatpush1.bf16.msra.mxu1 %v7841_v52  ;;  %5726 = vmatprep.subr.bf16.mxu0 %v7852_v44  ;;  %v7924_v52 = vld [vmem:[#allocation7 + $0x4bc] ss:$40 sps:$4 sm:$0xff]   ;;  %v7919_v44 = vld [vmem:[#allocation7 + $0x1770] ss:$40 sps:$4 sm:$0xff]  }
 0x191   :  { %5664 = vmatprep.subr.bf16.mxu1 %v7849_v56  ;;  %v7922_v56 = vld [vmem:[#allocation7 + $0x4b8] ss:$40 sps:$4 sm:$0xff]  }
 0x193   :  { %5727 = vmatpush1.bf16.msra.mxu0 %v7850_v51  ;;  %v7927_v51 = vld [vmem:[#allocation7 + $0x17c4] ss:$40 sps:$4 sm:$0xff]  }
 0x194   :  { %5665 = vmatpush1.bf16.msra.mxu1 %v7847_v58  ;;  %5728 = vmatprep.subr.bf16.mxu0 %v7858_v54  ;;  %v7930_v58 = vld [vmem:[#allocation7 + $0x50c] ss:$40 sps:$4 sm:$0xff]   ;;  %v7925_v54 = vld [vmem:[#allocation7 + $0x17c0] ss:$40 sps:$4 sm:$0xff]  }
 0x195   :  { %5677 = vmatprep.subr.bf16.mxu1 %v7855_v47  ;;  %v7928_v47 = vld [vmem:[#allocation7 + $0x508] ss:$40 sps:$4 sm:$0xff]  }
 0x197   :  { %5667 = vmatmul.mubr.bf16.vlgmr.msra.gmra.mrb[0].mxu1 %v9276_v43  ;;  %5729 = vmatpush1.bf16.msra.mxu0 %v7856_v59  ;;  %v7936_v59 = vld [vmem:[#allocation7 + $0x55c] ss:$40 sps:$4 sm:$0xff]  }
 0x198   :  { %5678 = vmatpush1.bf16.msra.mxu1 %v7853_v60  ;;  %5730 = vmatprep.subr.bf16.mxu0 %v7864_v61  ;;  %v7933_v60 = vld [vmem:[#allocation7 + $0x1814] ss:$40 sps:$4 sm:$0xff]   ;;  %v7934_v61 = vld [vmem:[#allocation7 + $0x558] ss:$40 sps:$4 sm:$0xff]  }
 0x199   :  { %5679 = vmatprep.subr.bf16.mxu1 %v7861_v62  ;;  %5709 = vmatprep.mubr.bf16.mxu1 %v9287_v3  ;;  %v7931_v62 = vld [vmem:[#allocation7 + $0x1810] ss:$40 sps:$4 sm:$0xff]  }
 0x19b   :  { %5731 = vmatpush1.bf16.msra.mxu0 %v7862_v63  ;;  %v7942_v63 = vld [vmem:[#allocation7 + $0x5ac] ss:$40 sps:$4 sm:$0xff]  }
 0x19c   :  { %5680 = vmatpush1.bf16.msra.mxu1 %v7859_v9  ;;  %5732 = vmatprep.subr.bf16.mxu0 %v7870_v1  ;;  %v7939_v9 = vld [vmem:[#allocation7 + $0x1864] ss:$40 sps:$4 sm:$0xff]   ;;  %v7940_v1 = vld [vmem:[#allocation7 + $0x5a8] ss:$40 sps:$4 sm:$0xff]  }
 0x19d   :  { %5681 = vmatprep.subr.bf16.mxu1 %v7867_v13  ;;  %v7937_v13 = vld [vmem:[#allocation7 + $0x1860] ss:$40 sps:$4 sm:$0xff]  }
 0x19f   :  { %5733 = vmatpush1.bf16.msra.mxu0 %v7868_v4  ;;  %v7948_v4 = vld [vmem:[#allocation7 + $0x5fc] ss:$40 sps:$4 sm:$0xff]  }
 0x1a0   :  { %5682 = vmatpush1.bf16.msra.mxu1 %v7865_v20  ;;  %5734 = vmatprep.subr.bf16.mxu0 %v7876_v28  ;;  %v7945_v20 = vld [vmem:[#allocation7 + $0x18b4] ss:$40 sps:$4 sm:$0xff]   ;;  %v7943_v28 = vld [vmem:[#allocation7 + $0x18b0] ss:$40 sps:$4 sm:$0xff]  }
 0x1a1   :  { %5683 = vmatprep.subr.bf16.mxu1 %v7873_v5  ;;  %v7946_v5 = vld [vmem:[#allocation7 + $0x5f8] ss:$40 sps:$4 sm:$0xff]  }
 0x1a3   :  { %5735 = vmatpush1.bf16.msra.mxu0 %v7874_v8  ;;  %v7951_v8 = vld [vmem:[#allocation7 + $0x64c] ss:$40 sps:$4 sm:$0xff]  }
 0x1a4   :  { %5684 = vmatpush1.bf16.msra.mxu1 %v7871_v10  ;;  %5736 = vmatprep.subr.bf16.mxu0 %v7882_v34  ;;  %v7954_v10 = vld [vmem:[#allocation7 + $0x14] ss:$40 sps:$4 sm:$0xff]   ;;  %v7952_v34 = vld [vmem:[#allocation7 + $0x10] ss:$40 sps:$4 sm:$0xff]  }
 0x1a5   :  { %5685 = vmatprep.subr.bf16.mxu1 %v7879_v27  ;;  %v7949_v27 = vld [vmem:[#allocation7 + $0x648] ss:$40 sps:$4 sm:$0xff]  }
 0x1a7   :  { %5737 = vmatpush1.bf16.msra.mxu0 %v7880_v30  ;;  %v7957_v30 = vld [vmem:[#allocation7 + $0x69c] ss:$40 sps:$4 sm:$0xff]  }
 0x1a8   :  { %5686 = vmatpush1.bf16.msra.mxu1 %v7877_v37  ;;  %5738 = vmatprep.subr.bf16.mxu0 %v7888_v2  ;;  %v7960_v37 = vld [vmem:[#allocation7 + $0x64] ss:$40 sps:$4 sm:$0xff]   ;;  %v7958_v2 = vld [vmem:[#allocation7 + $0x60] ss:$40 sps:$4 sm:$0xff]  }
 0x1a9   :  { %5687 = vmatprep.subr.bf16.mxu1 %v7885_v16  ;;  %v7955_v16 = vld [vmem:[#allocation7 + $0x698] ss:$40 sps:$4 sm:$0xff]  }
 0x1ab   :  { %5739 = vmatpush1.bf16.msra.mxu0 %v7886_v21  ;;  %v7963_v21 = vld [vmem:[#allocation7 + $0x6ec] ss:$40 sps:$4 sm:$0xff]  }
 0x1ac   :  { %5688 = vmatpush1.bf16.msra.mxu1 %v7883_v12  ;;  %5740 = vmatprep.subr.bf16.mxu0 %v7894_v24  ;;  %v7966_v12 = vld [vmem:[#allocation7 + $0xb4] ss:$40 sps:$4 sm:$0xff]   ;;  %v7964_v24 = vld [vmem:[#allocation7 + $0xb0] ss:$40 sps:$4 sm:$0xff]  }
 0x1ad   :  { %5689 = vmatprep.subr.bf16.mxu1 %v7891_v22  ;;  %v7961_v22 = vld [vmem:[#allocation7 + $0x6e8] ss:$40 sps:$4 sm:$0xff]  }
 0x1af   :  { %5741 = vmatpush1.bf16.msra.mxu0 %v7892_v7  ;;  %v7969_v7 = vld [vmem:[#allocation7 + $0x73c] ss:$40 sps:$4 sm:$0xff]  }
 0x1b0   :  { %5690 = vmatpush1.bf16.msra.mxu1 %v7889_v15  ;;  %5742 = vmatprep.subr.bf16.mxu0 %v7900_v29  ;;  %v7972_v15 = vld [vmem:[#allocation7 + $0x104] ss:$40 sps:$4 sm:$0xff]   ;;  %v7970_v29 = vld [vmem:[#allocation7 + $0x100] ss:$40 sps:$4 sm:$0xff]  }
 0x1b1   :  { %5691 = vmatprep.subr.bf16.mxu1 %v7897_v26  ;;  %v7967_v26 = vld [vmem:[#allocation7 + $0x738] ss:$40 sps:$4 sm:$0xff]  }
 0x1b3   :  { %5743 = vmatpush1.bf16.msra.mxu0 %v7898_v31  ;;  %v7975_v31 = vld [vmem:[#allocation7 + $0x78c] ss:$40 sps:$4 sm:$0xff]  }
 0x1b4   :  { %5692 = vmatpush1.bf16.msra.mxu1 %v7895_v32  ;;  %5744 = vmatprep.subr.bf16.mxu0 %v7906_v36  ;;  %v7978_v32 = vld [vmem:[#allocation7 + $0x154] ss:$40 sps:$4 sm:$0xff]   ;;  %v7976_v36 = vld [vmem:[#allocation7 + $0x150] ss:$40 sps:$4 sm:$0xff]  }
 0x1b5   :  { %5693 = vmatprep.subr.bf16.mxu1 %v7903_v35  ;;  %v7973_v35 = vld [vmem:[#allocation7 + $0x788] ss:$40 sps:$4 sm:$0xff]  }
 0x1b7   :  { %5745 = vmatpush1.bf16.msra.mxu0 %v7904_v38  ;;  %v7981_v38 = vld [vmem:[#allocation7 + $0x7dc] ss:$40 sps:$4 sm:$0xff]  }
 0x1b8   :  { %5694 = vmatpush1.bf16.msra.mxu1 %v7901_v39  ;;  %5746 = vmatprep.subr.bf16.mxu0 %v7912_v42  ;;  %v7984_v39 = vld [vmem:[#allocation7 + $0x1a4] ss:$40 sps:$4 sm:$0xff]   ;;  %v7982_v42 = vld [vmem:[#allocation7 + $0x1a0] ss:$40 sps:$4 sm:$0xff]  }
 0x1b9   :  { %5695 = vmatprep.subr.bf16.mxu1 %v7909_v41  ;;  %v7979_v41 = vld [vmem:[#allocation7 + $0x7d8] ss:$40 sps:$4 sm:$0xff]  }
 0x1bb   :  { %5747 = vmatpush1.bf16.msra.mxu0 %v7910_v33  ;;  %v7987_v33 = vld [vmem:[#allocation7 + $0x82c] ss:$40 sps:$4 sm:$0xff]  }
 0x1bc   :  { %5696 = vmatpush1.bf16.msra.mxu1 %v7907_v40  ;;  %5748 = vmatprep.subr.bf16.mxu0 %v7918_v49  ;;  %v7990_v40 = vld [vmem:[#allocation7 + $0x1f4] ss:$40 sps:$4 sm:$0xff]   ;;  %v7988_v49 = vld [vmem:[#allocation7 + $0x1f0] ss:$40 sps:$4 sm:$0xff]  }
 0x1bd   :  { %5697 = vmatprep.subr.bf16.mxu1 %v7915_v48  ;;  %v7985_v48 = vld [vmem:[#allocation7 + $0x828] ss:$40 sps:$4 sm:$0xff]  }
 0x1bf   :  { %5749 = vmatpush1.bf16.msra.mxu0 %v7916_v50  ;;  %v7993_v50 = vld [vmem:[#allocation7 + $0x87c] ss:$40 sps:$4 sm:$0xff]  }
 0x1c0   :  { %5698 = vmatpush1.bf16.msra.mxu1 %v7913_v46  ;;  %5750 = vmatprep.subr.bf16.mxu0 %v7924_v52  ;;  %v7996_v46 = vld [vmem:[#allocation7 + $0x244] ss:$40 sps:$4 sm:$0xff]   ;;  %v7994_v52 = vld [vmem:[#allocation7 + $0x240] ss:$40 sps:$4 sm:$0xff]  }
 0x1c1   :  { %5699 = vmatprep.subr.bf16.mxu1 %v7921_v55  ;;  %v7991_v55 = vld [vmem:[#allocation7 + $0x878] ss:$40 sps:$4 sm:$0xff]  }
 0x1c3   :  { %5751 = vmatpush1.bf16.msra.mxu0 %v7922_v56  ;;  %v7999_v56 = vld [vmem:[#allocation7 + $0x8cc] ss:$40 sps:$4 sm:$0xff]  }
 0x1c4   :  { %5700 = vmatpush1.bf16.msra.mxu1 %v7919_v44  ;;  %5763 = vmatprep.subr.bf16.mxu0 %v7930_v58  ;;  %v8002_v44 = vld [vmem:[#allocation7 + $0x294] ss:$40 sps:$4 sm:$0xff]   ;;  %v8000_v58 = vld [vmem:[#allocation7 + $0x290] ss:$40 sps:$4 sm:$0xff]  }
 0x1c5   :  { %5701 = vmatprep.subr.bf16.mxu1 %v7927_v51  ;;  %v7997_v51 = vld [vmem:[#allocation7 + $0x8c8] ss:$40 sps:$4 sm:$0xff]  }
 0x1c6   :  { %5753 = vmatmul.mubr.bf16.vlgmr.msra.gmra.mrb[24].mxu0 %v9235_v6 }
 0x1c7   :  { %5764 = vmatpush1.bf16.msra.mxu0 %v7928_v47  ;;  %5795 = vmatprep.mubr.bf16.mxu0 %v9259_v57  ;;  %v8005_v47 = vld [vmem:[#allocation7 + $0x91c] ss:$40 sps:$4 sm:$0xff]  }
 0x1c8   :  { %5702 = vmatpush1.bf16.msra.mxu1 %v7925_v54  ;;  %5765 = vmatprep.subr.bf16.mxu0 %v7936_v59  ;;  %v8008_v54 = vld [vmem:[#allocation7 + $0x2e4] ss:$40 sps:$4 sm:$0xff]   ;;  %v8003_v59 = vld [vmem:[#allocation7 + $0x918] ss:$40 sps:$4 sm:$0xff]  }
 0x1c9   :  { %5703 = vmatprep.subr.bf16.mxu1 %v7933_v60  ;;  %v8006_v60 = vld [vmem:[#allocation7 + $0x2e0] ss:$40 sps:$4 sm:$0xff]  }
 0x1cb   :  { %5766 = vmatpush1.bf16.msra.mxu0 %v7934_v61  ;;  %v8011_v61 = vld [vmem:[#allocation7 + $0x96c] ss:$40 sps:$4 sm:$0xff]  }
 0x1cc   :  { %5704 = vmatpush1.bf16.msra.mxu1 %v7931_v62  ;;  %5767 = vmatprep.subr.bf16.mxu0 %v7942_v63  ;;  %v8014_v62 = vld [vmem:[#allocation7 + $0x334] ss:$40 sps:$4 sm:$0xff]   ;;  %v8009_v63 = vld [vmem:[#allocation7 + $0x968] ss:$40 sps:$4 sm:$0xff]  }
 0x1cd   :  { %5705 = vmatprep.subr.bf16.mxu1 %v7939_v9  ;;  %v8012_v9 = vld [vmem:[#allocation7 + $0x330] ss:$40 sps:$4 sm:$0xff]  }
 0x1cf   :  { %5768 = vmatpush1.bf16.msra.mxu0 %v7940_v1  ;;  %v8017_v1 = vld [vmem:[#allocation7 + $0x9bc] ss:$40 sps:$4 sm:$0xff]  }
 0x1d0   :  { %5706 = vmatpush1.bf16.msra.mxu1 %v7937_v13  ;;  %5769 = vmatprep.subr.bf16.mxu0 %v7948_v4  ;;  %v8020_v13 = vld [vmem:[#allocation7 + $0x384] ss:$40 sps:$4 sm:$0xff]   ;;  %v8015_v4 = vld [vmem:[#allocation7 + $0x9b8] ss:$40 sps:$4 sm:$0xff]  }
 0x1d1   :  { %5707 = vmatprep.subr.bf16.mxu1 %v7945_v20  ;;  %v8018_v20 = vld [vmem:[#allocation7 + $0x380] ss:$40 sps:$4 sm:$0xff]  }
 0x1d3   :  { %5770 = vmatpush1.bf16.msra.mxu0 %v7946_v5  ;;  %v8023_v5 = vld [vmem:[#allocation7 + $0xa0c] ss:$40 sps:$4 sm:$0xff]  }
 0x1d4   :  { %5708 = vmatpush1.bf16.msra.mxu1 %v7943_v28  ;;  %5771 = vmatprep.subr.bf16.mxu0 %v7951_v8  ;;  %v8026_v28 = vld [vmem:[#allocation7 + $0x3d4] ss:$40 sps:$4 sm:$0xff]   ;;  %v8021_v8 = vld [vmem:[#allocation7 + $0xa08] ss:$40 sps:$4 sm:$0xff]  }
 0x1d5   :  { %5935 = vmatprep.subr.bf16.mxu1 %v7954_v10  ;;  %v8024_v10 = vld [vmem:[#allocation7 + $0x3d0] ss:$40 sps:$4 sm:$0xff]  }
 0x1d7   :  { %5710 = vmatmul.mubr.bf16.vlgmr.msra.gmra.mrb[0].mxu1 %v9285_v0  ;;  %5772 = vmatpush1.bf16.msra.mxu0 %v7949_v27  ;;  %v8029_v27 = vld [vmem:[#allocation7 + $0xa5c] ss:$40 sps:$4 sm:$0xff]  }
 0x1d8   :  { %5936 = vmatpush1.bf16.msra.mxu1 %v7952_v34  ;;  %5967 = vmatprep.mubr.bf16.mxu1 %v9239_v11  ;;  %v8032_v34 = vld [vmem:[#allocation7 + $0x424] ss:$40 sps:$4 sm:$0xff]  }
 0x1d9   :  { %5773 = vmatprep.subr.bf16.mxu0 %v7957_v30  ;;  %5937 = vmatprep.subr.bf16.mxu1 %v7960_v37  ;;  %v8027_v30 = vld [vmem:[#allocation7 + $0xa58] ss:$40 sps:$4 sm:$0xff]  }
 0x1da   :  { %v8030_v37 = vld [vmem:[#allocation7 + $0x420] ss:$40 sps:$4 sm:$0xff]  }
 0x1db   :  { %5774 = vmatpush1.bf16.msra.mxu0 %v7955_v16  ;;  %v8035_v16 = vld [vmem:[#allocation7 + $0xaac] ss:$40 sps:$4 sm:$0xff]  }
 0x1dc   :  { %5938 = vmatpush1.bf16.msra.mxu1 %v7958_v2  ;;  %5775 = vmatprep.subr.bf16.mxu0 %v7963_v21  ;;  %v8038_v2 = vld [vmem:[#allocation7 + $0x474] ss:$40 sps:$4 sm:$0xff]   ;;  %v8033_v21 = vld [vmem:[#allocation7 + $0xaa8] ss:$40 sps:$4 sm:$0xff]  }
 0x1dd   :  { %5939 = vmatprep.subr.bf16.mxu1 %v7966_v12  ;;  %v8036_v12 = vld [vmem:[#allocation7 + $0x470] ss:$40 sps:$4 sm:$0xff]  }
 0x1df   :  { %5776 = vmatpush1.bf16.msra.mxu0 %v7961_v22  ;;  %v8041_v22 = vld [vmem:[#allocation7 + $0xafc] ss:$40 sps:$4 sm:$0xff]  }
 0x1e0   :  { %5940 = vmatpush1.bf16.msra.mxu1 %v7964_v24  ;;  %5777 = vmatprep.subr.bf16.mxu0 %v7969_v7  ;;  %v8044_v24 = vld [vmem:[#allocation7 + $0x4c4] ss:$40 sps:$4 sm:$0xff]   ;;  %v8039_v7 = vld [vmem:[#allocation7 + $0xaf8] ss:$40 sps:$4 sm:$0xff]  }
 0x1e1   :  { %5941 = vmatprep.subr.bf16.mxu1 %v7972_v15  ;;  %v8042_v15 = vld [vmem:[#allocation7 + $0x4c0] ss:$40 sps:$4 sm:$0xff]  }
 0x1e3   :  { %5778 = vmatpush1.bf16.msra.mxu0 %v7967_v26  ;;  %v8047_v26 = vld [vmem:[#allocation7 + $0xb4c] ss:$40 sps:$4 sm:$0xff]  }
 0x1e4   :  { %5942 = vmatpush1.bf16.msra.mxu1 %v7970_v29  ;;  %5779 = vmatprep.subr.bf16.mxu0 %v7975_v31  ;;  %v8050_v29 = vld [vmem:[#allocation7 + $0x514] ss:$40 sps:$4 sm:$0xff]   ;;  %v8045_v31 = vld [vmem:[#allocation7 + $0xb48] ss:$40 sps:$4 sm:$0xff]  }
 0x1e5   :  { %5943 = vmatprep.subr.bf16.mxu1 %v7978_v32  ;;  %v8048_v32 = vld [vmem:[#allocation7 + $0x510] ss:$40 sps:$4 sm:$0xff]  }
 0x1e7   :  { %5780 = vmatpush1.bf16.msra.mxu0 %v7973_v35  ;;  %v8053_v35 = vld [vmem:[#allocation7 + $0xb9c] ss:$40 sps:$4 sm:$0xff]  }
 0x1e8   :  { %5944 = vmatpush1.bf16.msra.mxu1 %v7976_v36  ;;  %5781 = vmatprep.subr.bf16.mxu0 %v7981_v38  ;;  %v8056_v36 = vld [vmem:[#allocation7 + $0x564] ss:$40 sps:$4 sm:$0xff]   ;;  %v8051_v38 = vld [vmem:[#allocation7 + $0xb98] ss:$40 sps:$4 sm:$0xff]  }
 0x1e9   :  { %5945 = vmatprep.subr.bf16.mxu1 %v7984_v39  ;;  %v8054_v39 = vld [vmem:[#allocation7 + $0x560] ss:$40 sps:$4 sm:$0xff]  }
 0x1eb   :  { %5782 = vmatpush1.bf16.msra.mxu0 %v7979_v41  ;;  %v8059_v41 = vld [vmem:[#allocation7 + $0xbec] ss:$40 sps:$4 sm:$0xff]  }
 0x1ec   :  { %5946 = vmatpush1.bf16.msra.mxu1 %v7982_v42  ;;  %5783 = vmatprep.subr.bf16.mxu0 %v7987_v33  ;;  %v8062_v42 = vld [vmem:[#allocation7 + $0x5b4] ss:$40 sps:$4 sm:$0xff]   ;;  %v8057_v33 = vld [vmem:[#allocation7 + $0xbe8] ss:$40 sps:$4 sm:$0xff]  }
 0x1ed   :  { %5947 = vmatprep.subr.bf16.mxu1 %v7990_v40  ;;  %v8060_v40 = vld [vmem:[#allocation7 + $0x5b0] ss:$40 sps:$4 sm:$0xff]  }
 0x1ef   :  { %5784 = vmatpush1.bf16.msra.mxu0 %v7985_v48  ;;  %v8065_v48 = vld [vmem:[#allocation7 + $0xc3c] ss:$40 sps:$4 sm:$0xff]  }
 0x1f0   :  { %5948 = vmatpush1.bf16.msra.mxu1 %v7988_v49  ;;  %5785 = vmatprep.subr.bf16.mxu0 %v7993_v50  ;;  %v8068_v49 = vld [vmem:[#allocation7 + $0x604] ss:$40 sps:$4 sm:$0xff]   ;;  %v8063_v50 = vld [vmem:[#allocation7 + $0xc38] ss:$40 sps:$4 sm:$0xff]  }
 0x1f1   :  { %5949 = vmatprep.subr.bf16.mxu1 %v7996_v46  ;;  %v8066_v46 = vld [vmem:[#allocation7 + $0x600] ss:$40 sps:$4 sm:$0xff]  }
 0x1f3   :  { %5786 = vmatpush1.bf16.msra.mxu0 %v7991_v55  ;;  %v8071_v55 = vld [vmem:[#allocation7 + $0xc8c] ss:$40 sps:$4 sm:$0xff]  }
 0x1f4   :  { %5950 = vmatpush1.bf16.msra.mxu1 %v7994_v52  ;;  %5787 = vmatprep.subr.bf16.mxu0 %v7999_v56  ;;  %v8074_v52 = vld [vmem:[#allocation7 + $0x654] ss:$40 sps:$4 sm:$0xff]   ;;  %v8069_v56 = vld [vmem:[#allocation7 + $0xc88] ss:$40 sps:$4 sm:$0xff]  }
 0x1f5   :  { %5951 = vmatprep.subr.bf16.mxu1 %v8002_v44  ;;  %v8072_v44 = vld [vmem:[#allocation7 + $0x650] ss:$40 sps:$4 sm:$0xff]  }
 0x1f7   :  { %5788 = vmatpush1.bf16.msra.mxu0 %v7997_v51  ;;  %v8077_v51 = vld [vmem:[#allocation7 + $0xcdc] ss:$40 sps:$4 sm:$0xff]  }
 0x1f8   :  { %5952 = vmatpush1.bf16.msra.mxu1 %v8000_v58  ;;  %5789 = vmatprep.subr.bf16.mxu0 %v8005_v47  ;;  %v8080_v58 = vld [vmem:[#allocation7 + $0x6a4] ss:$40 sps:$4 sm:$0xff]   ;;  %v8075_v47 = vld [vmem:[#allocation7 + $0xcd8] ss:$40 sps:$4 sm:$0xff]  }
 0x1f9   :  { %5953 = vmatprep.subr.bf16.mxu1 %v8008_v54  ;;  %v8078_v54 = vld [vmem:[#allocation7 + $0x6a0] ss:$40 sps:$4 sm:$0xff]  }
 0x1fb   :  { %5790 = vmatpush1.bf16.msra.mxu0 %v8003_v59  ;;  %v8083_v59 = vld [vmem:[#allocation7 + $0xd2c] ss:$40 sps:$4 sm:$0xff]  }
 0x1fc   :  { %5954 = vmatpush1.bf16.msra.mxu1 %v8006_v60  ;;  %5791 = vmatprep.subr.bf16.mxu0 %v8011_v61  ;;  %v8086_v60 = vld [vmem:[#allocation7 + $0x6f4] ss:$40 sps:$4 sm:$0xff]   ;;  %v8081_v61 = vld [vmem:[#allocation7 + $0xd28] ss:$40 sps:$4 sm:$0xff]  }
 0x1fd   :  { %5955 = vmatprep.subr.bf16.mxu1 %v8014_v62  ;;  %v8084_v62 = vld [vmem:[#allocation7 + $0x6f0] ss:$40 sps:$4 sm:$0xff]  }
 0x1ff   :  { %5792 = vmatpush1.bf16.msra.mxu0 %v8009_v63  ;;  %v8089_v63 = vld [vmem:[#allocation7 + $0xd7c] ss:$40 sps:$4 sm:$0xff]  }
 0x200   :  { %5956 = vmatpush1.bf16.msra.mxu1 %v8012_v9  ;;  %5793 = vmatprep.subr.bf16.mxu0 %v8017_v1  ;;  %v8092_v9 = vld [vmem:[#allocation7 + $0x744] ss:$40 sps:$4 sm:$0xff]   ;;  %v8087_v1 = vld [vmem:[#allocation7 + $0xd78] ss:$40 sps:$4 sm:$0xff]  }
 0x201   :  { %5957 = vmatprep.subr.bf16.mxu1 %v8020_v13  ;;  %v8090_v13 = vld [vmem:[#allocation7 + $0x740] ss:$40 sps:$4 sm:$0xff]  }
 0x203   :  { %5794 = vmatpush1.bf16.msra.mxu0 %v8015_v4  ;;  %v8095_v4 = vld [vmem:[#allocation7 + $0xdcc] ss:$40 sps:$4 sm:$0xff]  }
 0x204   :  { %5958 = vmatpush1.bf16.msra.mxu1 %v8018_v20  ;;  %5806 = vmatprep.subr.bf16.mxu0 %v8023_v5  ;;  %v8098_v20 = vld [vmem:[#allocation7 + $0x794] ss:$40 sps:$4 sm:$0xff]   ;;  %v8093_v5 = vld [vmem:[#allocation7 + $0xdc8] ss:$40 sps:$4 sm:$0xff]  }
 0x205   :  { %5959 = vmatprep.subr.bf16.mxu1 %v8026_v28  ;;  %v8096_v28 = vld [vmem:[#allocation7 + $0x790] ss:$40 sps:$4 sm:$0xff]  }
 0x206   :  { %5796 = vmatmul.mubr.bf16.vlgmr.msra.gmra.mrb[24].mxu0 %v9257_v53 }
 0x207   :  { %5807 = vmatpush1.bf16.msra.mxu0 %v8021_v8  ;;  %5838 = vmatprep.mubr.bf16.mxu0 %v9268_v17  ;;  %v8101_v8 = vld [vmem:[#allocation7 + $0xe1c] ss:$40 sps:$4 sm:$0xff]  }
 0x208   :  { %5960 = vmatpush1.bf16.msra.mxu1 %v8024_v10  ;;  %5808 = vmatprep.subr.bf16.mxu0 %v8029_v27  ;;  %v8104_v10 = vld [vmem:[#allocation7 + $0x7e4] ss:$40 sps:$4 sm:$0xff]   ;;  %v8099_v27 = vld [vmem:[#allocation7 + $0xe18] ss:$40 sps:$4 sm:$0xff]  }
 0x209   :  { %5961 = vmatprep.subr.bf16.mxu1 %v8032_v34  ;;  %v8102_v34 = vld [vmem:[#allocation7 + $0x7e0] ss:$40 sps:$4 sm:$0xff]  }
 0x20b   :  { %5809 = vmatpush1.bf16.msra.mxu0 %v8027_v30  ;;  %v8107_v30 = vld [vmem:[#allocation7 + $0xe6c] ss:$40 sps:$4 sm:$0xff]  }
 0x20c   :  { %5962 = vmatpush1.bf16.msra.mxu1 %v8030_v37  ;;  %5810 = vmatprep.subr.bf16.mxu0 %v8035_v16  ;;  %v8110_v37 = vld [vmem:[#allocation7 + $0x834] ss:$40 sps:$4 sm:$0xff]   ;;  %v8105_v16 = vld [vmem:[#allocation7 + $0xe68] ss:$40 sps:$4 sm:$0xff]  }
 0x20d   :  { %5963 = vmatprep.subr.bf16.mxu1 %v8038_v2  ;;  %v8108_v2 = vld [vmem:[#allocation7 + $0x830] ss:$40 sps:$4 sm:$0xff]  }
 0x20f   :  { %5811 = vmatpush1.bf16.msra.mxu0 %v8033_v21  ;;  %v8113_v21 = vld [vmem:[#allocation7 + $0xebc] ss:$40 sps:$4 sm:$0xff]  }
 0x210   :  { %5964 = vmatpush1.bf16.msra.mxu1 %v8036_v12  ;;  %5812 = vmatprep.subr.bf16.mxu0 %v8041_v22  ;;  %v8116_v12 = vld [vmem:[#allocation7 + $0x884] ss:$40 sps:$4 sm:$0xff]   ;;  %v8111_v22 = vld [vmem:[#allocation7 + $0xeb8] ss:$40 sps:$4 sm:$0xff]  }
 0x211   :  { %5965 = vmatprep.subr.bf16.mxu1 %v8044_v24  ;;  %v8114_v24 = vld [vmem:[#allocation7 + $0x880] ss:$40 sps:$4 sm:$0xff]  }
 0x213   :  { %5813 = vmatpush1.bf16.msra.mxu0 %v8039_v7  ;;  %v8119_v7 = vld [vmem:[#allocation7 + $0xf0c] ss:$40 sps:$4 sm:$0xff]  }
 0x214   :  { %5966 = vmatpush1.bf16.msra.mxu1 %v8042_v15  ;;  %5814 = vmatprep.subr.bf16.mxu0 %v8047_v26  ;;  %v8122_v15 = vld [vmem:[#allocation7 + $0x8d4] ss:$40 sps:$4 sm:$0xff]   ;;  %v8117_v26 = vld [vmem:[#allocation7 + $0xf08] ss:$40 sps:$4 sm:$0xff]  }
 0x215   :  { %5978 = vmatprep.subr.bf16.mxu1 %v8050_v29  ;;  %v8120_v29 = vld [vmem:[#allocation7 + $0x8d0] ss:$40 sps:$4 sm:$0xff]  }
 0x217   :  { %5968 = vmatmul.mubr.bf16.vlgmr.msra.gmra.mrb[4].mxu1 %v9235_v6  ;;  %5815 = vmatpush1.bf16.msra.mxu0 %v8045_v31  ;;  %v8125_v31 = vld [vmem:[#allocation7 + $0xf5c] ss:$40 sps:$4 sm:$0xff]  }
 0x218   :  { %5979 = vmatpush1.bf16.msra.mxu1 %v8048_v32  ;;  %6010 = vmatprep.mubr.bf16.mxu1 %v9259_v57  ;;  %v8128_v32 = vld [vmem:[#allocation7 + $0x924] ss:$40 sps:$4 sm:$0xff]  }
 0x219   :  { %5816 = vmatprep.subr.bf16.mxu0 %v8053_v35  ;;  %5980 = vmatprep.subr.bf16.mxu1 %v8056_v36  ;;  %v8123_v35 = vld [vmem:[#allocation7 + $0xf58] ss:$40 sps:$4 sm:$0xff]  }
 0x21a   :  { %v8126_v36 = vld [vmem:[#allocation7 + $0x920] ss:$40 sps:$4 sm:$0xff]  }
 0x21b   :  { %5817 = vmatpush1.bf16.msra.mxu0 %v8051_v38  ;;  %v8131_v38 = vld [vmem:[#allocation7 + $0xfac] ss:$40 sps:$4 sm:$0xff]  }
 0x21c   :  { %5981 = vmatpush1.bf16.msra.mxu1 %v8054_v39  ;;  %5818 = vmatprep.subr.bf16.mxu0 %v8059_v41  ;;  %v8134_v39 = vld [vmem:[#allocation7 + $0x974] ss:$40 sps:$4 sm:$0xff]   ;;  %v8129_v41 = vld [vmem:[#allocation7 + $0xfa8] ss:$40 sps:$4 sm:$0xff]  }
 0x21d   :  { %5982 = vmatprep.subr.bf16.mxu1 %v8062_v42  ;;  %v8132_v42 = vld [vmem:[#allocation7 + $0x970] ss:$40 sps:$4 sm:$0xff]  }
 0x21f   :  { %5819 = vmatpush1.bf16.msra.mxu0 %v8057_v33  ;;  %v8137_v33 = vld [vmem:[#allocation7 + $0xffc] ss:$40 sps:$4 sm:$0xff]  }
 0x220   :  { %5983 = vmatpush1.bf16.msra.mxu1 %v8060_v40  ;;  %5820 = vmatprep.subr.bf16.mxu0 %v8065_v48  ;;  %v8140_v40 = vld [vmem:[#allocation7 + $0x9c4] ss:$40 sps:$4 sm:$0xff]   ;;  %v8135_v48 = vld [vmem:[#allocation7 + $0xff8] ss:$40 sps:$4 sm:$0xff]  }
 0x221   :  { %5984 = vmatprep.subr.bf16.mxu1 %v8068_v49  ;;  %v8138_v49 = vld [vmem:[#allocation7 + $0x9c0] ss:$40 sps:$4 sm:$0xff]  }
 0x223   :  { %5821 = vmatpush1.bf16.msra.mxu0 %v8063_v50  ;;  %v8143_v50 = vld [vmem:[#allocation7 + $0x104c] ss:$40 sps:$4 sm:$0xff]  }
 0x224   :  { %5985 = vmatpush1.bf16.msra.mxu1 %v8066_v46  ;;  %5822 = vmatprep.subr.bf16.mxu0 %v8071_v55  ;;  %v8146_v46 = vld [vmem:[#allocation7 + $0xa14] ss:$40 sps:$4 sm:$0xff]   ;;  %v8141_v55 = vld [vmem:[#allocation7 + $0x1048] ss:$40 sps:$4 sm:$0xff]  }
 0x225   :  { %5986 = vmatprep.subr.bf16.mxu1 %v8074_v52  ;;  %v8144_v52 = vld [vmem:[#allocation7 + $0xa10] ss:$40 sps:$4 sm:$0xff]  }
 0x227   :  { %5823 = vmatpush1.bf16.msra.mxu0 %v8069_v56  ;;  %v8149_v56 = vld [vmem:[#allocation7 + $0x109c] ss:$40 sps:$4 sm:$0xff]  }
 0x228   :  { %5987 = vmatpush1.bf16.msra.mxu1 %v8072_v44  ;;  %5824 = vmatprep.subr.bf16.mxu0 %v8077_v51  ;;  %v8152_v44 = vld [vmem:[#allocation7 + $0xa64] ss:$40 sps:$4 sm:$0xff]   ;;  %v8147_v51 = vld [vmem:[#allocation7 + $0x1098] ss:$40 sps:$4 sm:$0xff]  }
 0x229   :  { %5988 = vmatprep.subr.bf16.mxu1 %v8080_v58  ;;  %v8150_v58 = vld [vmem:[#allocation7 + $0xa60] ss:$40 sps:$4 sm:$0xff]  }
 0x22b   :  { %5825 = vmatpush1.bf16.msra.mxu0 %v8075_v47  ;;  %v8155_v47 = vld [vmem:[#allocation7 + $0x10ec] ss:$40 sps:$4 sm:$0xff]  }
 0x22c   :  { %5989 = vmatpush1.bf16.msra.mxu1 %v8078_v54  ;;  %5826 = vmatprep.subr.bf16.mxu0 %v8083_v59  ;;  %v8158_v59 = vld [vmem:[#allocation7 + $0xab4] ss:$40 sps:$4 sm:$0xff]  }
 0x22d   :  { %5990 = vmatprep.subr.bf16.mxu1 %v8086_v60 }
 0x22f   :  { %5827 = vmatpush1.bf16.msra.mxu0 %v8081_v61 }
 0x230   :  { %5991 = vmatpush1.bf16.msra.mxu1 %v8084_v62  ;;  %5828 = vmatprep.subr.bf16.mxu0 %v8089_v63  ;;  %v8153_v62 = vld [vmem:[#allocation7 + $0x10e8] ss:$40 sps:$4 sm:$0xff]  }
 0x231   :  { %5992 = vmatprep.subr.bf16.mxu1 %v8092_v9  ;;  %v8156_v9 = vld [vmem:[#allocation7 + $0xab0] ss:$40 sps:$4 sm:$0xff]  }
 0x233   :  { %5829 = vmatpush1.bf16.msra.mxu0 %v8087_v1  ;;  %v8161_v1 = vld [vmem:[#allocation7 + $0x113c] ss:$40 sps:$4 sm:$0xff]  }
 0x234   :  { %5993 = vmatpush1.bf16.msra.mxu1 %v8090_v13  ;;  %5830 = vmatprep.subr.bf16.mxu0 %v8095_v4  ;;  %v8164_v13 = vld [vmem:[#allocation7 + $0xb04] ss:$40 sps:$4 sm:$0xff]   ;;  %v8159_v4 = vld [vmem:[#allocation7 + $0x1138] ss:$40 sps:$4 sm:$0xff]  }
 0x235   :  { %5994 = vmatprep.subr.bf16.mxu1 %v8098_v20  ;;  %v8162_v20 = vld [vmem:[#allocation7 + $0xb00] ss:$40 sps:$4 sm:$0xff]  }
 0x237   :  { %5831 = vmatpush1.bf16.msra.mxu0 %v8093_v5  ;;  %v8167_v5 = vld [vmem:[#allocation7 + $0x118c] ss:$40 sps:$4 sm:$0xff]  }
 0x238   :  { %5995 = vmatpush1.bf16.msra.mxu1 %v8096_v28  ;;  %5832 = vmatprep.subr.bf16.mxu0 %v8101_v8  ;;  %v8170_v28 = vld [vmem:[#allocation7 + $0xb54] ss:$40 sps:$4 sm:$0xff]   ;;  %v8165_v8 = vld [vmem:[#allocation7 + $0x1188] ss:$40 sps:$4 sm:$0xff]  }
 0x239   :  { %5996 = vmatprep.subr.bf16.mxu1 %v8104_v10  ;;  %v8168_v10 = vld [vmem:[#allocation7 + $0xb50] ss:$40 sps:$4 sm:$0xff]  }
 0x23b   :  { %5833 = vmatpush1.bf16.msra.mxu0 %v8099_v27  ;;  %v8173_v27 = vld [vmem:[#allocation7 + $0x11dc] ss:$40 sps:$4 sm:$0xff]  }
 0x23c   :  { %5997 = vmatpush1.bf16.msra.mxu1 %v8102_v34  ;;  %5834 = vmatprep.subr.bf16.mxu0 %v8107_v30  ;;  %v8176_v34 = vld [vmem:[#allocation7 + $0xba4] ss:$40 sps:$4 sm:$0xff]   ;;  %v8171_v30 = vld [vmem:[#allocation7 + $0x11d8] ss:$40 sps:$4 sm:$0xff]  }
 0x23d   :  { %5998 = vmatprep.subr.bf16.mxu1 %v8110_v37  ;;  %v8174_v37 = vld [vmem:[#allocation7 + $0xba0] ss:$40 sps:$4 sm:$0xff]  }
 0x23f   :  { %5835 = vmatpush1.bf16.msra.mxu0 %v8105_v16  ;;  %v8179_v16 = vld [vmem:[#allocation7 + $0x122c] ss:$40 sps:$4 sm:$0xff]  }
 0x240   :  { %5999 = vmatpush1.bf16.msra.mxu1 %v8108_v2  ;;  %5836 = vmatprep.subr.bf16.mxu0 %v8113_v21  ;;  %v8182_v2 = vld [vmem:[#allocation7 + $0xbf4] ss:$40 sps:$4 sm:$0xff]   ;;  %v8177_v21 = vld [vmem:[#allocation7 + $0x1228] ss:$40 sps:$4 sm:$0xff]  }
 0x241   :  { %6000 = vmatprep.subr.bf16.mxu1 %v8116_v12  ;;  %v8180_v12 = vld [vmem:[#allocation7 + $0xbf0] ss:$40 sps:$4 sm:$0xff]  }
 0x243   :  { %5837 = vmatpush1.bf16.msra.mxu0 %v8111_v22  ;;  %v8185_v22 = vld [vmem:[#allocation7 + $0x127c] ss:$40 sps:$4 sm:$0xff]  }
 0x244   :  { %6001 = vmatpush1.bf16.msra.mxu1 %v8114_v24  ;;  %5849 = vmatprep.subr.bf16.mxu0 %v8119_v7  ;;  %v8188_v24 = vld [vmem:[#allocation7 + $0xc44] ss:$40 sps:$4 sm:$0xff]   ;;  %v8183_v7 = vld [vmem:[#allocation7 + $0x1278] ss:$40 sps:$4 sm:$0xff]  }
 0x245   :  { %6002 = vmatprep.subr.bf16.mxu1 %v8122_v15  ;;  %v8186_v15 = vld [vmem:[#allocation7 + $0xc40] ss:$40 sps:$4 sm:$0xff]  }
 0x246   :  { %5839 = vmatmul.mubr.bf16.vlgmr.msra.gmra.mrb[24].mxu0 %v9266_v14 }
 0x247   :  { %5850 = vmatpush1.bf16.msra.mxu0 %v8117_v26  ;;  %5881 = vmatprep.mubr.bf16.mxu0 %v9278_v45  ;;  %v8191_v26 = vld [vmem:[#allocation7 + $0x12cc] ss:$40 sps:$4 sm:$0xff]  }
 0x248   :  { %6003 = vmatpush1.bf16.msra.mxu1 %v8120_v29  ;;  %5851 = vmatprep.subr.bf16.mxu0 %v8125_v31  ;;  %v8194_v29 = vld [vmem:[#allocation7 + $0xc94] ss:$40 sps:$4 sm:$0xff]   ;;  %v8189_v31 = vld [vmem:[#allocation7 + $0x12c8] ss:$40 sps:$4 sm:$0xff]  }
 0x249   :  { %6004 = vmatprep.subr.bf16.mxu1 %v8128_v32  ;;  %v8192_v32 = vld [vmem:[#allocation7 + $0xc90] ss:$40 sps:$4 sm:$0xff]  }
 0x24b   :  { %5852 = vmatpush1.bf16.msra.mxu0 %v8123_v35  ;;  %v8197_v35 = vld [vmem:[#allocation7 + $0x131c] ss:$40 sps:$4 sm:$0xff]  }
 0x24c   :  { %6005 = vmatpush1.bf16.msra.mxu1 %v8126_v36  ;;  %5853 = vmatprep.subr.bf16.mxu0 %v8131_v38  ;;  %v8200_v36 = vld [vmem:[#allocation7 + $0xce4] ss:$40 sps:$4 sm:$0xff]   ;;  %v8195_v38 = vld [vmem:[#allocation7 + $0x1318] ss:$40 sps:$4 sm:$0xff]  }
 0x24d   :  { %6006 = vmatprep.subr.bf16.mxu1 %v8134_v39  ;;  %v8198_v39 = vld [vmem:[#allocation7 + $0xce0] ss:$40 sps:$4 sm:$0xff]  }
 0x24f   :  { %5854 = vmatpush1.bf16.msra.mxu0 %v8129_v41  ;;  %v8203_v41 = vld [vmem:[#allocation7 + $0x136c] ss:$40 sps:$4 sm:$0xff]  }
 0x250   :  { %6007 = vmatpush1.bf16.msra.mxu1 %v8132_v42  ;;  %5855 = vmatprep.subr.bf16.mxu0 %v8137_v33  ;;  %v8206_v42 = vld [vmem:[#allocation7 + $0xd34] ss:$40 sps:$4 sm:$0xff]   ;;  %v8201_v33 = vld [vmem:[#allocation7 + $0x1368] ss:$40 sps:$4 sm:$0xff]  }
 0x251   :  { %6008 = vmatprep.subr.bf16.mxu1 %v8140_v40  ;;  %v8204_v40 = vld [vmem:[#allocation7 + $0xd30] ss:$40 sps:$4 sm:$0xff]  }
 0x253   :  { %5856 = vmatpush1.bf16.msra.mxu0 %v8135_v48  ;;  %v8209_v48 = vld [vmem:[#allocation7 + $0x13bc] ss:$40 sps:$4 sm:$0xff]  }
 0x254   :  { %6009 = vmatpush1.bf16.msra.mxu1 %v8138_v49  ;;  %5857 = vmatprep.subr.bf16.mxu0 %v8143_v50  ;;  %v8212_v49 = vld [vmem:[#allocation7 + $0xd84] ss:$40 sps:$4 sm:$0xff]   ;;  %v8207_v50 = vld [vmem:[#allocation7 + $0x13b8] ss:$40 sps:$4 sm:$0xff]  }
 0x255   :  { %6021 = vmatprep.subr.bf16.mxu1 %v8146_v46  ;;  %v8210_v46 = vld [vmem:[#allocation7 + $0xd80] ss:$40 sps:$4 sm:$0xff]  }
 0x257   :  { %6011 = vmatmul.mubr.bf16.vlgmr.msra.gmra.mrb[4].mxu1 %v9257_v53  ;;  %5858 = vmatpush1.bf16.msra.mxu0 %v8141_v55  ;;  %v8215_v55 = vld [vmem:[#allocation7 + $0x140c] ss:$40 sps:$4 sm:$0xff]  }
 0x258   :  { %6022 = vmatpush1.bf16.msra.mxu1 %v8144_v52  ;;  %6053 = vmatprep.mubr.bf16.mxu1 %v9268_v17  ;;  %v8218_v52 = vld [vmem:[#allocation7 + $0xdd4] ss:$40 sps:$4 sm:$0xff]  }
 0x259   :  { %v9305_v54 = vpop.f32.mrb[20].mxu0  ;;  %5859 = vmatprep.subr.bf16.mxu0 %v8149_v56  ;;  %6023 = vmatprep.subr.bf16.mxu1 %v8152_v44  ;;  %v8213_v56 = vld [vmem:[#allocation7 + $0x1408] ss:$40 sps:$4 sm:$0xff]  }
 0x25a   :  { %v9307_v60 = vpop.f32.mrb[21].mxu0  ;;  %v8216_v44 = vld [vmem:[#allocation7 + $0xdd0] ss:$40 sps:$4 sm:$0xff]  }
 0x25b   :  { %v9309_v61 = vpop.f32.mrb[22].mxu0  ;;  %5860 = vmatpush1.bf16.msra.mxu0 %v8147_v51  ;;  %v8221_v51 = vld [vmem:[#allocation7 + $0x145c] ss:$40 sps:$4 sm:$0xff]  }
 0x25c   :  { %6024 = vmatpush1.bf16.msra.mxu1 %v8150_v58  ;;  %v9311_v63 = vpop.f32.mrb[23].mxu0  ;;  %5861 = vmatprep.subr.bf16.mxu0 %v8155_v47  ;;  %v8224_v58 = vld [vmem:[#allocation7 + $0xe24] ss:$40 sps:$4 sm:$0xff]   ;;  %v8219_v47 = vld [vmem:[#allocation7 + $0x1458] ss:$40 sps:$4 sm:$0xff]  }
 0x25d   :  { %6025 = vmatprep.subr.bf16.mxu1 %v8158_v59  ;;  %v8222_v59 = vld [vmem:[#allocation7 + $0xe20] ss:$40 sps:$4 sm:$0xff]  }
 0x25f   :  { %5862 = vmatpush1.bf16.msra.mxu0 %v8153_v62  ;;  %v8227_v62 = vld [vmem:[#allocation7 + $0x14ac] ss:$40 sps:$4 sm:$0xff]  }
 0x260   :  { %6026 = vmatpush1.bf16.msra.mxu1 %v8156_v9  ;;  %5863 = vmatprep.subr.bf16.mxu0 %v8161_v1  ;;  %v8230_v9 = vld [vmem:[#allocation7 + $0xe74] ss:$40 sps:$4 sm:$0xff]   ;;  %v8225_v1 = vld [vmem:[#allocation7 + $0x14a8] ss:$40 sps:$4 sm:$0xff]  }
 0x261   :  { %6027 = vmatprep.subr.bf16.mxu1 %v8164_v13  ;;  %v8228_v13 = vld [vmem:[#allocation7 + $0xe70] ss:$40 sps:$4 sm:$0xff]  }
 0x263   :  { %5864 = vmatpush1.bf16.msra.mxu0 %v8159_v4  ;;  %v8233_v4 = vld [vmem:[#allocation7 + $0x14fc] ss:$40 sps:$4 sm:$0xff]  }
 0x264   :  { %6028 = vmatpush1.bf16.msra.mxu1 %v8162_v20  ;;  %5865 = vmatprep.subr.bf16.mxu0 %v8167_v5  ;;  %v8236_v20 = vld [vmem:[#allocation7 + $0xec4] ss:$40 sps:$4 sm:$0xff]   ;;  %v8231_v5 = vld [vmem:[#allocation7 + $0x14f8] ss:$40 sps:$4 sm:$0xff]  }
 0x265   :  { %6029 = vmatprep.subr.bf16.mxu1 %v8170_v28  ;;  %v8234_v28 = vld [vmem:[#allocation7 + $0xec0] ss:$40 sps:$4 sm:$0xff]  }
 0x267   :  { %5866 = vmatpush1.bf16.msra.mxu0 %v8165_v8  ;;  %v8239_v8 = vld [vmem:[#allocation7 + $0x154c] ss:$40 sps:$4 sm:$0xff]  }
 0x268   :  { %6030 = vmatpush1.bf16.msra.mxu1 %v8168_v10  ;;  %5867 = vmatprep.subr.bf16.mxu0 %v8173_v27  ;;  %v8242_v10 = vld [vmem:[#allocation7 + $0xf14] ss:$40 sps:$4 sm:$0xff]   ;;  %v8237_v27 = vld [vmem:[#allocation7 + $0x1548] ss:$40 sps:$4 sm:$0xff]  }
 0x269   :  { %6031 = vmatprep.subr.bf16.mxu1 %v8176_v34  ;;  %v8240_v34 = vld [vmem:[#allocation7 + $0xf10] ss:$40 sps:$4 sm:$0xff]  }
 0x26b   :  { %5868 = vmatpush1.bf16.msra.mxu0 %v8171_v30  ;;  %v8245_v30 = vld [vmem:[#allocation7 + $0x159c] ss:$40 sps:$4 sm:$0xff]  }
 0x26c   :  { %6032 = vmatpush1.bf16.msra.mxu1 %v8174_v37  ;;  %5869 = vmatprep.subr.bf16.mxu0 %v8179_v16  ;;  %v8248_v37 = vld [vmem:[#allocation7 + $0xf64] ss:$40 sps:$4 sm:$0xff]   ;;  %v8243_v16 = vld [vmem:[#allocation7 + $0x1598] ss:$40 sps:$4 sm:$0xff]  }
 0x26d   :  { %6033 = vmatprep.subr.bf16.mxu1 %v8182_v2  ;;  %v8246_v2 = vld [vmem:[#allocation7 + $0xf60] ss:$40 sps:$4 sm:$0xff]  }
 0x26f   :  { %5870 = vmatpush1.bf16.msra.mxu0 %v8177_v21  ;;  %v8251_v21 = vld [vmem:[#allocation7 + $0x15ec] ss:$40 sps:$4 sm:$0xff]  }
 0x270   :  { %6034 = vmatpush1.bf16.msra.mxu1 %v8180_v12  ;;  %5871 = vmatprep.subr.bf16.mxu0 %v8185_v22  ;;  %v8254_v12 = vld [vmem:[#allocation7 + $0xfb4] ss:$40 sps:$4 sm:$0xff]   ;;  %v1407_v22 = vld [vmem:[#allocation8] sm:$0xff] }
 0x271   :  { %6035 = vmatprep.subr.bf16.mxu1 %v8188_v24  ;;  %v8249_v24 = vld [vmem:[#allocation7 + $0x15e8] ss:$40 sps:$4 sm:$0xff]  }
 0x273   :  { %5872 = vmatpush1.bf16.msra.mxu0 %v8183_v7  ;;  %v8252_v7 = vld [vmem:[#allocation7 + $0xfb0] ss:$40 sps:$4 sm:$0xff]  }
 0x274   :  { %6036 = vmatpush1.bf16.msra.mxu1 %v8186_v15  ;;  %5873 = vmatprep.subr.bf16.mxu0 %v8191_v26  ;;  %v8257_v15 = vld [vmem:[#allocation7 + $0x163c] ss:$40 sps:$4 sm:$0xff]   ;;  %v9317_v26 = vunpack.c.l.bf16 %v1407_v22  ;;  %v8299_v22 = vld [vmem:[#allocation7 + $0x186c] ss:$40 sps:$4 sm:$0xff]  }
 0x275   :  { %6037 = vmatprep.subr.bf16.mxu1 %v8194_v29  ;;  %v8260_v29 = vld [vmem:[#allocation7 + $0x1004] ss:$40 sps:$4 sm:$0xff]  }
 0x277   :  { %5874 = vmatpush1.bf16.msra.mxu0 %v8189_v31  ;;  %v8255_v31 = vld [vmem:[#allocation7 + $0x1638] ss:$40 sps:$4 sm:$0xff]  }
 0x278   :  { %6038 = vmatpush1.bf16.msra.mxu1 %v8192_v32  ;;  %5875 = vmatprep.subr.bf16.mxu0 %v8197_v35  ;;  %v8258_v32 = vld [vmem:[#allocation7 + $0x1000] ss:$40 sps:$4 sm:$0xff]   ;;  %v8263_v35 = vld [vmem:[#allocation7 + $0x168c] ss:$40 sps:$4 sm:$0xff]  }
 0x279   :  { %6039 = vmatprep.subr.bf16.mxu1 %v8200_v36  ;;  %v1418_v36 = vrot.slane %v9317_v26, %v9155_v18 }
 0x27b   :  { %5876 = vmatpush1.bf16.msra.mxu0 %v8195_v38  ;;  %v8266_v38 = vld [vmem:[#allocation7 + $0x1054] ss:$40 sps:$4 sm:$0xff]  }
 0x27c   :  { %6040 = vmatpush1.bf16.msra.mxu1 %v8198_v39  ;;  %5877 = vmatprep.subr.bf16.mxu0 %v8203_v41  ;;  %v1422_v39 = vrot.slane %v9317_v26, %v9157_v19  ;;  %v8261_v41 = vld [vmem:[#allocation7 + $0x1688] ss:$40 sps:$4 sm:$0xff]  }
 0x27d   :  { %6041 = vmatprep.subr.bf16.mxu1 %v8206_v42  ;;  %v8264_v42 = vld [vmem:[#allocation7 + $0x1050] ss:$40 sps:$4 sm:$0xff]  }
 0x27f   :  { %5878 = vmatpush1.bf16.msra.mxu0 %v8201_v33  ;;  %v8269_v33 = vld [vmem:[#allocation7 + $0x16dc] ss:$40 sps:$4 sm:$0xff]  }
 0x280   :  { %6042 = vmatpush1.bf16.msra.mxu1 %v8204_v40  ;;  %5879 = vmatprep.subr.bf16.mxu0 %v8209_v48  ;;  %v1468_v40 = vrot.slane %v1418_v36, %v9155_v18  ;;  %v8272_v48 = vld [vmem:[#allocation7 + $0x10a4] ss:$40 sps:$4 sm:$0xff]  }
 0x281   :  { %6043 = vmatprep.subr.bf16.mxu1 %v8212_v49  ;;  %v1472_v49 = vrot.slane %v1422_v39, %v9155_v18  ;;  %v8314_v36 = vld [vmem:[#allocation7 + $0x1c] ss:$40 sps:$4 sm:$0xff]   ;;  %v8312_v39 = vld [vmem:[#allocation7 + $0x18] ss:$40 sps:$4 sm:$0xff]  }
 0x283   :  { %5880 = vmatpush1.bf16.msra.mxu0 %v8207_v50  ;;  %v8267_v50 = vld [vmem:[#allocation7 + $0x16d8] ss:$40 sps:$4 sm:$0xff]  }
 0x284   :  { %6044 = vmatpush1.bf16.msra.mxu1 %v8210_v46  ;;  %5892 = vmatprep.subr.bf16.mxu0 %v8215_v55  ;;  %v8270_v46 = vld [vmem:[#allocation7 + $0x10a0] ss:$40 sps:$4 sm:$0xff]   ;;  %v8275_v55 = vld [vmem:[#allocation7 + $0x172c] ss:$40 sps:$4 sm:$0xff]  }
 0x285   :  { %6045 = vmatprep.subr.bf16.mxu1 %v8218_v52  ;;  %v7525_v52 = vadd.f32 %v9305_v54, %v1468_v40 }
 0x286   :  { %5882 = vmatmul.mubr.bf16.vlgmr.msra.gmra.mrb[24].mxu0 %v9276_v43 }
 0x287   :  { %5893 = vmatpush1.bf16.msra.mxu0 %v8213_v56  ;;  %5924 = vmatprep.mubr.bf16.mxu0 %v9287_v3  ;;  %v8278_v56 = vld [vmem:[#allocation7 + $0x10f4] ss:$40 sps:$4 sm:$0xff]  }
 0x288   :  { %6046 = vmatpush1.bf16.msra.mxu1 %v8216_v44  ;;  %5894 = vmatprep.subr.bf16.mxu0 %v8221_v51  ;;  %v7527_v44 = vadd.f32 %v9307_v60, %v1472_v49 }
 0x289   :  { %6047 = vmatprep.subr.bf16.mxu1 %v8224_v58  ;;  %v7529_v58 = vadd.f32 %v9309_v61, %v1468_v40  ;;  %v8279_v61 = vld [vmem:[#allocation7 + $0x1778] ss:$40 sps:$4 sm:$0xff]   ;;  %v8318_v40 = vld [vmem:[#allocation7 + $0x68] ss:$40 sps:$4 sm:$0xff]  }
 0x28b   :  { %5895 = vmatpush1.bf16.msra.mxu0 %v8219_v47 }
 0x28c   :  { %6048 = vmatpush1.bf16.msra.mxu1 %v8222_v59  ;;  %5896 = vmatprep.subr.bf16.mxu0 %v8227_v62  ;;  %v8273_v62 = vld [vmem:[#allocation7 + $0x1728] ss:$40 sps:$4 sm:$0xff]  }
 0x28d   :  { %6049 = vmatprep.subr.bf16.mxu1 %v8230_v9  ;;  %v7531_v9 = vadd.f32 %v9311_v63, %v1472_v49  ;;  %v8287_v63 = vld [vmem:[#allocation7 + $0x17cc] ss:$40 sps:$4 sm:$0xff]   ;;  %v8326_v49 = vld [vmem:[#allocation7 + $0xbc] ss:$40 sps:$4 sm:$0xff]  }
 0x28f   :  { %5897 = vmatpush1.bf16.msra.mxu0 %v8225_v1 }
 0x290   :  { %6050 = vmatpush1.bf16.msra.mxu1 %v8228_v13  ;;  %5898 = vmatprep.subr.bf16.mxu0 %v8233_v4  ;;  %v8276_v4 = vld [vmem:[#allocation7 + $0x10f0] ss:$40 sps:$4 sm:$0xff]  }
 0x291   :  { %6051 = vmatprep.subr.bf16.mxu1 %v8236_v20  ;;  %v8281_v20 = vld [vmem:[#allocation7 + $0x177c] ss:$40 sps:$4 sm:$0xff]  }
 0x293   :  { %5899 = vmatpush1.bf16.msra.mxu0 %v8231_v5 }
 0x294   :  { %6052 = vmatpush1.bf16.msra.mxu1 %v8234_v28  ;;  %5900 = vmatprep.subr.bf16.mxu0 %v8239_v8  ;;  %v8284_v28 = vld [vmem:[#allocation7 + $0x1144] ss:$40 sps:$4 sm:$0xff]  }
 0x295   :  { %6064 = vmatprep.subr.bf16.mxu1 %v8242_v10 }
 0x297   :  { %6054 = vmatmul.mubr.bf16.vlgmr.msra.gmra.mrb[4].mxu1 %v9266_v14  ;;  %5901 = vmatpush1.bf16.msra.mxu0 %v8237_v27  ;;  %v8282_v27 = vld [vmem:[#allocation7 + $0x1140] ss:$40 sps:$4 sm:$0xff]  }
 0x298   :  { %6065 = vmatpush1.bf16.msra.mxu1 %v8240_v34  ;;  %6096 = vmatprep.mubr.bf16.mxu1 %v9278_v45  ;;  %v8290_v34 = vld [vmem:[#allocation7 + $0x1194] ss:$40 sps:$4 sm:$0xff]  }
 0x299   :  { %5902 = vmatprep.subr.bf16.mxu0 %v8245_v30  ;;  %6066 = vmatprep.subr.bf16.mxu1 %v8248_v37  ;;  %v8285_v30 = vld [vmem:[#allocation7 + $0x17c8] ss:$40 sps:$4 sm:$0xff]  }
 0x29a   :  { %v8288_v37 = vld [vmem:[#allocation7 + $0x1190] ss:$40 sps:$4 sm:$0xff]  }
 0x29b   :  { %5903 = vmatpush1.bf16.msra.mxu0 %v8243_v16  ;;  %v8293_v16 = vld [vmem:[#allocation7 + $0x181c] ss:$40 sps:$4 sm:$0xff]  }
 0x29c   :  { %6067 = vmatpush1.bf16.msra.mxu1 %v8246_v2  ;;  %5904 = vmatprep.subr.bf16.mxu0 %v8251_v21  ;;  %v8296_v2 = vld [vmem:[#allocation7 + $0x11e4] ss:$40 sps:$4 sm:$0xff]   ;;  %v8291_v21 = vld [vmem:[#allocation7 + $0x1818] ss:$40 sps:$4 sm:$0xff]  }
 0x29d   :  { %6068 = vmatprep.subr.bf16.mxu1 %v8254_v12  ;;  %v8294_v12 = vld [vmem:[#allocation7 + $0x11e0] ss:$40 sps:$4 sm:$0xff]  }
 0x29f   :  { %5905 = vmatpush1.bf16.msra.mxu0 %v8249_v24  ;;  %v8302_v24 = vld [vmem:[#allocation7 + $0x1234] ss:$40 sps:$4 sm:$0xff]  }
 0x2a0   :  { %6069 = vmatpush1.bf16.msra.mxu1 %v8252_v7  ;;  %5906 = vmatprep.subr.bf16.mxu0 %v8257_v15  ;;  %v8297_v7 = vld [vmem:[#allocation7 + $0x1868] ss:$40 sps:$4 sm:$0xff]  }
 0x2a1   :  { %6070 = vmatprep.subr.bf16.mxu1 %v8260_v29  ;;  %v8300_v15 = vld [vmem:[#allocation7 + $0x1230] ss:$40 sps:$4 sm:$0xff]   ;;  %v8305_v29 = vld [vmem:[#allocation7 + $0x18bc] ss:$40 sps:$4 sm:$0xff]  }
 0x2a3   :  { %5907 = vmatpush1.bf16.msra.mxu0 %v8255_v31  ;;  %v8308_v31 = vld [vmem:[#allocation7 + $0x1284] ss:$40 sps:$4 sm:$0xff]  }
 0x2a4   :  { %6071 = vmatpush1.bf16.msra.mxu1 %v8258_v32  ;;  %5908 = vmatprep.subr.bf16.mxu0 %v8263_v35  ;;  %v8303_v32 = vld [vmem:[#allocation7 + $0x18b8] ss:$40 sps:$4 sm:$0xff]  }
 0x2a5   :  { %6072 = vmatprep.subr.bf16.mxu1 %v8266_v38  ;;  %v8306_v35 = vld [vmem:[#allocation7 + $0x1280] ss:$40 sps:$4 sm:$0xff]   ;;  %v8311_v38 = vld [vmem:[#allocation7 + $0x12d4] ss:$40 sps:$4 sm:$0xff]  }
 0x2a7   :  { %5909 = vmatpush1.bf16.msra.mxu0 %v8261_v41  ;;  %v8309_v41 = vld [vmem:[#allocation7 + $0x12d0] ss:$40 sps:$4 sm:$0xff]  }
 0x2a8   :  { %6073 = vmatpush1.bf16.msra.mxu1 %v8264_v42  ;;  %5910 = vmatprep.subr.bf16.mxu0 %v8269_v33  ;;  %v8320_v42 = vld [vmem:[#allocation7 + $0x6c] ss:$40 sps:$4 sm:$0xff]  }
 0x2a9   :  { %6074 = vmatprep.subr.bf16.mxu1 %v8272_v48  ;;  %v8317_v33 = vld [vmem:[#allocation7 + $0x1324] ss:$40 sps:$4 sm:$0xff]   ;;  %v8315_v48 = vld [vmem:[#allocation7 + $0x1320] ss:$40 sps:$4 sm:$0xff]  }
 0x2aa   :  { %v5711_v51 = vpop.f32.mrb[0].mxu1 }
 0x2ab   :  { %v7526_v47 = vadd.f32 %v7525_v52, %v5711_v51  ;;  %v5713_v59 = vpop.f32.mrb[1].mxu1  ;;  %5911 = vmatpush1.bf16.msra.mxu0 %v8267_v50  ;;  %v8323_v50 = vld [vmem:[#allocation7 + $0x1374] ss:$40 sps:$4 sm:$0xff]   ;;  %v8327_v51 = vld [vmem:[#allocation7 + $0x13c0] ss:$40 sps:$4 sm:$0xff]  }
 0x2ac   :  { %v7528_v1 = vadd.f32 %v7527_v44, %v5713_v59  ;;  %v5715_v13 = vpop.f32.mrb[2].mxu1  ;;  %6075 = vmatpush1.bf16.msra.mxu1 %v8270_v46  ;;  %5912 = vmatprep.subr.bf16.mxu0 %v8275_v55  ;;  %v8324_v46 = vld [vmem:[#allocation7 + $0xb8] ss:$40 sps:$4 sm:$0xff]   ;;  %v8332_v52 = vld [vmem:[#allocation7 + $0x10c] ss:$40 sps:$4 sm:$0xff]  }
 0x2ad   :  { %v7530_v54 = vadd.f32 %v7529_v58, %v5715_v13  ;;  %v5717_v5 = vpop.f32.mrb[3].mxu1  ;;  %6076 = vmatprep.subr.bf16.mxu1 %v8278_v56  ;;  %v8321_v55 = vld [vmem:[#allocation7 + $0x1370] ss:$40 sps:$4 sm:$0xff]   ;;  %v8329_v56 = vld [vmem:[#allocation7 + $0x13c4] ss:$40 sps:$4 sm:$0xff]  }
 0x2ae   :  { %v7515_v60 = vpack.c.bf16 %v7528_v1, %v7526_v47  ;;  %v7532_v8 = vadd.f32 %v7531_v9, %v5717_v5  ;;  %v8330_v44 = vld [vmem:[#allocation7 + $0x108] ss:$40 sps:$4 sm:$0xff]   ;;  %v8338_v58 = vld [vmem:[#allocation7 + $0x15c] ss:$40 sps:$4 sm:$0xff]   ;;  %v8336_v59 = vld [vmem:[#allocation7 + $0x158] ss:$40 sps:$4 sm:$0xff]  }
 0x2af   :  { %5913 = vmatpush1.bf16.msra.mxu0 %v8273_v62  ;;  %v8335_v47 = vld [vmem:[#allocation7 + $0x1414] ss:$40 sps:$4 sm:$0xff]   ;;  %v8333_v62 = vld [vmem:[#allocation7 + $0x1410] ss:$40 sps:$4 sm:$0xff]   ;;  %v8341_v9 = vld [vmem:[#allocation7 + $0x1464] ss:$40 sps:$4 sm:$0xff]  }
 0x2b0   :  { %6640 = vst [vmem:[#allocation10] sm:$0xff] %v7515_v60  ;;  %v7520_v10 = vpack.c.bf16 %v7532_v8, %v7530_v54  ;;  %6077 = vmatpush1.bf16.msra.mxu1 %v8276_v4  ;;  %5914 = vmatprep.subr.bf16.mxu0 %v8281_v20  ;;  %v8344_v1 = vld [vmem:[#allocation7 + $0x1ac] ss:$40 sps:$4 sm:$0xff]   ;;  %v8342_v13 = vld [vmem:[#allocation7 + $0x1a8] ss:$40 sps:$4 sm:$0xff]  }
 0x2b1   :  { %6078 = vmatprep.subr.bf16.mxu1 %v8284_v28  ;;  %v8339_v4 = vld [vmem:[#allocation7 + $0x1460] ss:$40 sps:$4 sm:$0xff]   ;;  %v8350_v20 = vld [vmem:[#allocation7 + $0x1fc] ss:$40 sps:$4 sm:$0xff]   ;;  %v8345_v28 = vld [vmem:[#allocation7 + $0x14b0] ss:$40 sps:$4 sm:$0xff]  }
 0x2b2   :  { %6645 = vst [vmem:[#allocation10 + $0x28] sm:$0xff] %v7520_v10  ;;  %v8347_v54 = vld [vmem:[#allocation7 + $0x14b4] ss:$40 sps:$4 sm:$0xff]   ;;  %v8348_v5 = vld [vmem:[#allocation7 + $0x1f8] ss:$40 sps:$4 sm:$0xff]  }
 0x2b3   :  { %5915 = vmatpush1.bf16.msra.mxu0 %v8279_v61  ;;  %v8356_v60 = vld [vmem:[#allocation7 + $0x24c] ss:$40 sps:$4 sm:$0xff]   ;;  %v8354_v61 = vld [vmem:[#allocation7 + $0x248] ss:$40 sps:$4 sm:$0xff]  }
 0x2b4   :  { %6079 = vmatpush1.bf16.msra.mxu1 %v8282_v27  ;;  %5916 = vmatprep.subr.bf16.mxu0 %v8287_v63  ;;  %v8353_v8 = vld [vmem:[#allocation7 + $0x1504] ss:$40 sps:$4 sm:$0xff]   ;;  %v8351_v10 = vld [vmem:[#allocation7 + $0x1500] ss:$40 sps:$4 sm:$0xff]   ;;  %v8359_v63 = vld [vmem:[#allocation7 + $0x1554] ss:$40 sps:$4 sm:$0xff]  }
 0x2b5   :  { %6080 = vmatprep.subr.bf16.mxu1 %v8290_v34  ;;  %v8362_v27 = vld [vmem:[#allocation7 + $0x29c] ss:$40 sps:$4 sm:$0xff]   ;;  %v8360_v34 = vld [vmem:[#allocation7 + $0x298] ss:$40 sps:$4 sm:$0xff]  }
 0x2b7   :  { %5917 = vmatpush1.bf16.msra.mxu0 %v8285_v30  ;;  %v8357_v30 = vld [vmem:[#allocation7 + $0x1550] ss:$40 sps:$4 sm:$0xff]  }
 0x2b8   :  { %6081 = vmatpush1.bf16.msra.mxu1 %v8288_v37  ;;  %5918 = vmatprep.subr.bf16.mxu0 %v8293_v16  ;;  %v8368_v37 = vld [vmem:[#allocation7 + $0x2ec] ss:$40 sps:$4 sm:$0xff]  }
 0x2b9   :  { %6082 = vmatprep.subr.bf16.mxu1 %v8296_v2  ;;  %v8365_v16 = vld [vmem:[#allocation7 + $0x15a4] ss:$40 sps:$4 sm:$0xff]   ;;  %v8366_v2 = vld [vmem:[#allocation7 + $0x2e8] ss:$40 sps:$4 sm:$0xff]  }
 0x2bb   :  { %5919 = vmatpush1.bf16.msra.mxu0 %v8291_v21  ;;  %v8363_v21 = vld [vmem:[#allocation7 + $0x15a0] ss:$40 sps:$4 sm:$0xff]  }
 0x2bc   :  { %6083 = vmatpush1.bf16.msra.mxu1 %v8294_v12  ;;  %5920 = vmatprep.subr.bf16.mxu0 %v8299_v22  ;;  %v8374_v12 = vld [vmem:[#allocation7 + $0x33c] ss:$40 sps:$4 sm:$0xff]  }
 0x2bd   :  { %6084 = vmatprep.subr.bf16.mxu1 %v8302_v24  ;;  %v8371_v22 = vld [vmem:[#allocation7 + $0x15f4] ss:$40 sps:$4 sm:$0xff]   ;;  %v8372_v24 = vld [vmem:[#allocation7 + $0x338] ss:$40 sps:$4 sm:$0xff]  }
 0x2bf   :  { %5921 = vmatpush1.bf16.msra.mxu0 %v8297_v7  ;;  %v8369_v7 = vld [vmem:[#allocation7 + $0x15f0] ss:$40 sps:$4 sm:$0xff]  }
 0x2c0   :  { %6085 = vmatpush1.bf16.msra.mxu1 %v8300_v15  ;;  %5922 = vmatprep.subr.bf16.mxu0 %v8305_v29  ;;  %v8380_v15 = vld [vmem:[#allocation7 + $0x38c] ss:$40 sps:$4 sm:$0xff]  }
 0x2c1   :  { %6086 = vmatprep.subr.bf16.mxu1 %v8308_v31  ;;  %v8377_v29 = vld [vmem:[#allocation7 + $0x1644] ss:$40 sps:$4 sm:$0xff]   ;;  %v8378_v31 = vld [vmem:[#allocation7 + $0x388] ss:$40 sps:$4 sm:$0xff]  }
 0x2c3   :  { %5923 = vmatpush1.bf16.msra.mxu0 %v8303_v32  ;;  %v8375_v32 = vld [vmem:[#allocation7 + $0x1640] ss:$40 sps:$4 sm:$0xff]  }
 0x2c4   :  { %6087 = vmatpush1.bf16.msra.mxu1 %v8306_v35  ;;  %6150 = vmatprep.subr.bf16.mxu0 %v8314_v36  ;;  %v8386_v35 = vld [vmem:[#allocation7 + $0x3dc] ss:$40 sps:$4 sm:$0xff]  }
 0x2c5   :  { %6088 = vmatprep.subr.bf16.mxu1 %v8311_v38  ;;  %v8383_v36 = vld [vmem:[#allocation7 + $0x1694] ss:$40 sps:$4 sm:$0xff]   ;;  %v8384_v38 = vld [vmem:[#allocation7 + $0x3d8] ss:$40 sps:$4 sm:$0xff]  }
 0x2c6   :  { %5925 = vmatmul.mubr.bf16.vlgmr.msra.gmra.mrb[24].mxu0 %v9285_v0 }
 0x2c7   :  { %6151 = vmatpush1.bf16.msra.mxu0 %v8312_v39  ;;  %6182 = vmatprep.mubr.bf16.mxu0 %v9239_v11  ;;  %v8381_v39 = vld [vmem:[#allocation7 + $0x1690] ss:$40 sps:$4 sm:$0xff]  }
 0x2c8   :  { %6089 = vmatpush1.bf16.msra.mxu1 %v8309_v41  ;;  %6152 = vmatprep.subr.bf16.mxu0 %v8320_v42  ;;  %v8392_v41 = vld [vmem:[#allocation7 + $0x42c] ss:$40 sps:$4 sm:$0xff]  }
 0x2c9   :  { %6090 = vmatprep.subr.bf16.mxu1 %v8317_v33  ;;  %v8389_v42 = vld [vmem:[#allocation7 + $0x16e4] ss:$40 sps:$4 sm:$0xff]   ;;  %v8390_v33 = vld [vmem:[#allocation7 + $0x428] ss:$40 sps:$4 sm:$0xff]  }
 0x2cb   :  { %6153 = vmatpush1.bf16.msra.mxu0 %v8318_v40  ;;  %v8387_v40 = vld [vmem:[#allocation7 + $0x16e0] ss:$40 sps:$4 sm:$0xff]  }
 0x2cc   :  { %6091 = vmatpush1.bf16.msra.mxu1 %v8315_v48  ;;  %6154 = vmatprep.subr.bf16.mxu0 %v8326_v49  ;;  %v8398_v48 = vld [vmem:[#allocation7 + $0x47c] ss:$40 sps:$4 sm:$0xff]  }
 0x2cd   :  { %6092 = vmatprep.subr.bf16.mxu1 %v8323_v50  ;;  %v8395_v49 = vld [vmem:[#allocation7 + $0x1734] ss:$40 sps:$4 sm:$0xff]   ;;  %v8396_v50 = vld [vmem:[#allocation7 + $0x478] ss:$40 sps:$4 sm:$0xff]  }
 0x2cf   :  { %6155 = vmatpush1.bf16.msra.mxu0 %v8324_v46  ;;  %v8393_v46 = vld [vmem:[#allocation7 + $0x1730] ss:$40 sps:$4 sm:$0xff]  }
 0x2d0   :  { %6093 = vmatpush1.bf16.msra.mxu1 %v8321_v55  ;;  %6156 = vmatprep.subr.bf16.mxu0 %v8332_v52  ;;  %v8404_v55 = vld [vmem:[#allocation7 + $0x4cc] ss:$40 sps:$4 sm:$0xff]  }
 0x2d1   :  { %6094 = vmatprep.subr.bf16.mxu1 %v8329_v56  ;;  %v8401_v52 = vld [vmem:[#allocation7 + $0x1784] ss:$40 sps:$4 sm:$0xff]   ;;  %v8402_v56 = vld [vmem:[#allocation7 + $0x4c8] ss:$40 sps:$4 sm:$0xff]  }
 0x2d3   :  { %6157 = vmatpush1.bf16.msra.mxu0 %v8330_v44  ;;  %v8399_v44 = vld [vmem:[#allocation7 + $0x1780] ss:$40 sps:$4 sm:$0xff]  }
 0x2d4   :  { %6095 = vmatpush1.bf16.msra.mxu1 %v8327_v51  ;;  %6158 = vmatprep.subr.bf16.mxu0 %v8338_v58  ;;  %v8410_v51 = vld [vmem:[#allocation7 + $0x51c] ss:$40 sps:$4 sm:$0xff]  }
 0x2d5   :  { %6107 = vmatprep.subr.bf16.mxu1 %v8335_v47  ;;  %v8407_v58 = vld [vmem:[#allocation7 + $0x17d4] ss:$40 sps:$4 sm:$0xff]   ;;  %v8408_v47 = vld [vmem:[#allocation7 + $0x518] ss:$40 sps:$4 sm:$0xff]  }
 0x2d7   :  { %6097 = vmatmul.mubr.bf16.vlgmr.msra.gmra.mrb[4].mxu1 %v9276_v43  ;;  %6159 = vmatpush1.bf16.msra.mxu0 %v8336_v59  ;;  %v8405_v59 = vld [vmem:[#allocation7 + $0x17d0] ss:$40 sps:$4 sm:$0xff]  }
 0x2d8   :  { %6108 = vmatpush1.bf16.msra.mxu1 %v8333_v62  ;;  %6139 = vmatprep.mubr.bf16.mxu1 %v9287_v3  ;;  %v8416_v62 = vld [vmem:[#allocation7 + $0x56c] ss:$40 sps:$4 sm:$0xff]  }
 0x2d9   :  { %6109 = vmatprep.subr.bf16.mxu1 %v8341_v9  ;;  %6160 = vmatprep.subr.bf16.mxu0 %v8344_v1  ;;  %v8413_v9 = vld [vmem:[#allocation7 + $0x1824] ss:$40 sps:$4 sm:$0xff]   ;;  %v8414_v1 = vld [vmem:[#allocation7 + $0x568] ss:$40 sps:$4 sm:$0xff]  }
 0x2db   :  { %6161 = vmatpush1.bf16.msra.mxu0 %v8342_v13  ;;  %v8411_v13 = vld [vmem:[#allocation7 + $0x1820] ss:$40 sps:$4 sm:$0xff]  }
 0x2dc   :  { %6110 = vmatpush1.bf16.msra.mxu1 %v8339_v4  ;;  %6162 = vmatprep.subr.bf16.mxu0 %v8350_v20  ;;  %v8422_v4 = vld [vmem:[#allocation7 + $0x5bc] ss:$40 sps:$4 sm:$0xff]  }
 0x2dd   :  { %6111 = vmatprep.subr.bf16.mxu1 %v8347_v54  ;;  %v8419_v20 = vld [vmem:[#allocation7 + $0x1874] ss:$40 sps:$4 sm:$0xff]   ;;  %v8420_v54 = vld [vmem:[#allocation7 + $0x5b8] ss:$40 sps:$4 sm:$0xff]  }
 0x2df   :  { %6163 = vmatpush1.bf16.msra.mxu0 %v8348_v5  ;;  %v8417_v5 = vld [vmem:[#allocation7 + $0x1870] ss:$40 sps:$4 sm:$0xff]  }
 0x2e0   :  { %6112 = vmatpush1.bf16.msra.mxu1 %v8345_v28  ;;  %6164 = vmatprep.subr.bf16.mxu0 %v8356_v60  ;;  %v8428_v28 = vld [vmem:[#allocation7 + $0x60c] ss:$40 sps:$4 sm:$0xff]  }
 0x2e1   :  { %6113 = vmatprep.subr.bf16.mxu1 %v8353_v8  ;;  %v8425_v60 = vld [vmem:[#allocation7 + $0x18c4] ss:$40 sps:$4 sm:$0xff]   ;;  %v8426_v8 = vld [vmem:[#allocation7 + $0x608] ss:$40 sps:$4 sm:$0xff]  }
 0x2e3   :  { %6165 = vmatpush1.bf16.msra.mxu0 %v8354_v61  ;;  %v8423_v61 = vld [vmem:[#allocation7 + $0x18c0] ss:$40 sps:$4 sm:$0xff]  }
 0x2e4   :  { %6114 = vmatpush1.bf16.msra.mxu1 %v8351_v10  ;;  %6166 = vmatprep.subr.bf16.mxu0 %v8362_v27  ;;  %v8431_v10 = vld [vmem:[#allocation7 + $0x65c] ss:$40 sps:$4 sm:$0xff]  }
 0x2e5   :  { %6115 = vmatprep.subr.bf16.mxu1 %v8359_v63  ;;  %v8434_v27 = vld [vmem:[#allocation7 + $0x24] ss:$40 sps:$4 sm:$0xff]   ;;  %v8429_v63 = vld [vmem:[#allocation7 + $0x658] ss:$40 sps:$4 sm:$0xff]  }
 0x2e7   :  { %6167 = vmatpush1.bf16.msra.mxu0 %v8360_v34  ;;  %v8432_v34 = vld [vmem:[#allocation7 + $0x20] ss:$40 sps:$4 sm:$0xff]  }
 0x2e8   :  { %6116 = vmatpush1.bf16.msra.mxu1 %v8357_v30  ;;  %6168 = vmatprep.subr.bf16.mxu0 %v8368_v37  ;;  %v8437_v30 = vld [vmem:[#allocation7 + $0x6ac] ss:$40 sps:$4 sm:$0xff]  }
 0x2e9   :  { %6117 = vmatprep.subr.bf16.mxu1 %v8365_v16  ;;  %v8440_v37 = vld [vmem:[#allocation7 + $0x74] ss:$40 sps:$4 sm:$0xff]   ;;  %v8435_v16 = vld [vmem:[#allocation7 + $0x6a8] ss:$40 sps:$4 sm:$0xff]  }
 0x2eb   :  { %6169 = vmatpush1.bf16.msra.mxu0 %v8366_v2  ;;  %v8438_v2 = vld [vmem:[#allocation7 + $0x70] ss:$40 sps:$4 sm:$0xff]  }
 0x2ec   :  { %6118 = vmatpush1.bf16.msra.mxu1 %v8363_v21  ;;  %6170 = vmatprep.subr.bf16.mxu0 %v8374_v12  ;;  %v8443_v21 = vld [vmem:[#allocation7 + $0x6fc] ss:$40 sps:$4 sm:$0xff]  }
 0x2ed   :  { %6119 = vmatprep.subr.bf16.mxu1 %v8371_v22  ;;  %v8446_v12 = vld [vmem:[#allocation7 + $0xc4] ss:$40 sps:$4 sm:$0xff]   ;;  %v8441_v22 = vld [vmem:[#allocation7 + $0x6f8] ss:$40 sps:$4 sm:$0xff]  }
 0x2ef   :  { %6171 = vmatpush1.bf16.msra.mxu0 %v8372_v24  ;;  %v8444_v24 = vld [vmem:[#allocation7 + $0xc0] ss:$40 sps:$4 sm:$0xff]  }
 0x2f0   :  { %6120 = vmatpush1.bf16.msra.mxu1 %v8369_v7  ;;  %6172 = vmatprep.subr.bf16.mxu0 %v8380_v15  ;;  %v8449_v7 = vld [vmem:[#allocation7 + $0x74c] ss:$40 sps:$4 sm:$0xff]  }
 0x2f1   :  { %6121 = vmatprep.subr.bf16.mxu1 %v8377_v29  ;;  %v8452_v15 = vld [vmem:[#allocation7 + $0x114] ss:$40 sps:$4 sm:$0xff]   ;;  %v8447_v29 = vld [vmem:[#allocation7 + $0x748] ss:$40 sps:$4 sm:$0xff]  }
 0x2f3   :  { %6173 = vmatpush1.bf16.msra.mxu0 %v8378_v31  ;;  %v8450_v31 = vld [vmem:[#allocation7 + $0x110] ss:$40 sps:$4 sm:$0xff]  }
 0x2f4   :  { %6122 = vmatpush1.bf16.msra.mxu1 %v8375_v32  ;;  %6174 = vmatprep.subr.bf16.mxu0 %v8386_v35  ;;  %v8455_v32 = vld [vmem:[#allocation7 + $0x79c] ss:$40 sps:$4 sm:$0xff]   ;;  %v8453_v35 = vld [vmem:[#allocation7 + $0x798] ss:$40 sps:$4 sm:$0xff]  }
 0x2f5   :  { %6123 = vmatprep.subr.bf16.mxu1 %v8383_v36  ;;  %v8456_v36 = vld [vmem:[#allocation7 + $0x160] ss:$40 sps:$4 sm:$0xff]  }
 0x2f7   :  { %6175 = vmatpush1.bf16.msra.mxu0 %v8384_v38  ;;  %v8461_v38 = vld [vmem:[#allocation7 + $0x7ec] ss:$40 sps:$4 sm:$0xff]  }
 0x2f8   :  { %6124 = vmatpush1.bf16.msra.mxu1 %v8381_v39  ;;  %6176 = vmatprep.subr.bf16.mxu0 %v8392_v41  ;;  %v8464_v39 = vld [vmem:[#allocation7 + $0x1b4] ss:$40 sps:$4 sm:$0xff]   ;;  %v8459_v41 = vld [vmem:[#allocation7 + $0x7e8] ss:$40 sps:$4 sm:$0xff]  }
 0x2f9   :  { %6125 = vmatprep.subr.bf16.mxu1 %v8389_v42  ;;  %v8462_v42 = vld [vmem:[#allocation7 + $0x1b0] ss:$40 sps:$4 sm:$0xff]  }
 0x2fb   :  { %6177 = vmatpush1.bf16.msra.mxu0 %v8390_v33  ;;  %v8467_v33 = vld [vmem:[#allocation7 + $0x83c] ss:$40 sps:$4 sm:$0xff]  }
 0x2fc   :  { %6126 = vmatpush1.bf16.msra.mxu1 %v8387_v40  ;;  %6178 = vmatprep.subr.bf16.mxu0 %v8398_v48  ;;  %v8470_v40 = vld [vmem:[#allocation7 + $0x204] ss:$40 sps:$4 sm:$0xff]   ;;  %v8465_v48 = vld [vmem:[#allocation7 + $0x838] ss:$40 sps:$4 sm:$0xff]  }
 0x2fd   :  { %6127 = vmatprep.subr.bf16.mxu1 %v8395_v49  ;;  %v8468_v49 = vld [vmem:[#allocation7 + $0x200] ss:$40 sps:$4 sm:$0xff]  }
 0x2ff   :  { %6179 = vmatpush1.bf16.msra.mxu0 %v8396_v50  ;;  %v8473_v50 = vld [vmem:[#allocation7 + $0x88c] ss:$40 sps:$4 sm:$0xff]  }
 0x300   :  { %6128 = vmatpush1.bf16.msra.mxu1 %v8393_v46  ;;  %6180 = vmatprep.subr.bf16.mxu0 %v8404_v55  ;;  %v8476_v46 = vld [vmem:[#allocation7 + $0x254] ss:$40 sps:$4 sm:$0xff]   ;;  %v8471_v55 = vld [vmem:[#allocation7 + $0x888] ss:$40 sps:$4 sm:$0xff]  }
 0x301   :  { %6129 = vmatprep.subr.bf16.mxu1 %v8401_v52  ;;  %v8474_v52 = vld [vmem:[#allocation7 + $0x250] ss:$40 sps:$4 sm:$0xff]  }
 0x303   :  { %6181 = vmatpush1.bf16.msra.mxu0 %v8402_v56  ;;  %v8479_v56 = vld [vmem:[#allocation7 + $0x8dc] ss:$40 sps:$4 sm:$0xff]  }
 0x304   :  { %6130 = vmatpush1.bf16.msra.mxu1 %v8399_v44  ;;  %6193 = vmatprep.subr.bf16.mxu0 %v8410_v51  ;;  %v8482_v44 = vld [vmem:[#allocation7 + $0x2a4] ss:$40 sps:$4 sm:$0xff]   ;;  %v8477_v51 = vld [vmem:[#allocation7 + $0x8d8] ss:$40 sps:$4 sm:$0xff]  }
 0x305   :  { %6131 = vmatprep.subr.bf16.mxu1 %v8407_v58  ;;  %v8480_v58 = vld [vmem:[#allocation7 + $0x2a0] ss:$40 sps:$4 sm:$0xff]  }
 0x306   :  { %6183 = vmatmul.mubr.bf16.vlgmr.msra.gmra.mrb[28].mxu0 %v9235_v6 }
 0x307   :  { %6194 = vmatpush1.bf16.msra.mxu0 %v8408_v47  ;;  %6225 = vmatprep.mubr.bf16.mxu0 %v9259_v57  ;;  %v8485_v47 = vld [vmem:[#allocation7 + $0x92c] ss:$40 sps:$4 sm:$0xff]  }
 0x308   :  { %6132 = vmatpush1.bf16.msra.mxu1 %v8405_v59  ;;  %6195 = vmatprep.subr.bf16.mxu0 %v8416_v62  ;;  %v8488_v59 = vld [vmem:[#allocation7 + $0x2f4] ss:$40 sps:$4 sm:$0xff]   ;;  %v8483_v62 = vld [vmem:[#allocation7 + $0x928] ss:$40 sps:$4 sm:$0xff]  }
 0x309   :  { %6133 = vmatprep.subr.bf16.mxu1 %v8413_v9  ;;  %v8486_v9 = vld [vmem:[#allocation7 + $0x2f0] ss:$40 sps:$4 sm:$0xff]  }
 0x30b   :  { %6196 = vmatpush1.bf16.msra.mxu0 %v8414_v1  ;;  %v8491_v1 = vld [vmem:[#allocation7 + $0x97c] ss:$40 sps:$4 sm:$0xff]  }
 0x30c   :  { %6134 = vmatpush1.bf16.msra.mxu1 %v8411_v13  ;;  %6197 = vmatprep.subr.bf16.mxu0 %v8422_v4  ;;  %v8494_v13 = vld [vmem:[#allocation7 + $0x344] ss:$40 sps:$4 sm:$0xff]   ;;  %v8489_v4 = vld [vmem:[#allocation7 + $0x978] ss:$40 sps:$4 sm:$0xff]  }
 0x30d   :  { %6135 = vmatprep.subr.bf16.mxu1 %v8419_v20  ;;  %v8492_v20 = vld [vmem:[#allocation7 + $0x340] ss:$40 sps:$4 sm:$0xff]  }
 0x30f   :  { %6198 = vmatpush1.bf16.msra.mxu0 %v8420_v54  ;;  %v8497_v54 = vld [vmem:[#allocation7 + $0x9cc] ss:$40 sps:$4 sm:$0xff]  }
 0x310   :  { %6136 = vmatpush1.bf16.msra.mxu1 %v8417_v5  ;;  %6199 = vmatprep.subr.bf16.mxu0 %v8428_v28  ;;  %v8500_v5 = vld [vmem:[#allocation7 + $0x394] ss:$40 sps:$4 sm:$0xff]   ;;  %v8495_v28 = vld [vmem:[#allocation7 + $0x9c8] ss:$40 sps:$4 sm:$0xff]  }
 0x311   :  { %6137 = vmatprep.subr.bf16.mxu1 %v8425_v60  ;;  %v8498_v60 = vld [vmem:[#allocation7 + $0x390] ss:$40 sps:$4 sm:$0xff]  }
 0x313   :  { %6200 = vmatpush1.bf16.msra.mxu0 %v8426_v8  ;;  %v8503_v8 = vld [vmem:[#allocation7 + $0xa1c] ss:$40 sps:$4 sm:$0xff]  }
 0x314   :  { %6138 = vmatpush1.bf16.msra.mxu1 %v8423_v61  ;;  %6201 = vmatprep.subr.bf16.mxu0 %v8431_v10  ;;  %v8506_v61 = vld [vmem:[#allocation7 + $0x3e4] ss:$40 sps:$4 sm:$0xff]   ;;  %v8501_v10 = vld [vmem:[#allocation7 + $0xa18] ss:$40 sps:$4 sm:$0xff]  }
 0x315   :  { %6365 = vmatprep.subr.bf16.mxu1 %v8434_v27  ;;  %v8504_v27 = vld [vmem:[#allocation7 + $0x3e0] ss:$40 sps:$4 sm:$0xff]  }
 0x317   :  { %6140 = vmatmul.mubr.bf16.vlgmr.msra.gmra.mrb[4].mxu1 %v9285_v0  ;;  %6202 = vmatpush1.bf16.msra.mxu0 %v8429_v63  ;;  %v8509_v63 = vld [vmem:[#allocation7 + $0xa6c] ss:$40 sps:$4 sm:$0xff]  }
 0x318   :  { %6366 = vmatpush1.bf16.msra.mxu1 %v8432_v34  ;;  %6397 = vmatprep.mubr.bf16.mxu1 %v9239_v11  ;;  %v8458_v11 = vld [vmem:[#allocation7 + $0x164] ss:$40 sps:$4 sm:$0xff]   ;;  %v8512_v34 = vld [vmem:[#allocation7 + $0x434] ss:$40 sps:$4 sm:$0xff]  }
 0x319   :  { %6203 = vmatprep.subr.bf16.mxu0 %v8437_v30  ;;  %6367 = vmatprep.subr.bf16.mxu1 %v8440_v37  ;;  %v8507_v30 = vld [vmem:[#allocation7 + $0xa68] ss:$40 sps:$4 sm:$0xff]  }
 0x31a   :  { %v8510_v37 = vld [vmem:[#allocation7 + $0x430] ss:$40 sps:$4 sm:$0xff]  }
 0x31b   :  { %6204 = vmatpush1.bf16.msra.mxu0 %v8435_v16  ;;  %v8515_v16 = vld [vmem:[#allocation7 + $0xabc] ss:$40 sps:$4 sm:$0xff]  }
 0x31c   :  { %6368 = vmatpush1.bf16.msra.mxu1 %v8438_v2  ;;  %6205 = vmatprep.subr.bf16.mxu0 %v8443_v21  ;;  %v8518_v2 = vld [vmem:[#allocation7 + $0x484] ss:$40 sps:$4 sm:$0xff]   ;;  %v8513_v21 = vld [vmem:[#allocation7 + $0xab8] ss:$40 sps:$4 sm:$0xff]  }
 0x31d   :  { %6369 = vmatprep.subr.bf16.mxu1 %v8446_v12  ;;  %v8516_v12 = vld [vmem:[#allocation7 + $0x480] ss:$40 sps:$4 sm:$0xff]  }
 0x31f   :  { %6206 = vmatpush1.bf16.msra.mxu0 %v8441_v22  ;;  %v8521_v22 = vld [vmem:[#allocation7 + $0xb0c] ss:$40 sps:$4 sm:$0xff]  }
 0x320   :  { %6370 = vmatpush1.bf16.msra.mxu1 %v8444_v24  ;;  %6207 = vmatprep.subr.bf16.mxu0 %v8449_v7  ;;  %v8524_v24 = vld [vmem:[#allocation7 + $0x4d4] ss:$40 sps:$4 sm:$0xff]   ;;  %v8519_v7 = vld [vmem:[#allocation7 + $0xb08] ss:$40 sps:$4 sm:$0xff]  }
 0x321   :  { %6371 = vmatprep.subr.bf16.mxu1 %v8452_v15  ;;  %v8522_v15 = vld [vmem:[#allocation7 + $0x4d0] ss:$40 sps:$4 sm:$0xff]  }
 0x323   :  { %6208 = vmatpush1.bf16.msra.mxu0 %v8447_v29  ;;  %v8527_v29 = vld [vmem:[#allocation7 + $0xb5c] ss:$40 sps:$4 sm:$0xff]  }
 0x324   :  { %6372 = vmatpush1.bf16.msra.mxu1 %v8450_v31  ;;  %6209 = vmatprep.subr.bf16.mxu0 %v8455_v32  ;;  %v8530_v31 = vld [vmem:[#allocation7 + $0x524] ss:$40 sps:$4 sm:$0xff]   ;;  %v8525_v32 = vld [vmem:[#allocation7 + $0xb58] ss:$40 sps:$4 sm:$0xff]  }
 0x325   :  { %6373 = vmatprep.subr.bf16.mxu1 %v8458_v11  ;;  %v8528_v11 = vld [vmem:[#allocation7 + $0x520] ss:$40 sps:$4 sm:$0xff]  }
 0x327   :  { %6210 = vmatpush1.bf16.msra.mxu0 %v8453_v35  ;;  %v8533_v35 = vld [vmem:[#allocation7 + $0xbac] ss:$40 sps:$4 sm:$0xff]  }
 0x328   :  { %6374 = vmatpush1.bf16.msra.mxu1 %v8456_v36  ;;  %6211 = vmatprep.subr.bf16.mxu0 %v8461_v38  ;;  %v8536_v36 = vld [vmem:[#allocation7 + $0x574] ss:$40 sps:$4 sm:$0xff]   ;;  %v8531_v38 = vld [vmem:[#allocation7 + $0xba8] ss:$40 sps:$4 sm:$0xff]  }
 0x329   :  { %6375 = vmatprep.subr.bf16.mxu1 %v8464_v39  ;;  %v8534_v39 = vld [vmem:[#allocation7 + $0x570] ss:$40 sps:$4 sm:$0xff]  }
 0x32b   :  { %6212 = vmatpush1.bf16.msra.mxu0 %v8459_v41  ;;  %v8539_v41 = vld [vmem:[#allocation7 + $0xbfc] ss:$40 sps:$4 sm:$0xff]  }
 0x32c   :  { %6376 = vmatpush1.bf16.msra.mxu1 %v8462_v42  ;;  %6213 = vmatprep.subr.bf16.mxu0 %v8467_v33  ;;  %v8542_v42 = vld [vmem:[#allocation7 + $0x5c4] ss:$40 sps:$4 sm:$0xff]   ;;  %v8537_v33 = vld [vmem:[#allocation7 + $0xbf8] ss:$40 sps:$4 sm:$0xff]  }
 0x32d   :  { %6377 = vmatprep.subr.bf16.mxu1 %v8470_v40  ;;  %v8540_v40 = vld [vmem:[#allocation7 + $0x5c0] ss:$40 sps:$4 sm:$0xff]  }
 0x32f   :  { %6214 = vmatpush1.bf16.msra.mxu0 %v8465_v48  ;;  %v8545_v48 = vld [vmem:[#allocation7 + $0xc4c] ss:$40 sps:$4 sm:$0xff]  }
 0x330   :  { %6378 = vmatpush1.bf16.msra.mxu1 %v8468_v49  ;;  %6215 = vmatprep.subr.bf16.mxu0 %v8473_v50  ;;  %v8548_v49 = vld [vmem:[#allocation7 + $0x614] ss:$40 sps:$4 sm:$0xff]   ;;  %v8546_v50 = vld [vmem:[#allocation7 + $0x610] ss:$40 sps:$4 sm:$0xff]  }
 0x331   :  { %6379 = vmatprep.subr.bf16.mxu1 %v8476_v46  ;;  %v8551_v46 = vld [vmem:[#allocation7 + $0xc9c] ss:$40 sps:$4 sm:$0xff]  }
 0x333   :  { %6216 = vmatpush1.bf16.msra.mxu0 %v8471_v55  ;;  %v8549_v55 = vld [vmem:[#allocation7 + $0xc98] ss:$40 sps:$4 sm:$0xff]  }
 0x334   :  { %6380 = vmatpush1.bf16.msra.mxu1 %v8474_v52  ;;  %6217 = vmatprep.subr.bf16.mxu0 %v8479_v56  ;;  %v8552_v52 = vld [vmem:[#allocation7 + $0x660] ss:$40 sps:$4 sm:$0xff]   ;;  %v8557_v56 = vld [vmem:[#allocation7 + $0xcec] ss:$40 sps:$4 sm:$0xff]  }
 0x335   :  { %6381 = vmatprep.subr.bf16.mxu1 %v8482_v44  ;;  %v8560_v44 = vld [vmem:[#allocation7 + $0x6b4] ss:$40 sps:$4 sm:$0xff]  }
 0x337   :  { %6218 = vmatpush1.bf16.msra.mxu0 %v8477_v51  ;;  %v8555_v51 = vld [vmem:[#allocation7 + $0xce8] ss:$40 sps:$4 sm:$0xff]  }
 0x338   :  { %6382 = vmatpush1.bf16.msra.mxu1 %v8480_v58  ;;  %6219 = vmatprep.subr.bf16.mxu0 %v8485_v47  ;;  %v8558_v58 = vld [vmem:[#allocation7 + $0x6b0] ss:$40 sps:$4 sm:$0xff]   ;;  %v8563_v47 = vld [vmem:[#allocation7 + $0xd3c] ss:$40 sps:$4 sm:$0xff]  }
 0x339   :  { %6383 = vmatprep.subr.bf16.mxu1 %v8488_v59  ;;  %v8566_v59 = vld [vmem:[#allocation7 + $0x704] ss:$40 sps:$4 sm:$0xff]  }
 0x33b   :  { %6220 = vmatpush1.bf16.msra.mxu0 %v8483_v62  ;;  %v8561_v62 = vld [vmem:[#allocation7 + $0xd38] ss:$40 sps:$4 sm:$0xff]  }
 0x33c   :  { %6384 = vmatpush1.bf16.msra.mxu1 %v8486_v9  ;;  %6221 = vmatprep.subr.bf16.mxu0 %v8491_v1  ;;  %v8564_v9 = vld [vmem:[#allocation7 + $0x700] ss:$40 sps:$4 sm:$0xff]   ;;  %v8569_v1 = vld [vmem:[#allocation7 + $0xd8c] ss:$40 sps:$4 sm:$0xff]  }
 0x33d   :  { %6385 = vmatprep.subr.bf16.mxu1 %v8494_v13  ;;  %v8572_v13 = vld [vmem:[#allocation7 + $0x754] ss:$40 sps:$4 sm:$0xff]  }
 0x33f   :  { %6222 = vmatpush1.bf16.msra.mxu0 %v8489_v4  ;;  %v8567_v4 = vld [vmem:[#allocation7 + $0xd88] ss:$40 sps:$4 sm:$0xff]  }
 0x340   :  { %6386 = vmatpush1.bf16.msra.mxu1 %v8492_v20  ;;  %6223 = vmatprep.subr.bf16.mxu0 %v8497_v54  ;;  %v8570_v20 = vld [vmem:[#allocation7 + $0x750] ss:$40 sps:$4 sm:$0xff]   ;;  %v8575_v54 = vld [vmem:[#allocation7 + $0xddc] ss:$40 sps:$4 sm:$0xff]  }
 0x341   :  { %6387 = vmatprep.subr.bf16.mxu1 %v8500_v5  ;;  %v8578_v5 = vld [vmem:[#allocation7 + $0x7a4] ss:$40 sps:$4 sm:$0xff]  }
 0x343   :  { %6224 = vmatpush1.bf16.msra.mxu0 %v8495_v28  ;;  %v8573_v28 = vld [vmem:[#allocation7 + $0xdd8] ss:$40 sps:$4 sm:$0xff]  }
 0x344   :  { %6388 = vmatpush1.bf16.msra.mxu1 %v8498_v60  ;;  %6236 = vmatprep.subr.bf16.mxu0 %v8503_v8  ;;  %v8576_v60 = vld [vmem:[#allocation7 + $0x7a0] ss:$40 sps:$4 sm:$0xff]   ;;  %v8581_v8 = vld [vmem:[#allocation7 + $0xe2c] ss:$40 sps:$4 sm:$0xff]  }
 0x345   :  { %6389 = vmatprep.subr.bf16.mxu1 %v8506_v61  ;;  %v8584_v61 = vld [vmem:[#allocation7 + $0x7f4] ss:$40 sps:$4 sm:$0xff]  }
 0x346   :  { %6226 = vmatmul.mubr.bf16.vlgmr.msra.gmra.mrb[28].mxu0 %v9257_v53 }
 0x347   :  { %6237 = vmatpush1.bf16.msra.mxu0 %v8501_v10  ;;  %6268 = vmatprep.mubr.bf16.mxu0 %v9268_v17  ;;  %v8579_v10 = vld [vmem:[#allocation7 + $0xe28] ss:$40 sps:$4 sm:$0xff]  }
 0x348   :  { %6390 = vmatpush1.bf16.msra.mxu1 %v8504_v27  ;;  %6238 = vmatprep.subr.bf16.mxu0 %v8509_v63  ;;  %v8582_v27 = vld [vmem:[#allocation7 + $0x7f0] ss:$40 sps:$4 sm:$0xff]   ;;  %v8587_v63 = vld [vmem:[#allocation7 + $0xe7c] ss:$40 sps:$4 sm:$0xff]  }
 0x349   :  { %6391 = vmatprep.subr.bf16.mxu1 %v8512_v34  ;;  %v8590_v34 = vld [vmem:[#allocation7 + $0x844] ss:$40 sps:$4 sm:$0xff]  }
 0x34b   :  { %6239 = vmatpush1.bf16.msra.mxu0 %v8507_v30  ;;  %v8585_v30 = vld [vmem:[#allocation7 + $0xe78] ss:$40 sps:$4 sm:$0xff]  }
 0x34c   :  { %6392 = vmatpush1.bf16.msra.mxu1 %v8510_v37  ;;  %6240 = vmatprep.subr.bf16.mxu0 %v8515_v16  ;;  %v8588_v37 = vld [vmem:[#allocation7 + $0x840] ss:$40 sps:$4 sm:$0xff]   ;;  %v8593_v16 = vld [vmem:[#allocation7 + $0xecc] ss:$40 sps:$4 sm:$0xff]  }
 0x34d   :  { %6393 = vmatprep.subr.bf16.mxu1 %v8518_v2  ;;  %v8596_v2 = vld [vmem:[#allocation7 + $0x894] ss:$40 sps:$4 sm:$0xff]  }
 0x34f   :  { %6241 = vmatpush1.bf16.msra.mxu0 %v8513_v21  ;;  %v8591_v21 = vld [vmem:[#allocation7 + $0xec8] ss:$40 sps:$4 sm:$0xff]  }
 0x350   :  { %6394 = vmatpush1.bf16.msra.mxu1 %v8516_v12  ;;  %6242 = vmatprep.subr.bf16.mxu0 %v8521_v22  ;;  %v8594_v12 = vld [vmem:[#allocation7 + $0x890] ss:$40 sps:$4 sm:$0xff]   ;;  %v8599_v22 = vld [vmem:[#allocation7 + $0xf1c] ss:$40 sps:$4 sm:$0xff]  }
 0x351   :  { %6395 = vmatprep.subr.bf16.mxu1 %v8524_v24  ;;  %v8602_v24 = vld [vmem:[#allocation7 + $0x8e4] ss:$40 sps:$4 sm:$0xff]  }
 0x353   :  { %6243 = vmatpush1.bf16.msra.mxu0 %v8519_v7  ;;  %v8597_v7 = vld [vmem:[#allocation7 + $0xf18] ss:$40 sps:$4 sm:$0xff]  }
 0x354   :  { %6396 = vmatpush1.bf16.msra.mxu1 %v8522_v15  ;;  %6244 = vmatprep.subr.bf16.mxu0 %v8527_v29  ;;  %v8600_v15 = vld [vmem:[#allocation7 + $0x8e0] ss:$40 sps:$4 sm:$0xff]   ;;  %v8605_v29 = vld [vmem:[#allocation7 + $0xf6c] ss:$40 sps:$4 sm:$0xff]  }
 0x355   :  { %6408 = vmatprep.subr.bf16.mxu1 %v8530_v31  ;;  %v8608_v31 = vld [vmem:[#allocation7 + $0x934] ss:$40 sps:$4 sm:$0xff]  }
 0x357   :  { %6398 = vmatmul.mubr.bf16.vlgmr.msra.gmra.mrb[8].mxu1 %v9235_v6  ;;  %6245 = vmatpush1.bf16.msra.mxu0 %v8525_v32  ;;  %v8543_v6 = vld [vmem:[#allocation7 + $0xc48] ss:$40 sps:$4 sm:$0xff]  }
 0x358   :  { %6409 = vmatpush1.bf16.msra.mxu1 %v8528_v11  ;;  %6440 = vmatprep.mubr.bf16.mxu1 %v9259_v57  ;;  %v8554_v57 = vld [vmem:[#allocation7 + $0x664] ss:$40 sps:$4 sm:$0xff]   ;;  %v8603_v32 = vld [vmem:[#allocation7 + $0xf68] ss:$40 sps:$4 sm:$0xff]  }
 0x359   :  { %6246 = vmatprep.subr.bf16.mxu0 %v8533_v35  ;;  %6410 = vmatprep.subr.bf16.mxu1 %v8536_v36  ;;  %v8606_v11 = vld [vmem:[#allocation7 + $0x930] ss:$40 sps:$4 sm:$0xff]   ;;  %v8611_v35 = vld [vmem:[#allocation7 + $0xfbc] ss:$40 sps:$4 sm:$0xff]  }
 0x35a   :  { %v8614_v36 = vld [vmem:[#allocation7 + $0x984] ss:$40 sps:$4 sm:$0xff]  }
 0x35b   :  { %6247 = vmatpush1.bf16.msra.mxu0 %v8531_v38  ;;  %v8609_v38 = vld [vmem:[#allocation7 + $0xfb8] ss:$40 sps:$4 sm:$0xff]  }
 0x35c   :  { %6411 = vmatpush1.bf16.msra.mxu1 %v8534_v39  ;;  %6248 = vmatprep.subr.bf16.mxu0 %v8539_v41  ;;  %v8612_v39 = vld [vmem:[#allocation7 + $0x980] ss:$40 sps:$4 sm:$0xff]   ;;  %v8617_v41 = vld [vmem:[#allocation7 + $0x100c] ss:$40 sps:$4 sm:$0xff]  }
 0x35d   :  { %6412 = vmatprep.subr.bf16.mxu1 %v8542_v42  ;;  %v8620_v42 = vld [vmem:[#allocation7 + $0x9d4] ss:$40 sps:$4 sm:$0xff]  }
 0x35f   :  { %6249 = vmatpush1.bf16.msra.mxu0 %v8537_v33  ;;  %v8615_v33 = vld [vmem:[#allocation7 + $0x1008] ss:$40 sps:$4 sm:$0xff]  }
 0x360   :  { %6413 = vmatpush1.bf16.msra.mxu1 %v8540_v40  ;;  %6250 = vmatprep.subr.bf16.mxu0 %v8545_v48  ;;  %v8618_v40 = vld [vmem:[#allocation7 + $0x9d0] ss:$40 sps:$4 sm:$0xff]   ;;  %v8623_v48 = vld [vmem:[#allocation7 + $0x105c] ss:$40 sps:$4 sm:$0xff]  }
 0x361   :  { %6414 = vmatprep.subr.bf16.mxu1 %v8548_v49  ;;  %v8626_v49 = vld [vmem:[#allocation7 + $0xa24] ss:$40 sps:$4 sm:$0xff]  }
 0x363   :  { %6251 = vmatpush1.bf16.msra.mxu0 %v8543_v6  ;;  %v1426_v6 = vrot.slane %v9317_v26, %v9162_v23 }
 0x364   :  { %6415 = vmatpush1.bf16.msra.mxu1 %v8546_v50  ;;  %6252 = vmatprep.subr.bf16.mxu0 %v8551_v46  ;;  %v8621_v50 = vld [vmem:[#allocation7 + $0x1058] ss:$40 sps:$4 sm:$0xff]   ;;  %v1430_v46 = vrot.slane %v9317_v26, %v9165_v25 }
 0x365   :  { %6416 = vmatprep.subr.bf16.mxu1 %v8554_v57  ;;  %v8624_v57 = vld [vmem:[#allocation7 + $0xa20] ss:$40 sps:$4 sm:$0xff]  }
 0x367   :  { %6253 = vmatpush1.bf16.msra.mxu0 %v8549_v55  ;;  %v8629_v55 = vld [vmem:[#allocation7 + $0x10ac] ss:$40 sps:$4 sm:$0xff]  }
 0x368   :  { %6417 = vmatpush1.bf16.msra.mxu1 %v8552_v52  ;;  %6254 = vmatprep.subr.bf16.mxu0 %v8557_v56  ;;  %v8632_v52 = vld [vmem:[#allocation7 + $0xa74] ss:$40 sps:$4 sm:$0xff]   ;;  %v1476_v56 = vrot.slane %v1426_v6, %v9155_v18  ;;  %v8684_v6 = vld [vmem:[#allocation7 + $0xd40] ss:$40 sps:$4 sm:$0xff]  }
 0x369   :  { %6418 = vmatprep.subr.bf16.mxu1 %v8560_v44  ;;  %v1480_v44 = vrot.slane %v1430_v46, %v9155_v18  ;;  %v8692_v46 = vld [vmem:[#allocation7 + $0xd94] ss:$40 sps:$4 sm:$0xff]  }
 0x36b   :  { %6255 = vmatpush1.bf16.msra.mxu0 %v8555_v51  ;;  %v8627_v51 = vld [vmem:[#allocation7 + $0x10a8] ss:$40 sps:$4 sm:$0xff]  }
 0x36c   :  { %6419 = vmatpush1.bf16.msra.mxu1 %v8558_v58  ;;  %6256 = vmatprep.subr.bf16.mxu0 %v8563_v47  ;;  %v8630_v58 = vld [vmem:[#allocation7 + $0xa70] ss:$40 sps:$4 sm:$0xff]   ;;  %v8635_v47 = vld [vmem:[#allocation7 + $0x10fc] ss:$40 sps:$4 sm:$0xff]  }
 0x36d   :  { %6420 = vmatprep.subr.bf16.mxu1 %v8566_v59  ;;  %v8638_v59 = vld [vmem:[#allocation7 + $0xac4] ss:$40 sps:$4 sm:$0xff]  }
 0x36f   :  { %6257 = vmatpush1.bf16.msra.mxu0 %v8561_v62 }
 0x370   :  { %6421 = vmatpush1.bf16.msra.mxu1 %v8564_v9  ;;  %6258 = vmatprep.subr.bf16.mxu0 %v8569_v1 }
 0x371   :  { %6422 = vmatprep.subr.bf16.mxu1 %v8572_v13 }
 0x373   :  { %6259 = vmatpush1.bf16.msra.mxu0 %v8567_v4  ;;  %v8633_v4 = vld [vmem:[#allocation7 + $0x10f8] ss:$40 sps:$4 sm:$0xff]  }
 0x374   :  { %6423 = vmatpush1.bf16.msra.mxu1 %v8570_v20  ;;  %6260 = vmatprep.subr.bf16.mxu0 %v8575_v54  ;;  %v8636_v54 = vld [vmem:[#allocation7 + $0xac0] ss:$40 sps:$4 sm:$0xff]  }
 0x375   :  { %6424 = vmatprep.subr.bf16.mxu1 %v8578_v5  ;;  %v8641_v5 = vld [vmem:[#allocation7 + $0x114c] ss:$40 sps:$4 sm:$0xff]  }
 0x377   :  { %6261 = vmatpush1.bf16.msra.mxu0 %v8573_v28 }
 0x378   :  { %6425 = vmatpush1.bf16.msra.mxu1 %v8576_v60  ;;  %6262 = vmatprep.subr.bf16.mxu0 %v8581_v8  ;;  %v8644_v60 = vld [vmem:[#allocation7 + $0xb14] ss:$40 sps:$4 sm:$0xff]  }
 0x379   :  { %6426 = vmatprep.subr.bf16.mxu1 %v8584_v61  ;;  %v8639_v61 = vld [vmem:[#allocation7 + $0x1148] ss:$40 sps:$4 sm:$0xff]  }
 0x37b   :  { %6263 = vmatpush1.bf16.msra.mxu0 %v8579_v10  ;;  %v8642_v10 = vld [vmem:[#allocation7 + $0xb10] ss:$40 sps:$4 sm:$0xff]  }
 0x37c   :  { %6427 = vmatpush1.bf16.msra.mxu1 %v8582_v27  ;;  %6264 = vmatprep.subr.bf16.mxu0 %v8587_v63  ;;  %v8647_v27 = vld [vmem:[#allocation7 + $0x119c] ss:$40 sps:$4 sm:$0xff]  }
 0x37d   :  { %6428 = vmatprep.subr.bf16.mxu1 %v8590_v34  ;;  %v8650_v63 = vld [vmem:[#allocation7 + $0xb64] ss:$40 sps:$4 sm:$0xff]   ;;  %v8645_v34 = vld [vmem:[#allocation7 + $0x1198] ss:$40 sps:$4 sm:$0xff]  }
 0x37f   :  { %6265 = vmatpush1.bf16.msra.mxu0 %v8585_v30  ;;  %v8648_v30 = vld [vmem:[#allocation7 + $0xb60] ss:$40 sps:$4 sm:$0xff]  }
 0x380   :  { %6429 = vmatpush1.bf16.msra.mxu1 %v8588_v37  ;;  %6266 = vmatprep.subr.bf16.mxu0 %v8593_v16  ;;  %v8653_v37 = vld [vmem:[#allocation7 + $0x11ec] ss:$40 sps:$4 sm:$0xff]  }
 0x381   :  { %6430 = vmatprep.subr.bf16.mxu1 %v8596_v2  ;;  %v8656_v16 = vld [vmem:[#allocation7 + $0xbb4] ss:$40 sps:$4 sm:$0xff]   ;;  %v8651_v2 = vld [vmem:[#allocation7 + $0x11e8] ss:$40 sps:$4 sm:$0xff]  }
 0x383   :  { %6267 = vmatpush1.bf16.msra.mxu0 %v8591_v21  ;;  %v8654_v21 = vld [vmem:[#allocation7 + $0xbb0] ss:$40 sps:$4 sm:$0xff]  }
 0x384   :  { %6431 = vmatpush1.bf16.msra.mxu1 %v8594_v12  ;;  %6279 = vmatprep.subr.bf16.mxu0 %v8599_v22  ;;  %v8659_v12 = vld [vmem:[#allocation7 + $0x123c] ss:$40 sps:$4 sm:$0xff]  }
 0x385   :  { %6432 = vmatprep.subr.bf16.mxu1 %v8602_v24  ;;  %v8662_v22 = vld [vmem:[#allocation7 + $0xc04] ss:$40 sps:$4 sm:$0xff]   ;;  %v8657_v24 = vld [vmem:[#allocation7 + $0x1238] ss:$40 sps:$4 sm:$0xff]  }
 0x386   :  { %6269 = vmatmul.mubr.bf16.vlgmr.msra.gmra.mrb[28].mxu0 %v9266_v14 }
 0x387   :  { %6280 = vmatpush1.bf16.msra.mxu0 %v8597_v7  ;;  %6311 = vmatprep.mubr.bf16.mxu0 %v9278_v45  ;;  %v8660_v7 = vld [vmem:[#allocation7 + $0xc00] ss:$40 sps:$4 sm:$0xff]  }
 0x388   :  { %6433 = vmatpush1.bf16.msra.mxu1 %v8600_v15  ;;  %6281 = vmatprep.subr.bf16.mxu0 %v8605_v29  ;;  %v8665_v15 = vld [vmem:[#allocation7 + $0x128c] ss:$40 sps:$4 sm:$0xff]  }
 0x389   :  { %6434 = vmatprep.subr.bf16.mxu1 %v8608_v31  ;;  %v8668_v29 = vld [vmem:[#allocation7 + $0xc54] ss:$40 sps:$4 sm:$0xff]   ;;  %v8663_v31 = vld [vmem:[#allocation7 + $0x1288] ss:$40 sps:$4 sm:$0xff]  }
 0x38b   :  { %6282 = vmatpush1.bf16.msra.mxu0 %v8603_v32  ;;  %v8666_v32 = vld [vmem:[#allocation7 + $0xc50] ss:$40 sps:$4 sm:$0xff]  }
 0x38c   :  { %6435 = vmatpush1.bf16.msra.mxu1 %v8606_v11  ;;  %6283 = vmatprep.subr.bf16.mxu0 %v8611_v35  ;;  %v8671_v11 = vld [vmem:[#allocation7 + $0x12dc] ss:$40 sps:$4 sm:$0xff]  }
 0x38d   :  { %6436 = vmatprep.subr.bf16.mxu1 %v8614_v36  ;;  %v8674_v35 = vld [vmem:[#allocation7 + $0xca4] ss:$40 sps:$4 sm:$0xff]   ;;  %v8669_v36 = vld [vmem:[#allocation7 + $0x12d8] ss:$40 sps:$4 sm:$0xff]  }
 0x38f   :  { %6284 = vmatpush1.bf16.msra.mxu0 %v8609_v38  ;;  %v8672_v38 = vld [vmem:[#allocation7 + $0xca0] ss:$40 sps:$4 sm:$0xff]  }
 0x390   :  { %6437 = vmatpush1.bf16.msra.mxu1 %v8612_v39  ;;  %6285 = vmatprep.subr.bf16.mxu0 %v8617_v41  ;;  %v8677_v39 = vld [vmem:[#allocation7 + $0x132c] ss:$40 sps:$4 sm:$0xff]  }
 0x391   :  { %6438 = vmatprep.subr.bf16.mxu1 %v8620_v42  ;;  %v8680_v41 = vld [vmem:[#allocation7 + $0xcf4] ss:$40 sps:$4 sm:$0xff]   ;;  %v8675_v42 = vld [vmem:[#allocation7 + $0x1328] ss:$40 sps:$4 sm:$0xff]  }
 0x393   :  { %6286 = vmatpush1.bf16.msra.mxu0 %v8615_v33  ;;  %v8678_v33 = vld [vmem:[#allocation7 + $0xcf0] ss:$40 sps:$4 sm:$0xff]  }
 0x394   :  { %6439 = vmatpush1.bf16.msra.mxu1 %v8618_v40  ;;  %6287 = vmatprep.subr.bf16.mxu0 %v8623_v48  ;;  %v8683_v40 = vld [vmem:[#allocation7 + $0x137c] ss:$40 sps:$4 sm:$0xff]  }
 0x395   :  { %6451 = vmatprep.subr.bf16.mxu1 %v8626_v49  ;;  %v8686_v48 = vld [vmem:[#allocation7 + $0xd44] ss:$40 sps:$4 sm:$0xff]   ;;  %v8681_v49 = vld [vmem:[#allocation7 + $0x1378] ss:$40 sps:$4 sm:$0xff]  }
 0x397   :  { %6441 = vmatmul.mubr.bf16.vlgmr.msra.gmra.mrb[8].mxu1 %v9257_v53  ;;  %6288 = vmatpush1.bf16.msra.mxu0 %v8621_v50  ;;  %v8689_v50 = vld [vmem:[#allocation7 + $0x13cc] ss:$40 sps:$4 sm:$0xff]  }
 0x398   :  { %6452 = vmatpush1.bf16.msra.mxu1 %v8624_v57  ;;  %6483 = vmatprep.mubr.bf16.mxu1 %v9268_v17  ;;  %v8687_v57 = vld [vmem:[#allocation7 + $0x13c8] ss:$40 sps:$4 sm:$0xff]  }
 0x399   :  { %v5926_v26 = vpop.f32.mrb[24].mxu0  ;;  %6289 = vmatprep.subr.bf16.mxu0 %v8629_v55  ;;  %6453 = vmatprep.subr.bf16.mxu1 %v8632_v52  ;;  %v8690_v55 = vld [vmem:[#allocation7 + $0xd90] ss:$40 sps:$4 sm:$0xff]   ;;  %v8695_v52 = vld [vmem:[#allocation7 + $0x141c] ss:$40 sps:$4 sm:$0xff]  }
 0x39a   :  { %v7533_v62 = vadd.f32 %v5926_v26, %v1476_v56  ;;  %v5928_v9 = vpop.f32.mrb[25].mxu0  ;;  %v8699_v26 = vld [vmem:[#allocation7 + $0x1468] ss:$40 sps:$4 sm:$0xff]  }
 0x39b   :  { %v7534_v1 = vadd.f32 %v5928_v9, %v1480_v44  ;;  %v5930_v13 = vpop.f32.mrb[26].mxu0  ;;  %6290 = vmatpush1.bf16.msra.mxu0 %v8627_v51  ;;  %v8696_v51 = vld [vmem:[#allocation7 + $0xde0] ss:$40 sps:$4 sm:$0xff]   ;;  %v8710_v9 = vld [vmem:[#allocation7 + $0xe84] ss:$40 sps:$4 sm:$0xff]  }
 0x39c   :  { %v7535_v53 = vadd.f32 %v5930_v13, %v1476_v56  ;;  %6454 = vmatpush1.bf16.msra.mxu1 %v8630_v58  ;;  %v5932_v20 = vpop.f32.mrb[27].mxu0  ;;  %6291 = vmatprep.subr.bf16.mxu0 %v8635_v47  ;;  %v8698_v56 = vld [vmem:[#allocation7 + $0xde4] ss:$40 sps:$4 sm:$0xff]   ;;  %v8704_v47 = vld [vmem:[#allocation7 + $0xe34] ss:$40 sps:$4 sm:$0xff]  }
 0x39d   :  { %v7516_v28 = vpack.c.bf16 %v7534_v1, %v7533_v62  ;;  %v7536_v17 = vadd.f32 %v5932_v20, %v1480_v44  ;;  %6455 = vmatprep.subr.bf16.mxu1 %v8638_v59  ;;  %v8693_v44 = vld [vmem:[#allocation7 + $0x1418] ss:$40 sps:$4 sm:$0xff]   ;;  %v8701_v58 = vld [vmem:[#allocation7 + $0x146c] ss:$40 sps:$4 sm:$0xff]   ;;  %v8707_v62 = vld [vmem:[#allocation7 + $0x14bc] ss:$40 sps:$4 sm:$0xff]  }
 0x39e   :  { %v8702_v59 = vld [vmem:[#allocation7 + $0xe30] ss:$40 sps:$4 sm:$0xff]   ;;  %v8708_v13 = vld [vmem:[#allocation7 + $0xe80] ss:$40 sps:$4 sm:$0xff]  }
 0x39f   :  { %6641 = vst [vmem:[#allocation10 + $0x8] sm:$0xff] %v7516_v28  ;;  %v7521_v8 = vpack.c.bf16 %v7536_v17, %v7535_v53  ;;  %6292 = vmatpush1.bf16.msra.mxu0 %v8633_v4  ;;  %v8705_v1 = vld [vmem:[#allocation7 + $0x14b8] ss:$40 sps:$4 sm:$0xff]   ;;  %v8713_v4 = vld [vmem:[#allocation7 + $0x150c] ss:$40 sps:$4 sm:$0xff]  }
 0x3a0   :  { %6456 = vmatpush1.bf16.msra.mxu1 %v8636_v54  ;;  %6293 = vmatprep.subr.bf16.mxu0 %v8641_v5  ;;  %v8716_v53 = vld [vmem:[#allocation7 + $0xed4] ss:$40 sps:$4 sm:$0xff]   ;;  %v8711_v20 = vld [vmem:[#allocation7 + $0x1508] ss:$40 sps:$4 sm:$0xff]   ;;  %v8722_v28 = vld [vmem:[#allocation7 + $0xf24] ss:$40 sps:$4 sm:$0xff]  }
 0x3a1   :  { %6646 = vst [vmem:[#allocation10 + $0x30] sm:$0xff] %v7521_v8  ;;  %6457 = vmatprep.subr.bf16.mxu1 %v8644_v60  ;;  %v8714_v54 = vld [vmem:[#allocation7 + $0xed0] ss:$40 sps:$4 sm:$0xff]   ;;  %v8719_v5 = vld [vmem:[#allocation7 + $0x155c] ss:$40 sps:$4 sm:$0xff]  }
 0x3a2   :  { %v8717_v17 = vld [vmem:[#allocation7 + $0x1558] ss:$40 sps:$4 sm:$0xff]   ;;  %v8725_v8 = vld [vmem:[#allocation7 + $0x15ac] ss:$40 sps:$4 sm:$0xff]  }
 0x3a3   :  { %6294 = vmatpush1.bf16.msra.mxu0 %v8639_v61  ;;  %v8720_v60 = vld [vmem:[#allocation7 + $0xf20] ss:$40 sps:$4 sm:$0xff]   ;;  %v8728_v61 = vld [vmem:[#allocation7 + $0xf74] ss:$40 sps:$4 sm:$0xff]  }
 0x3a4   :  { %6458 = vmatpush1.bf16.msra.mxu1 %v8642_v10  ;;  %6295 = vmatprep.subr.bf16.mxu0 %v8647_v27  ;;  %v8723_v10 = vld [vmem:[#allocation7 + $0x15a8] ss:$40 sps:$4 sm:$0xff]  }
 0x3a5   :  { %6459 = vmatprep.subr.bf16.mxu1 %v8650_v63  ;;  %v8726_v27 = vld [vmem:[#allocation7 + $0xf70] ss:$40 sps:$4 sm:$0xff]   ;;  %v8731_v63 = vld [vmem:[#allocation7 + $0x15fc] ss:$40 sps:$4 sm:$0xff]  }
 0x3a7   :  { %6296 = vmatpush1.bf16.msra.mxu0 %v8645_v34  ;;  %v8734_v34 = vld [vmem:[#allocation7 + $0xfc4] ss:$40 sps:$4 sm:$0xff]  }
 0x3a8   :  { %6460 = vmatpush1.bf16.msra.mxu1 %v8648_v30  ;;  %6297 = vmatprep.subr.bf16.mxu0 %v8653_v37  ;;  %v8729_v30 = vld [vmem:[#allocation7 + $0x15f8] ss:$40 sps:$4 sm:$0xff]  }
 0x3a9   :  { %6461 = vmatprep.subr.bf16.mxu1 %v8656_v16  ;;  %v8732_v37 = vld [vmem:[#allocation7 + $0xfc0] ss:$40 sps:$4 sm:$0xff]   ;;  %v8737_v16 = vld [vmem:[#allocation7 + $0x164c] ss:$40 sps:$4 sm:$0xff]  }
 0x3ab   :  { %6298 = vmatpush1.bf16.msra.mxu0 %v8651_v2  ;;  %v8740_v2 = vld [vmem:[#allocation7 + $0x1014] ss:$40 sps:$4 sm:$0xff]  }
 0x3ac   :  { %6462 = vmatpush1.bf16.msra.mxu1 %v8654_v21  ;;  %6299 = vmatprep.subr.bf16.mxu0 %v8659_v12  ;;  %v8929_v21 = vld [vmem:[#allocation8] sm:$0xff] }
 0x3ad   :  { %6463 = vmatprep.subr.bf16.mxu1 %v8662_v22  ;;  %v9355_v12 = vunpack.c.h.bf16 %v8929_v21  ;;  %v8743_v22 = vld [vmem:[#allocation7 + $0x169c] ss:$40 sps:$4 sm:$0xff]  }
 0x3ae   :  { %v8803_v21 = vld [vmem:[#allocation7 + $0x1424] ss:$40 sps:$4 sm:$0xff]  }
 0x3af   :  { %6300 = vmatpush1.bf16.msra.mxu0 %v8657_v24  ;;  %v8746_v24 = vld [vmem:[#allocation7 + $0x1064] ss:$40 sps:$4 sm:$0xff]  }
 0x3b0   :  { %6464 = vmatpush1.bf16.msra.mxu1 %v8660_v7  ;;  %6301 = vmatprep.subr.bf16.mxu0 %v8665_v15  ;;  %v8741_v7 = vld [vmem:[#allocation7 + $0x1698] ss:$40 sps:$4 sm:$0xff]   ;;  %v1434_v15 = vrot.slane %v9355_v12, %v9155_v18 }
 0x3b1   :  { %6465 = vmatprep.subr.bf16.mxu1 %v8668_v29  ;;  %v8744_v29 = vld [vmem:[#allocation7 + $0x1060] ss:$40 sps:$4 sm:$0xff]  }
 0x3b3   :  { %6302 = vmatpush1.bf16.msra.mxu0 %v8663_v31  ;;  %v1438_v31 = vrot.slane %v9355_v12, %v9157_v19 }
 0x3b4   :  { %6466 = vmatpush1.bf16.msra.mxu1 %v8666_v32  ;;  %6303 = vmatprep.subr.bf16.mxu0 %v8671_v11  ;;  %v8749_v32 = vld [vmem:[#allocation7 + $0x16ec] ss:$40 sps:$4 sm:$0xff]  }
 0x3b5   :  { %6467 = vmatprep.subr.bf16.mxu1 %v8674_v35  ;;  %v8752_v11 = vld [vmem:[#allocation7 + $0x10b4] ss:$40 sps:$4 sm:$0xff]   ;;  %v1484_v35 = vrot.slane %v1434_v15, %v9155_v18  ;;  %v8807_v15 = vld [vmem:[#allocation7 + $0x14c0] ss:$40 sps:$4 sm:$0xff]  }
 0x3b7   :  { %6304 = vmatpush1.bf16.msra.mxu0 %v8669_v36  ;;  %v8747_v36 = vld [vmem:[#allocation7 + $0x16e8] ss:$40 sps:$4 sm:$0xff]  }
 0x3b8   :  { %6468 = vmatpush1.bf16.msra.mxu1 %v8672_v38  ;;  %6305 = vmatprep.subr.bf16.mxu0 %v8677_v39  ;;  %v1488_v38 = vrot.slane %v1438_v31, %v9155_v18  ;;  %v8750_v39 = vld [vmem:[#allocation7 + $0x10b0] ss:$40 sps:$4 sm:$0xff]  }
 0x3b9   :  { %6469 = vmatprep.subr.bf16.mxu1 %v8680_v41  ;;  %v8755_v41 = vld [vmem:[#allocation7 + $0x173c] ss:$40 sps:$4 sm:$0xff]   ;;  %v8810_v31 = vld [vmem:[#allocation7 + $0x1510] ss:$40 sps:$4 sm:$0xff]  }
 0x3bb   :  { %6306 = vmatpush1.bf16.msra.mxu0 %v8675_v42  ;;  %v8758_v42 = vld [vmem:[#allocation7 + $0x1104] ss:$40 sps:$4 sm:$0xff]  }
 0x3bc   :  { %6470 = vmatpush1.bf16.msra.mxu1 %v8678_v33  ;;  %6307 = vmatprep.subr.bf16.mxu0 %v8683_v40 }
 0x3bd   :  { %6471 = vmatprep.subr.bf16.mxu1 %v8686_v48 }
 0x3bf   :  { %6308 = vmatpush1.bf16.msra.mxu0 %v8681_v49  ;;  %v8753_v49 = vld [vmem:[#allocation7 + $0x1738] ss:$40 sps:$4 sm:$0xff]  }
 0x3c0   :  { %6472 = vmatpush1.bf16.msra.mxu1 %v8684_v6  ;;  %6309 = vmatprep.subr.bf16.mxu0 %v8689_v50 }
 0x3c1   :  { %6473 = vmatprep.subr.bf16.mxu1 %v8692_v46  ;;  %v8756_v46 = vld [vmem:[#allocation7 + $0x1100] ss:$40 sps:$4 sm:$0xff]  }
 0x3c3   :  { %6310 = vmatpush1.bf16.msra.mxu0 %v8687_v57  ;;  %v8761_v57 = vld [vmem:[#allocation7 + $0x178c] ss:$40 sps:$4 sm:$0xff]  }
 0x3c4   :  { %6474 = vmatpush1.bf16.msra.mxu1 %v8690_v55  ;;  %6322 = vmatprep.subr.bf16.mxu0 %v8695_v52 }
 0x3c5   :  { %6475 = vmatprep.subr.bf16.mxu1 %v8698_v56  ;;  %v8764_v56 = vld [vmem:[#allocation7 + $0x1154] ss:$40 sps:$4 sm:$0xff]  }
 0x3c6   :  { %6312 = vmatmul.mubr.bf16.vlgmr.msra.gmra.mrb[28].mxu0 %v9276_v43 }
 0x3c7   :  { %6323 = vmatpush1.bf16.msra.mxu0 %v8693_v44  ;;  %6354 = vmatprep.mubr.bf16.mxu0 %v9287_v3 }
 0x3c8   :  { %6476 = vmatpush1.bf16.msra.mxu1 %v8696_v51  ;;  %6324 = vmatprep.subr.bf16.mxu0 %v8701_v58  ;;  %v8759_v58 = vld [vmem:[#allocation7 + $0x1788] ss:$40 sps:$4 sm:$0xff]  }
 0x3c9   :  { %6477 = vmatprep.subr.bf16.mxu1 %v8704_v47 }
 0x3cb   :  { %6325 = vmatpush1.bf16.msra.mxu0 %v8699_v26  ;;  %v8762_v26 = vld [vmem:[#allocation7 + $0x1150] ss:$40 sps:$4 sm:$0xff]  }
 0x3cc   :  { %6478 = vmatpush1.bf16.msra.mxu1 %v8702_v59  ;;  %6326 = vmatprep.subr.bf16.mxu0 %v8707_v62  ;;  %v8767_v59 = vld [vmem:[#allocation7 + $0x17dc] ss:$40 sps:$4 sm:$0xff]  }
 0x3cd   :  { %6479 = vmatprep.subr.bf16.mxu1 %v8710_v9  ;;  %v8770_v62 = vld [vmem:[#allocation7 + $0x11a4] ss:$40 sps:$4 sm:$0xff]   ;;  %v8765_v9 = vld [vmem:[#allocation7 + $0x17d8] ss:$40 sps:$4 sm:$0xff]  }
 0x3cf   :  { %6327 = vmatpush1.bf16.msra.mxu0 %v8705_v1  ;;  %v8768_v1 = vld [vmem:[#allocation7 + $0x11a0] ss:$40 sps:$4 sm:$0xff]  }
 0x3d0   :  { %6480 = vmatpush1.bf16.msra.mxu1 %v8708_v13  ;;  %6328 = vmatprep.subr.bf16.mxu0 %v8713_v4  ;;  %v8773_v13 = vld [vmem:[#allocation7 + $0x182c] ss:$40 sps:$4 sm:$0xff]  }
 0x3d1   :  { %6481 = vmatprep.subr.bf16.mxu1 %v8716_v53  ;;  %v8776_v4 = vld [vmem:[#allocation7 + $0x11f4] ss:$40 sps:$4 sm:$0xff]   ;;  %v8771_v53 = vld [vmem:[#allocation7 + $0x1828] ss:$40 sps:$4 sm:$0xff]  }
 0x3d3   :  { %6329 = vmatpush1.bf16.msra.mxu0 %v8711_v20  ;;  %v8774_v20 = vld [vmem:[#allocation7 + $0x11f0] ss:$40 sps:$4 sm:$0xff]  }
 0x3d4   :  { %6482 = vmatpush1.bf16.msra.mxu1 %v8714_v54  ;;  %6330 = vmatprep.subr.bf16.mxu0 %v8719_v5  ;;  %v8779_v54 = vld [vmem:[#allocation7 + $0x187c] ss:$40 sps:$4 sm:$0xff]  }
 0x3d5   :  { %6494 = vmatprep.subr.bf16.mxu1 %v8722_v28  ;;  %v8782_v5 = vld [vmem:[#allocation7 + $0x1244] ss:$40 sps:$4 sm:$0xff]   ;;  %v8777_v28 = vld [vmem:[#allocation7 + $0x1878] ss:$40 sps:$4 sm:$0xff]  }
 0x3d7   :  { %6484 = vmatmul.mubr.bf16.vlgmr.msra.gmra.mrb[8].mxu1 %v9266_v14  ;;  %6331 = vmatpush1.bf16.msra.mxu0 %v8717_v17  ;;  %v8735_v14 = vld [vmem:[#allocation7 + $0x1648] ss:$40 sps:$4 sm:$0xff]  }
 0x3d8   :  { %6495 = vmatpush1.bf16.msra.mxu1 %v8720_v60  ;;  %6526 = vmatprep.mubr.bf16.mxu1 %v9278_v45  ;;  %v8738_v45 = vld [vmem:[#allocation7 + $0x1010] ss:$40 sps:$4 sm:$0xff]   ;;  %v8780_v17 = vld [vmem:[#allocation7 + $0x1240] ss:$40 sps:$4 sm:$0xff]   ;;  %v8785_v60 = vld [vmem:[#allocation7 + $0x18cc] ss:$40 sps:$4 sm:$0xff]  }
 0x3d9   :  { %6332 = vmatprep.subr.bf16.mxu0 %v8725_v8  ;;  %6496 = vmatprep.subr.bf16.mxu1 %v8728_v61  ;;  %v8788_v8 = vld [vmem:[#allocation7 + $0x1294] ss:$40 sps:$4 sm:$0xff]   ;;  %v8783_v61 = vld [vmem:[#allocation7 + $0x18c8] ss:$40 sps:$4 sm:$0xff]  }
 0x3db   :  { %6333 = vmatpush1.bf16.msra.mxu0 %v8723_v10  ;;  %v8786_v10 = vld [vmem:[#allocation7 + $0x1290] ss:$40 sps:$4 sm:$0xff]  }
 0x3dc   :  { %6497 = vmatpush1.bf16.msra.mxu1 %v8726_v27  ;;  %6334 = vmatprep.subr.bf16.mxu0 %v8731_v63  ;;  %v8791_v27 = vld [vmem:[#allocation7 + $0x12e4] ss:$40 sps:$4 sm:$0xff]   ;;  %v8789_v63 = vld [vmem:[#allocation7 + $0x12e0] ss:$40 sps:$4 sm:$0xff]  }
 0x3dd   :  { %6498 = vmatprep.subr.bf16.mxu1 %v8734_v34  ;;  %v8794_v34 = vld [vmem:[#allocation7 + $0x1334] ss:$40 sps:$4 sm:$0xff]  }
 0x3df   :  { %6335 = vmatpush1.bf16.msra.mxu0 %v8729_v30  ;;  %v8792_v30 = vld [vmem:[#allocation7 + $0x1330] ss:$40 sps:$4 sm:$0xff]  }
 0x3e0   :  { %6499 = vmatpush1.bf16.msra.mxu1 %v8732_v37  ;;  %6336 = vmatprep.subr.bf16.mxu0 %v8737_v16  ;;  %v8797_v37 = vld [vmem:[#allocation7 + $0x1384] ss:$40 sps:$4 sm:$0xff]   ;;  %v8795_v16 = vld [vmem:[#allocation7 + $0x1380] ss:$40 sps:$4 sm:$0xff]  }
 0x3e1   :  { %6500 = vmatprep.subr.bf16.mxu1 %v8740_v2  ;;  %v8800_v2 = vld [vmem:[#allocation7 + $0x13d4] ss:$40 sps:$4 sm:$0xff]  }
 0x3e3   :  { %6337 = vmatpush1.bf16.msra.mxu0 %v8735_v14  ;;  %v8798_v14 = vld [vmem:[#allocation7 + $0x13d0] ss:$40 sps:$4 sm:$0xff]  }
 0x3e4   :  { %6501 = vmatpush1.bf16.msra.mxu1 %v8738_v45  ;;  %6338 = vmatprep.subr.bf16.mxu0 %v8743_v22  ;;  %v8801_v45 = vld [vmem:[#allocation7 + $0x1420] ss:$40 sps:$4 sm:$0xff]   ;;  %v8806_v22 = vld [vmem:[#allocation7 + $0x1474] ss:$40 sps:$4 sm:$0xff]  }
 0x3e5   :  { %6502 = vmatprep.subr.bf16.mxu1 %v8746_v24  ;;  %v8804_v24 = vld [vmem:[#allocation7 + $0x1470] ss:$40 sps:$4 sm:$0xff]  }
 0x3e7   :  { %6339 = vmatpush1.bf16.msra.mxu0 %v8741_v7  ;;  %v8809_v7 = vld [vmem:[#allocation7 + $0x14c4] ss:$40 sps:$4 sm:$0xff]  }
 0x3e8   :  { %6503 = vmatpush1.bf16.msra.mxu1 %v8744_v29  ;;  %6340 = vmatprep.subr.bf16.mxu0 %v8749_v32  ;;  %v8812_v29 = vld [vmem:[#allocation7 + $0x1514] ss:$40 sps:$4 sm:$0xff]   ;;  %v8815_v32 = vld [vmem:[#allocation7 + $0x1564] ss:$40 sps:$4 sm:$0xff]  }
 0x3e9   :  { %6504 = vmatprep.subr.bf16.mxu1 %v8752_v11  ;;  %v8813_v11 = vld [vmem:[#allocation7 + $0x1560] ss:$40 sps:$4 sm:$0xff]  }
 0x3ea   :  { %v6141_v33 = vpop.f32.mrb[4].mxu1 }
 0x3eb   :  { %v7537_v40 = vadd.f32 %v6141_v33, %v1484_v35  ;;  %v6143_v48 = vpop.f32.mrb[5].mxu1  ;;  %6341 = vmatpush1.bf16.msra.mxu0 %v8747_v36  ;;  %v8821_v36 = vld [vmem:[#allocation7 + $0x1604] ss:$40 sps:$4 sm:$0xff]   ;;  %v8830_v33 = vld [vmem:[#allocation7 + $0x16f4] ss:$40 sps:$4 sm:$0xff]  }
 0x3ec   :  { %v7538_v6 = vadd.f32 %v6143_v48, %v1488_v38  ;;  %v6145_v50 = vpop.f32.mrb[6].mxu1  ;;  %6505 = vmatpush1.bf16.msra.mxu1 %v8750_v39  ;;  %6342 = vmatprep.subr.bf16.mxu0 %v8755_v41  ;;  %v8822_v39 = vld [vmem:[#allocation7 + $0x1650] ss:$40 sps:$4 sm:$0xff]   ;;  %v8827_v41 = vld [vmem:[#allocation7 + $0x16a4] ss:$40 sps:$4 sm:$0xff]  }
 0x3ed   :  { %v7539_v55 = vadd.f32 %v6145_v50, %v1484_v35  ;;  %v6147_v52 = vpop.f32.mrb[7].mxu1  ;;  %6506 = vmatprep.subr.bf16.mxu1 %v8758_v42  ;;  %v8818_v35 = vld [vmem:[#allocation7 + $0x15b4] ss:$40 sps:$4 sm:$0xff]   ;;  %v8825_v42 = vld [vmem:[#allocation7 + $0x16a0] ss:$40 sps:$4 sm:$0xff]  }
 0x3ee   :  { %v7517_v44 = vpack.c.bf16 %v7538_v6, %v7537_v40  ;;  %v7540_v51 = vadd.f32 %v6147_v52, %v1488_v38  ;;  %v8824_v38 = vld [vmem:[#allocation7 + $0x1654] ss:$40 sps:$4 sm:$0xff]   ;;  %v8828_v40 = vld [vmem:[#allocation7 + $0x16f0] ss:$40 sps:$4 sm:$0xff]   ;;  %v8833_v48 = vld [vmem:[#allocation7 + $0x1744] ss:$40 sps:$4 sm:$0xff]  }
 0x3ef   :  { %6343 = vmatpush1.bf16.msra.mxu0 %v8753_v49  ;;  %v8831_v49 = vld [vmem:[#allocation7 + $0x1740] ss:$40 sps:$4 sm:$0xff]   ;;  %v8836_v6 = vld [vmem:[#allocation7 + $0x1794] ss:$40 sps:$4 sm:$0xff]   ;;  %v8834_v50 = vld [vmem:[#allocation7 + $0x1790] ss:$40 sps:$4 sm:$0xff]  }
 0x3f0   :  { %6642 = vst [vmem:[#allocation10 + $0x10] sm:$0xff] %v7517_v44  ;;  %v7522_v47 = vpack.c.bf16 %v7540_v51, %v7539_v55  ;;  %6507 = vmatpush1.bf16.msra.mxu1 %v8756_v46  ;;  %6344 = vmatprep.subr.bf16.mxu0 %v8761_v57  ;;  %v8839_v46 = vld [vmem:[#allocation7 + $0x17e4] ss:$40 sps:$4 sm:$0xff]   ;;  %v8837_v57 = vld [vmem:[#allocation7 + $0x17e0] ss:$40 sps:$4 sm:$0xff]  }
 0x3f1   :  { %6508 = vmatprep.subr.bf16.mxu1 %v8764_v56  ;;  %v8842_v55 = vld [vmem:[#allocation7 + $0x1834] ss:$40 sps:$4 sm:$0xff]   ;;  %v8840_v52 = vld [vmem:[#allocation7 + $0x1830] ss:$40 sps:$4 sm:$0xff]   ;;  %v8845_v56 = vld [vmem:[#allocation7 + $0x1884] ss:$40 sps:$4 sm:$0xff]  }
 0x3f2   :  { %6647 = vst [vmem:[#allocation10 + $0x38] sm:$0xff] %v7522_v47  ;;  %v8843_v44 = vld [vmem:[#allocation7 + $0x1880] ss:$40 sps:$4 sm:$0xff]   ;;  %v8848_v51 = vld [vmem:[#allocation7 + $0x18d4] ss:$40 sps:$4 sm:$0xff]   ;;  %v1442_v47 = vrot.slane %v9355_v12, %v9162_v23 }
 0x3f3   :  { %6345 = vmatpush1.bf16.msra.mxu0 %v8759_v58  ;;  %v8846_v58 = vld [vmem:[#allocation7 + $0x18d0] ss:$40 sps:$4 sm:$0xff]   ;;  %v1408_v23 = vld [vmem:[#allocation8 + $0x8] sm:$0x3] }
 0x3f4   :  { %6509 = vmatpush1.bf16.msra.mxu1 %v8762_v26  ;;  %6346 = vmatprep.subr.bf16.mxu0 %v8767_v59  ;;  %v1446_v26 = vrot.slane %v9355_v12, %v9165_v25  ;;  %v1492_v59 = vrot.slane %v1442_v47, %v9155_v18 }
 0x3f5   :  { %6510 = vmatprep.subr.bf16.mxu1 %v8770_v62 }
 0x3f6   :  { %v1496_v62 = vrot.slane %v1446_v26, %v9155_v18 }
 0x3f7   :  { %6347 = vmatpush1.bf16.msra.mxu0 %v8765_v9 }
 0x3f8   :  { %6511 = vmatpush1.bf16.msra.mxu1 %v8768_v1  ;;  %6348 = vmatprep.subr.bf16.mxu0 %v8773_v13 }
 0x3f9   :  { %6512 = vmatprep.subr.bf16.mxu1 %v8776_v4 }
 0x3fb   :  { %6349 = vmatpush1.bf16.msra.mxu0 %v8771_v53 }
 0x3fc   :  { %6513 = vmatpush1.bf16.msra.mxu1 %v8774_v20  ;;  %6350 = vmatprep.subr.bf16.mxu0 %v8779_v54 }
 0x3fd   :  { %6514 = vmatprep.subr.bf16.mxu1 %v8782_v5 }
 0x3ff   :  { %6351 = vmatpush1.bf16.msra.mxu0 %v8777_v28 }
 0x400   :  { %6515 = vmatpush1.bf16.msra.mxu1 %v8780_v17  ;;  %6352 = vmatprep.subr.bf16.mxu0 %v8785_v60  ;;  %v1411_v17 = vunpack.c.l.bf16 %v1408_v23 }
 0x401   :  { %6516 = vmatprep.subr.bf16.mxu1 %v8788_v8 }
 0x402   :  { %v1450_v25 = vrot.slane %v1411_v17, %v9155_v18  ;;  %v1454_v12 = vrot.slane %v1411_v17, %v9157_v19 }
 0x403   :  { %6353 = vmatpush1.bf16.msra.mxu0 %v8783_v61 }
 0x404   :  { %6517 = vmatpush1.bf16.msra.mxu1 %v8786_v10  ;;  %v1500_v60 = vrot.slane %v1450_v25, %v9155_v18  ;;  %v1504_v8 = vrot.slane %v1454_v12, %v9155_v18 }
 0x405   :  { %6518 = vmatprep.subr.bf16.mxu1 %v8791_v27 }
 0x406   :  { %6355 = vmatmul.mubr.bf16.vlgmr.msra.gmra.mrb[28].mxu0 %v9285_v0 }
 0x408   :  { %6519 = vmatpush1.bf16.msra.mxu1 %v8789_v63 }
 0x409   :  { %6520 = vmatprep.subr.bf16.mxu1 %v8794_v34 }
 0x40c   :  { %6521 = vmatpush1.bf16.msra.mxu1 %v8792_v30 }
 0x40d   :  { %6522 = vmatprep.subr.bf16.mxu1 %v8797_v37 }
 0x410   :  { %6523 = vmatpush1.bf16.msra.mxu1 %v8795_v16 }
 0x411   :  { %6524 = vmatprep.subr.bf16.mxu1 %v8800_v2 }
 0x414   :  { %6525 = vmatpush1.bf16.msra.mxu1 %v8798_v14 }
 0x415   :  { %6537 = vmatprep.subr.bf16.mxu1 %v8803_v21 }
 0x417   :  { %6527 = vmatmul.mubr.bf16.vlgmr.msra.gmra.mrb[8].mxu1 %v9276_v43  ;;  %v8816_v43 = vld [vmem:[#allocation7 + $0x15b0] ss:$40 sps:$4 sm:$0xff]  }
 0x418   :  { %6538 = vmatpush1.bf16.msra.mxu1 %v8801_v45  ;;  %6569 = vmatprep.mubr.bf16.mxu1 %v9287_v3  ;;  %v8819_v3 = vld [vmem:[#allocation7 + $0x1600] ss:$40 sps:$4 sm:$0xff]  }
 0x419   :  { %6539 = vmatprep.subr.bf16.mxu1 %v8806_v22 }
 0x41c   :  { %6540 = vmatpush1.bf16.msra.mxu1 %v8804_v24 }
 0x41d   :  { %6541 = vmatprep.subr.bf16.mxu1 %v8809_v7 }
 0x420   :  { %6542 = vmatpush1.bf16.msra.mxu1 %v8807_v15 }
 0x421   :  { %6543 = vmatprep.subr.bf16.mxu1 %v8812_v29 }
 0x424   :  { %6544 = vmatpush1.bf16.msra.mxu1 %v8810_v31 }
 0x425   :  { %6545 = vmatprep.subr.bf16.mxu1 %v8815_v32 }
 0x428   :  { %6546 = vmatpush1.bf16.msra.mxu1 %v8813_v11 }
 0x429   :  { %6547 = vmatprep.subr.bf16.mxu1 %v8818_v35 }
 0x42c   :  { %6548 = vmatpush1.bf16.msra.mxu1 %v8816_v43 }
 0x42d   :  { %6549 = vmatprep.subr.bf16.mxu1 %v8821_v36 }
 0x430   :  { %6550 = vmatpush1.bf16.msra.mxu1 %v8819_v3 }
 0x431   :  { %6551 = vmatprep.subr.bf16.mxu1 %v8824_v38 }
 0x434   :  { %6552 = vmatpush1.bf16.msra.mxu1 %v8822_v39 }
 0x435   :  { %6553 = vmatprep.subr.bf16.mxu1 %v8827_v41 }
 0x438   :  { %6554 = vmatpush1.bf16.msra.mxu1 %v8825_v42 }
 0x439   :  { %6555 = vmatprep.subr.bf16.mxu1 %v8830_v33 }
 0x43c   :  { %6556 = vmatpush1.bf16.msra.mxu1 %v8828_v40 }
 0x43d   :  { %6557 = vmatprep.subr.bf16.mxu1 %v8833_v48 }
 0x440   :  { %6558 = vmatpush1.bf16.msra.mxu1 %v8831_v49 }
 0x441   :  { %6559 = vmatprep.subr.bf16.mxu1 %v8836_v6 }
 0x444   :  { %6560 = vmatpush1.bf16.msra.mxu1 %v8834_v50 }
 0x445   :  { %6561 = vmatprep.subr.bf16.mxu1 %v8839_v46 }
 0x448   :  { %6562 = vmatpush1.bf16.msra.mxu1 %v8837_v57 }
 0x449   :  { %6563 = vmatprep.subr.bf16.mxu1 %v8842_v55 }
 0x44c   :  { %6564 = vmatpush1.bf16.msra.mxu1 %v8840_v52 }
 0x44d   :  { %6565 = vmatprep.subr.bf16.mxu1 %v8845_v56 }
 0x450   :  { %6566 = vmatpush1.bf16.msra.mxu1 %v8843_v44 }
 0x451   :  { %6567 = vmatprep.subr.bf16.mxu1 %v8848_v51 }
 0x454   :  { %6568 = vmatpush1.bf16.msra.mxu1 %v8846_v58 }
 0x457   :  { %6570 = vmatmul.mubr.bf16.vlgmr.msra.gmra.mrb[8].mxu1 %v9285_v0 }
 0x4d9   :  { %v6356_v9 = vpop.f32.mrb[28].mxu0 }
 0x4da   :  { %v7541_v1 = vadd.f32 %v6356_v9, %v1492_v59  ;;  %v6358_v13 = vpop.f32.mrb[29].mxu0 }
 0x4db   :  { %v7542_v4 = vadd.f32 %v6358_v13, %v1496_v62  ;;  %v6360_v53 = vpop.f32.mrb[30].mxu0 }
 0x4dc   :  { %v7543_v20 = vadd.f32 %v6360_v53, %v1492_v59  ;;  %v6362_v54 = vpop.f32.mrb[31].mxu0 }
 0x4dd   :  { %v7518_v5 = vpack.c.bf16 %v7542_v4, %v7541_v1  ;;  %v7544_v28 = vadd.f32 %v6362_v54, %v1496_v62 }
 0x4df   :  { %6643 = vst [vmem:[#allocation10 + $0x18] sm:$0xff] %v7518_v5  ;;  %v7523_v0 = vpack.c.bf16 %v7544_v28, %v7543_v20 }
 0x4e1   :  { %6648 = vst [vmem:[#allocation10 + $0x40] sm:$0xff] %v7523_v0 }
 0x52a   :  { %v6571_v61 = vpop.f32.mrb[8].mxu1 }
 0x52b   :  { %v7545_v10 = vadd.f32 %v6571_v61, %v1500_v60  ;;  %v6573_v27 = vpop.f32.mrb[9].mxu1 }
 0x52c   :  { %v7546_v63 = vadd.f32 %v6573_v27, %v1504_v8  ;;  %v6575_v34 = vpop.f32.mrb[10].mxu1 }
 0x52d   :  { %v7547_v30 = vadd.f32 %v6575_v34, %v1500_v60  ;;  %v6577_v37 = vpop.f32.mrb[11].mxu1 }
 0x52e   :  { %v7519_v16 = vpack.c.bf16 %v7546_v63, %v7545_v10  ;;  %v7548_v2 = vadd.f32 %v6577_v37, %v1504_v8 }
 0x530   :  { %6644 = vst [vmem:[#allocation10 + $0x20] sm:$0xff] %v7519_v16  ;;  %v7524_v14 = vpack.c.bf16 %v7548_v2, %v7547_v30 }
 0x532   :  { %6649 = vst [vmem:[#allocation10 + $0x48] sm:$0xff] %v7524_v14 }
 0x533   :  { %9029 = shalt.err (!%p9026_p8)
}
 0x534   :  { %s9030_s22 = scalar_lea.hbm %s9397_s5, 1280 }
 0x535   :  { %p9031_p9 = scmp.ne.s32.totalorder %s9397_s5, %s9030_s22  ;;  %p9034_p10 = scmp.lt.u32.totalorder %s9030_s22, %s9397_s5 }
 0x537   :  { %p9036_p11 = pnand %p9034_p10, %p9031_p9 }
 0x539   :  { %9039 = shalt.err (!%p9036_p11)
}
 0x53a   :  { %6661 = dma.vmem_to_hbm [thread:$0]  %s6656_s4, 1280, %s9397_s5, [#allocation4], %s9050_s2, %s9050_s2, %s9051_s15  }
 0x53b   :  { %9046 = dma.done.wait [#allocation4], 1280  }
 0x53c   :  { %9047 = vsyncadd [#allocation4], 4294966016 }
 0x53d   :  { %6665 = vsyncpa [#allocation3], 1 }
 0x53e   :  { %6666 = vsyncpa [#allocation6], 1 }
 0x53f   :  { %6667 = vsyncpa [#allocation9], 1 }
 0x540   :  { %6668 = vsyncpa [#allocation4], 1 }

</bundles_post_ra>
